<compile_context>
chip_gen: v5e
topology: v5e:2x2
jax: 0.10.0
libtpu: 0.0.40
codegen_flags: <defaults>
</compile_context>

<pallas_src>
import functools

import numpy as np
import jax
import jax.numpy as jnp
from jax.experimental import pallas as pl
from jax.experimental.pallas import tpu as pltpu

# ----------------------- config (ALIGNNConfig defaults) ----------------------
ATOM_IN      = 8    # atom_input_features
EDGE_BINS    = 16   # edge_input_features    (RBF bins, vmin=0,  vmax=8)
TRIPLET_BINS = 16   # triplet_input_features (RBF bins, vmin=-1, vmax=1)
EMBED        = 16   # embedding_features
HIDDEN       = 32   # hidden_features
N_ALIGNN     = 2    # alignn_layers
N_GCN        = 2    # gcn_layers
OUT_FEATS    = 1    # output_features
N_EGC        = 2 * N_ALIGNN + N_GCN          # 6 EdgeGatedGraphConv blocks total

EDGE_GAMMA  = (EDGE_BINS - 1) / 8.0          # 1 / mean(diff(linspace(0, 8, bins)))
ANGLE_GAMMA = (TRIPLET_BINS - 1) / 2.0       # 1 / mean(diff(linspace(-1, 1, bins)))

P128_LAYER_ROWS = HIDDEN + 1                 # [Wx (H,4H) ; bx (1,4H)] per EGC layer
P128_ROWS = N_EGC * P128_LAYER_ROWS          # 198


# -------------------------- p32 slab layout (static) -------------------------
def _p32_layout():
    lay = [
        ("atom_W", (ATOM_IN, HIDDEN)),       ("atom_pb", (3, HIDDEN)),
        ("e1_W", (EDGE_BINS, EMBED)),        ("e1_pb", (3, EMBED)),
        ("e2_W", (EMBED, HIDDEN)),           ("e2_pb", (3, HIDDEN)),
        ("t1_W", (TRIPLET_BINS, EMBED)),     ("t1_pb", (3, EMBED)),
        ("t2_W", (EMBED, HIDDEN)),           ("t2_pb", (3, HIDDEN)),
        ("ecent", (1, EDGE_BINS)),           ("acent", (1, TRIPLET_BINS)),
    ]
    for li in range(N_EGC):
        lay.append(("We%d" % li, (HIDDEN, HIDDEN)))
        # aux rows: [edge_gate bias; bn_node scale; bn_node shift; bn_edge scale; bn_edge shift]
        lay.append(("aux%d" % li, (5, HIDDEN)))
    lay += [("fc_W", (HIDDEN, OUT_FEATS)), ("fc_b", (1, OUT_FEATS))]
    return lay


def _p32_offsets():
    off, r = {}, 0
    for name, (nr, nc) in _p32_layout():
        off[name] = (r, nr, nc)
        r += nr
    return off, r


# ------------------------------ fused kernel ---------------------------------
def _fused_alignn_kernel(
    feat_ref,   # (N+E+T, ATOM_IN)  features of the current graph
    adj_ref,    # (2E+2T, maxW)     stacked one-hot incidence [Sg;Dg] and [Slg;Dlg]
    p128_ref,   # (P128_ROWS, 4H)   per-layer fused EGC x-weights
    p32_ref,    # (rows32, H)       everything else
    out_ref,    # (1, OUT_FEATS)
    *, n_pg, e_pg, t_pg, hidden, n_alignn, n_gcn, edge_gamma, angle_gamma, off32,
):
    H = hidden
    f32, bf16 = jnp.float32, jnp.bfloat16

    def p32(name):
        r, nr, nc = off32[name]
        return p32_ref[r:r + nr, 0:nc]                 # static slice -> small load

    def dot16(a, b):
        # bf16 MXU operands, f32 accumulation (elementwise math stays f32)
        return jnp.dot(a.astype(bf16), b.astype(bf16), preferred_element_type=f32)

    def sigmoid(v):
        # single EUP op, stable for large |v|
        return 0.5 * jnp.tanh(0.5 * v) + 0.5

    def silu(v):
        return v * sigmoid(v)

    def mlp(v, wname, pbname):
        # Linear -> LayerNorm -> SiLU   (pb rows: bias, ln_gamma, ln_beta)
        PB = p32(pbname)
        h = dot16(v, p32(wname)) + PB[0:1]
        mu = jnp.mean(h, axis=-1, keepdims=True)
        d = h - mu
        var = jnp.mean(d * d, axis=-1, keepdims=True)
        hn = d * jax.lax.rsqrt(var + 1e-5) * PB[1:2] + PB[2:3]
        return silu(hn)

    def rbf(d, centers, gamma):
        diff = d - centers                              # (rows,1)-(1,bins) -> (rows,bins)
        return jnp.exp(-gamma * diff * diff)

    # ---- unpack features of this graph --------------------------------------
    atom  = feat_ref[0:n_pg, :]                                    # (N, ATOM_IN)
    bond  = feat_ref[n_pg:n_pg + e_pg, 0:1]                        # (E, 1)
    angle = feat_ref[n_pg + e_pg:n_pg + e_pg + t_pg, 0:1]          # (T, 1)

    # ---- graph incidence (stacked [S;D]) + scatter transposes, hoisted ------
    SDg_f  = adj_ref[0:2 * e_pg, 0:n_pg]                           # (2E, N)
    SDlg_f = adj_ref[2 * e_pg:2 * e_pg + 2 * t_pg, 0:e_pg]         # (2T, E)
    SDg,  DgT  = SDg_f.astype(bf16),  SDg_f[e_pg:, :].T.astype(bf16)    # (2E,N),(N,E)
    SDlg, DlgT = SDlg_f.astype(bf16), SDlg_f[t_pg:, :].T.astype(bf16)   # (2T,E),(E,T)

    # ---- embeddings ----------------------------------------------------------
    x = mlp(atom, "atom_W", "atom_pb")                             # (N, H)
    y = rbf(bond, p32("ecent"), edge_gamma)                        # (E, bins)
    y = mlp(y, "e1_W", "e1_pb")
    y = mlp(y, "e2_W", "e2_pb")                                    # (E, H)
    z = rbf(angle, p32("acent"), angle_gamma)                      # (T, bins)
    z = mlp(z, "t1_W", "t1_pb")
    z = mlp(z, "t2_W", "t2_pb")                                    # (T, H)

    def egc(li, xin, yin, SD, DT, ne):
        """EdgeGatedGraphConv (residual=True). Per-layer static slab slices."""
        r0 = li * (H + 1)
        Wx = p128_ref[r0:r0 + H, :]                                # (H, 4H)
        bx = p128_ref[r0 + H:r0 + H + 1, :]                        # (1, 4H)
        We = p32("We%d" % li)                                      # (H, H)
        aux = p32("aux%d" % li)                                    # (5, H)
        # fused x-linear, column order: [dst_update | src_gate | dst_gate | src_update]
        xw = dot16(xin, Wx) + bx                                   # (Nx, 4H) lane-dense
        yw = dot16(yin, We) + aux[0:1]                             # (ne, H)
        gsd = dot16(SD, xw)                                        # one gather matmul
        gs, gd = gsd[0:ne], gsd[ne:2 * ne]                         # src-/dst-gathered
        m = gs[:, H:2 * H] + gd[:, 2 * H:3 * H] + yw               # (ne, H)
        sg = sigmoid(m)
        pre = jnp.concatenate([gs[:, 0:H] * sg, sg], axis=-1)      # (ne, 2H)
        scat = dot16(DT, pre)                                      # scatter-sum (Nx, 2H)
        h = scat[:, 0:H] / (scat[:, H:2 * H] + 1e-6)               # exact divide
        xu = xw[:, 3 * H:4 * H] + h
        # eval-mode BatchNorm folded to affine, SiLU, residual
        x_out = xin + silu(xu * aux[1:2] + aux[2:3])
        y_out = yin + silu(m * aux[3:4] + aux[4:5])
        return x_out, y_out

    li = 0
    for _ in range(n_alignn):            # ALIGNNConv: node update on g, edge update on lg
        x, m = egc(li, x, y, SDg, DgT, e_pg); li += 1
        y, z = egc(li, m, z, SDlg, DlgT, t_pg); li += 1
    for _ in range(n_gcn):               # plain EdgeGatedGraphConv on g
        x, y = egc(li, x, y, SDg, DgT, e_pg); li += 1

    # ---- AvgPooling over this graph's nodes + fc, link='identity' ------------
    hg = jnp.mean(x, axis=0, keepdims=True)                        # (1, H)
    out_ref[...] = (jnp.dot(hg, p32("fc_W"), preferred_element_type=f32)
                    + p32("fc_b"))


# ------------------------------- forward wrapper -----------------------------
def alignn4inverse_forward(params, graph, atom_features, bondlength, angle_features):
    f32 = jnp.float32
    G, n_pg = graph["num_graphs"], graph["n_pg"]
    e_pg, t_pg = graph["e_pg"], graph["t_pg"]
    r_feat = n_pg + e_pg + t_pg

    # pack per-graph features into one slab (1 DMA instead of 3)
    af = atom_features.astype(f32).reshape(G, n_pg, ATOM_IN)
    bl = bondlength.astype(f32).reshape(G, e_pg, 1)
    an = angle_features.astype(f32).reshape(G, t_pg, 1)
    feat = jnp.zeros((G, r_feat, ATOM_IN), f32)
    feat = feat.at[:, 0:n_pg, :].set(af)
    feat = feat.at[:, n_pg:n_pg + e_pg, 0:1].set(bl)
    feat = feat.at[:, n_pg + e_pg:, 0:1].set(an)

    adj = graph["adj"]                                  # (G, 2E+2T, maxW)
    p128, p32 = params["p128"], params["p32"]
    off32, _ = _p32_offsets()

    kern = functools.partial(
        _fused_alignn_kernel,
        n_pg=n_pg, e_pg=e_pg, t_pg=t_pg, hidden=HIDDEN,
        n_alignn=N_ALIGNN, n_gcn=N_GCN,
        edge_gamma=float(EDGE_GAMMA), angle_gamma=float(ANGLE_GAMMA),
        off32=off32,
    )

    out = pl.pallas_call(
        kern,
        grid=(G,),
        in_specs=[
            pl.BlockSpec((None, r_feat, ATOM_IN), lambda i: (i, 0, 0)),
            pl.BlockSpec((None, adj.shape[1], adj.shape[2]), lambda i: (i, 0, 0)),
            pl.BlockSpec(p128.shape, lambda i: (0, 0)),
            pl.BlockSpec(p32.shape, lambda i: (0, 0)),
        ],
        out_specs=pl.BlockSpec((None, 1, OUT_FEATS), lambda i: (i, 0, 0)),
        out_shape=jax.ShapeDtypeStruct((G, 1, OUT_FEATS), jnp.float32),
        compiler_params=pltpu.CompilerParams(
            dimension_semantics=("parallel",),          # v7x: one graph per TensorCore
            vmem_limit_bytes=32 * 1024 * 1024,
        ),
    )(feat, adj, p128, p32)
    return jnp.squeeze(out)


# ------------------------------ parameter init -------------------------------
def _init_linear(key, fin, fout):
    k1, k2 = jax.random.split(key)
    lim = 1.0 / np.sqrt(fin)
    w = np.asarray(jax.random.uniform(k1, (fin, fout), jnp.float32, -lim, lim))
    b = np.asarray(jax.random.uniform(k2, (fout,), jnp.float32, -lim, lim))
    return w, b


def _init_mlp(key, fin, fout):
    w, b = _init_linear(key, fin, fout)
    pb = np.stack([b, np.ones((fout,), np.float32), np.zeros((fout,), np.float32)])
    return w, pb


def init_params(key):
    keys = jax.random.split(key, 6 + N_EGC)
    entries = {}
    entries["atom_W"], entries["atom_pb"] = _init_mlp(keys[0], ATOM_IN, HIDDEN)
    entries["e1_W"], entries["e1_pb"] = _init_mlp(keys[1], EDGE_BINS, EMBED)
    entries["e2_W"], entries["e2_pb"] = _init_mlp(keys[2], EMBED, HIDDEN)
    entries["t1_W"], entries["t1_pb"] = _init_mlp(keys[3], TRIPLET_BINS, EMBED)
    entries["t2_W"], entries["t2_pb"] = _init_mlp(keys[4], EMBED, HIDDEN)
    entries["ecent"] = np.linspace(0.0, 8.0, EDGE_BINS, dtype=np.float32).reshape(1, -1)
    entries["acent"] = np.linspace(-1.0, 1.0, TRIPLET_BINS, dtype=np.float32).reshape(1, -1)

    # eval-mode BN folded to affine: scale = gamma/sqrt(var+eps), shift = beta - mean*scale
    bn_scale = np.float32(1.0 / np.sqrt(1.0 + 1e-5))

    p128 = np.zeros((P128_ROWS, 4 * HIDDEN), np.float32)
    for li in range(N_EGC):
        ks = jax.random.split(keys[5 + li], 5)
        # PyTorch module order: src_gate, dst_gate, edge_gate, dst_update, src_update
        w_sg, b_sg = _init_linear(ks[0], HIDDEN, HIDDEN)
        w_dg, b_dg = _init_linear(ks[1], HIDDEN, HIDDEN)
        w_eg, b_eg = _init_linear(ks[2], HIDDEN, HIDDEN)
        w_du, b_du = _init_linear(ks[3], HIDDEN, HIDDEN)
        w_su, b_su = _init_linear(ks[4], HIDDEN, HIDDEN)
        # fused lane-dense order: [dst_update | src_gate | dst_gate | src_update]
        Wx = np.concatenate([w_du, w_sg, w_dg, w_su], axis=1)
        bx = np.concatenate([b_du, b_sg, b_dg, b_su])
        r0 = li * P128_LAYER_ROWS
        p128[r0:r0 + HIDDEN, :] = Wx
        p128[r0 + HIDDEN, :] = bx
        entries["We%d" % li] = w_eg
        entries["aux%d" % li] = np.stack([
            b_eg,
            np.full((HIDDEN,), bn_scale, np.float32), np.zeros((HIDDEN,), np.float32),
            np.full((HIDDEN,), bn_scale, np.float32), np.zeros((HIDDEN,), np.float32),
        ])

    fc_w, fc_b = _init_linear(keys[5 + N_EGC], HIDDEN, OUT_FEATS)
    entries["fc_W"] = fc_w
    entries["fc_b"] = fc_b.reshape(1, OUT_FEATS)

    off, total_rows = _p32_offsets()
    p32 = np.zeros((total_rows, HIDDEN), np.float32)
    for name, (r, nr, nc) in off.items():
        arr = entries[name]
        assert arr.shape == (nr, nc), (name, arr.shape, (nr, nc))
        p32[r:r + nr, 0:nc] = arr

    return {"p128": jnp.asarray(p128), "p32": jnp.asarray(p32)}


# --------------------------------- graph build --------------------------------
def build_graph(num_graphs=2, nodes_per_graph=4):
    """Homogeneous batch of identical complete directed graphs + line graphs."""
    src, dst = [], []
    for u in range(nodes_per_graph):
        for v in range(nodes_per_graph):
            if u != v:
                src.append(u); dst.append(v)
    src, dst = np.asarray(src), np.asarray(dst)
    e_pg = len(src)

    # line graph: lg node i == crystal-graph edge i; lg edge (e1 -> e2) iff dst(e1)==src(e2)
    lsrc, ldst = [], []
    for e1 in range(e_pg):
        for e2 in range(e_pg):
            if e1 != e2 and dst[e1] == src[e2]:
                lsrc.append(e1); ldst.append(e2)
    lsrc, ldst = np.asarray(lsrc), np.asarray(ldst)
    t_pg = len(lsrc)

    def onehot(idx, n):
        m = np.zeros((len(idx), n), np.float32)
        m[np.arange(len(idx)), idx] = 1.0
        return m

    SDg = np.concatenate([onehot(src, nodes_per_graph), onehot(dst, nodes_per_graph)], axis=0)
    SDlg = np.concatenate([onehot(lsrc, e_pg), onehot(ldst, e_pg)], axis=0)

    w = max(nodes_per_graph, e_pg)
    r = 2 * e_pg + 2 * t_pg
    adj1 = np.zeros((r, w), np.float32)
    adj1[0:2 * e_pg, 0:nodes_per_graph] = SDg
    adj1[2 * e_pg:, 0:e_pg] = SDlg
    adj = np.broadcast_to(adj1, (num_graphs, r, w)).copy()

    return {"adj": jnp.asarray(adj), "num_graphs": num_graphs,
            "n_pg": nodes_per_graph, "e_pg": e_pg, "t_pg": t_pg}


# ------------------------------------ main -------------------------------------
if __name__ == "__main__":
    key = jax.random.PRNGKey(0)
    k_param, k_atom, k_bond, k_angle = jax.random.split(key, 4)

    graph = build_graph(num_graphs=2, nodes_per_graph=4)
    G = graph["num_graphs"]
    N = G * graph["n_pg"]          # 8 atoms
    E = G * graph["e_pg"]          # 24 bonds
    T = G * graph["t_pg"]          # 72 triplets

    params = init_params(k_param)

    # forward inputs (inverse-design signature: features given explicitly)
    atom_features = jax.random.normal(k_atom, (N, ATOM_IN), jnp.float32)
    bondlength = jax.random.uniform(k_bond, (E,), jnp.float32, 0.5, 3.0)
    angle_features = jax.random.uniform(k_angle, (T,), jnp.float32, -1.0, 1.0)

    out = alignn4inverse_forward(params, graph, atom_features, bondlength, angle_features)
    out = jax.block_until_ready(out)

    assert out.shape == (2,), out.shape
    assert bool(jnp.all(jnp.isfinite(out)))
    print("KERNEL_OK")
</pallas_src>

<mosaic_0001>
module attributes {stable_mosaic.version = 11 : i64} {
  func.func @_fused_alignn_kernel(%arg0: i32, %arg1: memref<1x52x8xf32, #tpu.memory_space<vmem>>, %arg2: memref<1x96x12xf32, #tpu.memory_space<vmem>>, %arg3: memref<198x128xf32, #tpu.memory_space<vmem>>, %arg4: memref<344x32xf32, #tpu.memory_space<vmem>>, %arg5: memref<1x1x1xf32, #tpu.memory_space<vmem>>) attributes {dimension_semantics = [#tpu.dimension_semantics<parallel>], iteration_bounds = array<i64: 2>, scalar_prefetch = 0 : i64, scratch_operands = 0 : i64, tpu.core_type = #tpu.core_type<tc>, window_params = [{transform_indices = @transform_0, window_bounds = array<i64: 1, 52, 8>}, {transform_indices = @transform_1, window_bounds = array<i64: 1, 96, 12>}, {pipeline_mode = #tpu.pipeline_mode<synchronous>, transform_indices = @transform_2, window_bounds = array<i64: 198, 128>}, {pipeline_mode = #tpu.pipeline_mode<synchronous>, transform_indices = @transform_3, window_bounds = array<i64: 344, 32>}, {transform_indices = @transform_4, window_bounds = array<i64: 1, 1, 1>}]} {
    %c0 = arith.constant 0 : index
    %c0_0 = arith.constant 0 : index
    %c0_1 = arith.constant 0 : index
    %0 = vector.load %arg1[%c0, %c0_0, %c0_1] : memref<1x52x8xf32, #tpu.memory_space<vmem>>, vector<1x4x8xf32>
    %1 = vector.shape_cast %0 : vector<1x4x8xf32> to vector<4x8xf32>
    %c0_2 = arith.constant 0 : index
    %c4 = arith.constant 4 : index
    %c0_3 = arith.constant 0 : index
    %2 = vector.load %arg1[%c0_2, %c4, %c0_3] : memref<1x52x8xf32, #tpu.memory_space<vmem>>, vector<1x12x1xf32>
    %3 = vector.shape_cast %2 : vector<1x12x1xf32> to vector<12x1xf32>
    %c0_4 = arith.constant 0 : index
    %c16 = arith.constant 16 : index
    %c0_5 = arith.constant 0 : index
    %4 = vector.load %arg1[%c0_4, %c16, %c0_5] : memref<1x52x8xf32, #tpu.memory_space<vmem>>, vector<1x36x1xf32>
    %5 = vector.shape_cast %4 : vector<1x36x1xf32> to vector<36x1xf32>
    %c0_6 = arith.constant 0 : index
    %c0_7 = arith.constant 0 : index
    %c0_8 = arith.constant 0 : index
    %6 = vector.load %arg2[%c0_6, %c0_7, %c0_8] : memref<1x96x12xf32, #tpu.memory_space<vmem>>, vector<1x24x4xf32>
    %7 = vector.shape_cast %6 : vector<1x24x4xf32> to vector<24x4xf32>
    %c0_9 = arith.constant 0 : index
    %c24 = arith.constant 24 : index
    %c0_10 = arith.constant 0 : index
    %8 = vector.load %arg2[%c0_9, %c24, %c0_10] : memref<1x96x12xf32, #tpu.memory_space<vmem>>, vector<1x72x12xf32>
    %9 = vector.shape_cast %8 : vector<1x72x12xf32> to vector<72x12xf32>
    %10 = arith.truncf %7 : vector<24x4xf32> to vector<24x4xbf16>
    %11 = vector.extract_strided_slice %7 {offsets = [12, 0], sizes = [12, 4], strides = [1, 1]} : vector<24x4xf32> to vector<12x4xf32>
    %12 = tpu.transpose %11, [1, 0] : vector<12x4xf32> -> vector<4x12xf32>
    %13 = arith.truncf %12 : vector<4x12xf32> to vector<4x12xbf16>
    %14 = arith.truncf %9 : vector<72x12xf32> to vector<72x12xbf16>
    %15 = vector.extract_strided_slice %9 {offsets = [36, 0], sizes = [36, 12], strides = [1, 1]} : vector<72x12xf32> to vector<36x12xf32>
    %16 = tpu.transpose %15, [1, 0] : vector<36x12xf32> -> vector<12x36xf32>
    %17 = arith.truncf %16 : vector<12x36xf32> to vector<12x36xbf16>
    %c8 = arith.constant 8 : index
    %c0_11 = arith.constant 0 : index
    %18 = vector.load %arg4[%c8, %c0_11] : memref<344x32xf32, #tpu.memory_space<vmem>>, vector<3x32xf32>
    %c0_12 = arith.constant 0 : index
    %c0_13 = arith.constant 0 : index
    %19 = vector.load %arg4[%c0_12, %c0_13] : memref<344x32xf32, #tpu.memory_space<vmem>>, vector<8x32xf32>
    %20 = arith.truncf %1 : vector<4x8xf32> to vector<4x8xbf16>
    %21 = arith.truncf %19 : vector<8x32xf32> to vector<8x32xbf16>
    %cst = arith.constant dense<0.000000e+00> : vector<4x32xf32>
    %22 = tpu.matmul %20, %21, %cst {dimension_numbers = #tpu.dot_dimension_numbers<[1], [0], [0], [1], [0, 0, 1, 1], [], []>} : vector<4x8xbf16>, vector<8x32xbf16>, vector<4x32xf32> -> vector<4x32xf32>
    %23 = vector.extract_strided_slice %18 {offsets = [0, 0], sizes = [1, 32], strides = [1, 1]} : vector<3x32xf32> to vector<1x32xf32>
    %24 = vector.broadcast %23 : vector<1x32xf32> to vector<4x32xf32>
    %25 = arith.addf %22, %24 : vector<4x32xf32>
    %cst_14 = arith.constant dense<0.000000e+00> : vector<4xf32>
    %26 = vector.multi_reduction <add>, %25, %cst_14 [1] : vector<4x32xf32> to vector<4xf32>
    %27 = vector.shape_cast %26 : vector<4xf32> to vector<4x1xf32>
    %cst_15 = arith.constant 3.200000e+01 : f32
    %28 = vector.broadcast %cst_15 : f32 to vector<4x1xf32>
    %29 = arith.divf %27, %28 : vector<4x1xf32>
    %30 = vector.broadcast %29 : vector<4x1xf32> to vector<4x32xf32>
    %31 = arith.subf %25, %30 : vector<4x32xf32>
    %32 = arith.mulf %31, %31 : vector<4x32xf32>
    %cst_16 = arith.constant dense<0.000000e+00> : vector<4xf32>
    %33 = vector.multi_reduction <add>, %32, %cst_16 [1] : vector<4x32xf32> to vector<4xf32>
    %34 = vector.shape_cast %33 : vector<4xf32> to vector<4x1xf32>
    %cst_17 = arith.constant 3.200000e+01 : f32
    %35 = vector.broadcast %cst_17 : f32 to vector<4x1xf32>
    %36 = arith.divf %34, %35 : vector<4x1xf32>
    %cst_18 = arith.constant 9.99999974E-6 : f32
    %37 = vector.broadcast %cst_18 : f32 to vector<4x1xf32>
    %38 = arith.addf %36, %37 : vector<4x1xf32>
    %39 = math.rsqrt %38 : vector<4x1xf32>
    %40 = vector.broadcast %39 : vector<4x1xf32> to vector<4x32xf32>
    %41 = arith.mulf %31, %40 : vector<4x32xf32>
    %42 = vector.extract_strided_slice %18 {offsets = [1, 0], sizes = [1, 32], strides = [1, 1]} : vector<3x32xf32> to vector<1x32xf32>
    %43 = vector.broadcast %42 : vector<1x32xf32> to vector<4x32xf32>
    %44 = arith.mulf %41, %43 : vector<4x32xf32>
    %45 = vector.extract_strided_slice %18 {offsets = [2, 0], sizes = [1, 32], strides = [1, 1]} : vector<3x32xf32> to vector<1x32xf32>
    %46 = vector.broadcast %45 : vector<1x32xf32> to vector<4x32xf32>
    %47 = arith.addf %44, %46 : vector<4x32xf32>
    %cst_19 = arith.constant 5.000000e-01 : f32
    %48 = vector.broadcast %cst_19 : f32 to vector<4x32xf32>
    %49 = arith.mulf %48, %47 : vector<4x32xf32>
    %50 = math.tanh %49 : vector<4x32xf32>
    %cst_20 = arith.constant 5.000000e-01 : f32
    %51 = vector.broadcast %cst_20 : f32 to vector<4x32xf32>
    %52 = arith.mulf %51, %50 : vector<4x32xf32>
    %cst_21 = arith.constant 5.000000e-01 : f32
    %53 = vector.broadcast %cst_21 : f32 to vector<4x32xf32>
    %54 = arith.addf %52, %53 : vector<4x32xf32>
    %55 = arith.mulf %47, %54 : vector<4x32xf32>
    %c87 = arith.constant 87 : index
    %c0_22 = arith.constant 0 : index
    %56 = vector.load %arg4[%c87, %c0_22] : memref<344x32xf32, #tpu.memory_space<vmem>>, vector<1x16xf32>
    %57 = vector.broadcast %3 : vector<12x1xf32> to vector<12x16xf32>
    %58 = vector.broadcast %56 : vector<1x16xf32> to vector<12x16xf32>
    %59 = arith.subf %57, %58 : vector<12x16xf32>
    %cst_23 = arith.constant -1.875000e+00 : f32
    %60 = vector.broadcast %cst_23 : f32 to vector<12x16xf32>
    %61 = arith.mulf %60, %59 : vector<12x16xf32>
    %62 = arith.mulf %61, %59 : vector<12x16xf32>
    %63 = math.exp %62 : vector<12x16xf32>
    %c27 = arith.constant 27 : index
    %c0_24 = arith.constant 0 : index
    %64 = vector.load %arg4[%c27, %c0_24] : memref<344x32xf32, #tpu.memory_space<vmem>>, vector<3x16xf32>
    %c11 = arith.constant 11 : index
    %c0_25 = arith.constant 0 : index
    %65 = vector.load %arg4[%c11, %c0_25] : memref<344x32xf32, #tpu.memory_space<vmem>>, vector<16x16xf32>
    %66 = arith.truncf %63 : vector<12x16xf32> to vector<12x16xbf16>
    %67 = arith.truncf %65 : vector<16x16xf32> to vector<16x16xbf16>
    %cst_26 = arith.constant dense<0.000000e+00> : vector<12x16xf32>
    %68 = tpu.matmul %66, %67, %cst_26 {dimension_numbers = #tpu.dot_dimension_numbers<[1], [0], [0], [1], [0, 0, 1, 1], [], []>} : vector<12x16xbf16>, vector<16x16xbf16>, vector<12x16xf32> -> vector<12x16xf32>
    %69 = vector.extract_strided_slice %64 {offsets = [0, 0], sizes = [1, 16], strides = [1, 1]} : vector<3x16xf32> to vector<1x16xf32>
    %70 = vector.broadcast %69 : vector<1x16xf32> to vector<12x16xf32>
    %71 = arith.addf %68, %70 : vector<12x16xf32>
    %cst_27 = arith.constant dense<0.000000e+00> : vector<12xf32>
    %72 = vector.multi_reduction <add>, %71, %cst_27 [1] : vector<12x16xf32> to vector<12xf32>
    %73 = vector.shape_cast %72 : vector<12xf32> to vector<12x1xf32>
    %cst_28 = arith.constant 1.600000e+01 : f32
    %74 = vector.broadcast %cst_28 : f32 to vector<12x1xf32>
    %75 = arith.divf %73, %74 : vector<12x1xf32>
    %76 = vector.broadcast %75 : vector<12x1xf32> to vector<12x16xf32>
    %77 = arith.subf %71, %76 : vector<12x16xf32>
    %78 = arith.mulf %77, %77 : vector<12x16xf32>
    %cst_29 = arith.constant dense<0.000000e+00> : vector<12xf32>
    %79 = vector.multi_reduction <add>, %78, %cst_29 [1] : vector<12x16xf32> to vector<12xf32>
    %80 = vector.shape_cast %79 : vector<12xf32> to vector<12x1xf32>
    %cst_30 = arith.constant 1.600000e+01 : f32
    %81 = vector.broadcast %cst_30 : f32 to vector<12x1xf32>
    %82 = arith.divf %80, %81 : vector<12x1xf32>
    %cst_31 = arith.constant 9.99999974E-6 : f32
    %83 = vector.broadcast %cst_31 : f32 to vector<12x1xf32>
    %84 = arith.addf %82, %83 : vector<12x1xf32>
    %85 = math.rsqrt %84 : vector<12x1xf32>
    %86 = vector.broadcast %85 : vector<12x1xf32> to vector<12x16xf32>
    %87 = arith.mulf %77, %86 : vector<12x16xf32>
    %88 = vector.extract_strided_slice %64 {offsets = [1, 0], sizes = [1, 16], strides = [1, 1]} : vector<3x16xf32> to vector<1x16xf32>
    %89 = vector.broadcast %88 : vector<1x16xf32> to vector<12x16xf32>
    %90 = arith.mulf %87, %89 : vector<12x16xf32>
    %91 = vector.extract_strided_slice %64 {offsets = [2, 0], sizes = [1, 16], strides = [1, 1]} : vector<3x16xf32> to vector<1x16xf32>
    %92 = vector.broadcast %91 : vector<1x16xf32> to vector<12x16xf32>
    %93 = arith.addf %90, %92 : vector<12x16xf32>
    %cst_32 = arith.constant 5.000000e-01 : f32
    %94 = vector.broadcast %cst_32 : f32 to vector<12x16xf32>
    %95 = arith.mulf %94, %93 : vector<12x16xf32>
    %96 = math.tanh %95 : vector<12x16xf32>
    %cst_33 = arith.constant 5.000000e-01 : f32
    %97 = vector.broadcast %cst_33 : f32 to vector<12x16xf32>
    %98 = arith.mulf %97, %96 : vector<12x16xf32>
    %cst_34 = arith.constant 5.000000e-01 : f32
    %99 = vector.broadcast %cst_34 : f32 to vector<12x16xf32>
    %100 = arith.addf %98, %99 : vector<12x16xf32>
    %101 = arith.mulf %93, %100 : vector<12x16xf32>
    %c46 = arith.constant 46 : index
    %c0_35 = arith.constant 0 : index
    %102 = vector.load %arg4[%c46, %c0_35] : memref<344x32xf32, #tpu.memory_space<vmem>>, vector<3x32xf32>
    %c30 = arith.constant 30 : index
    %c0_36 = arith.constant 0 : index
    %103 = vector.load %arg4[%c30, %c0_36] : memref<344x32xf32, #tpu.memory_space<vmem>>, vector<16x32xf32>
    %104 = arith.truncf %101 : vector<12x16xf32> to vector<12x16xbf16>
    %105 = arith.truncf %103 : vector<16x32xf32> to vector<16x32xbf16>
    %cst_37 = arith.constant dense<0.000000e+00> : vector<12x32xf32>
    %106 = tpu.matmul %104, %105, %cst_37 {dimension_numbers = #tpu.dot_dimension_numbers<[1], [0], [0], [1], [0, 0, 1, 1], [], []>} : vector<12x16xbf16>, vector<16x32xbf16>, vector<12x32xf32> -> vector<12x32xf32>
    %107 = vector.extract_strided_slice %102 {offsets = [0, 0], sizes = [1, 32], strides = [1, 1]} : vector<3x32xf32> to vector<1x32xf32>
    %108 = vector.broadcast %107 : vector<1x32xf32> to vector<12x32xf32>
    %109 = arith.addf %106, %108 : vector<12x32xf32>
    %cst_38 = arith.constant dense<0.000000e+00> : vector<12xf32>
    %110 = vector.multi_reduction <add>, %109, %cst_38 [1] : vector<12x32xf32> to vector<12xf32>
    %111 = vector.shape_cast %110 : vector<12xf32> to vector<12x1xf32>
    %cst_39 = arith.constant 3.200000e+01 : f32
    %112 = vector.broadcast %cst_39 : f32 to vector<12x1xf32>
    %113 = arith.divf %111, %112 : vector<12x1xf32>
    %114 = vector.broadcast %113 : vector<12x1xf32> to vector<12x32xf32>
    %115 = arith.subf %109, %114 : vector<12x32xf32>
    %116 = arith.mulf %115, %115 : vector<12x32xf32>
    %cst_40 = arith.constant dense<0.000000e+00> : vector<12xf32>
    %117 = vector.multi_reduction <add>, %116, %cst_40 [1] : vector<12x32xf32> to vector<12xf32>
    %118 = vector.shape_cast %117 : vector<12xf32> to vector<12x1xf32>
    %cst_41 = arith.constant 3.200000e+01 : f32
    %119 = vector.broadcast %cst_41 : f32 to vector<12x1xf32>
    %120 = arith.divf %118, %119 : vector<12x1xf32>
    %cst_42 = arith.constant 9.99999974E-6 : f32
    %121 = vector.broadcast %cst_42 : f32 to vector<12x1xf32>
    %122 = arith.addf %120, %121 : vector<12x1xf32>
    %123 = math.rsqrt %122 : vector<12x1xf32>
    %124 = vector.broadcast %123 : vector<12x1xf32> to vector<12x32xf32>
    %125 = arith.mulf %115, %124 : vector<12x32xf32>
    %126 = vector.extract_strided_slice %102 {offsets = [1, 0], sizes = [1, 32], strides = [1, 1]} : vector<3x32xf32> to vector<1x32xf32>
    %127 = vector.broadcast %126 : vector<1x32xf32> to vector<12x32xf32>
    %128 = arith.mulf %125, %127 : vector<12x32xf32>
    %129 = vector.extract_strided_slice %102 {offsets = [2, 0], sizes = [1, 32], strides = [1, 1]} : vector<3x32xf32> to vector<1x32xf32>
    %130 = vector.broadcast %129 : vector<1x32xf32> to vector<12x32xf32>
    %131 = arith.addf %128, %130 : vector<12x32xf32>
    %cst_43 = arith.constant 5.000000e-01 : f32
    %132 = vector.broadcast %cst_43 : f32 to vector<12x32xf32>
    %133 = arith.mulf %132, %131 : vector<12x32xf32>
    %134 = math.tanh %133 : vector<12x32xf32>
    %cst_44 = arith.constant 5.000000e-01 : f32
    %135 = vector.broadcast %cst_44 : f32 to vector<12x32xf32>
    %136 = arith.mulf %135, %134 : vector<12x32xf32>
    %cst_45 = arith.constant 5.000000e-01 : f32
    %137 = vector.broadcast %cst_45 : f32 to vector<12x32xf32>
    %138 = arith.addf %136, %137 : vector<12x32xf32>
    %139 = arith.mulf %131, %138 : vector<12x32xf32>
    %c88 = arith.constant 88 : index
    %c0_46 = arith.constant 0 : index
    %140 = vector.load %arg4[%c88, %c0_46] : memref<344x32xf32, #tpu.memory_space<vmem>>, vector<1x16xf32>
    %141 = vector.broadcast %5 : vector<36x1xf32> to vector<36x16xf32>
    %142 = vector.broadcast %140 : vector<1x16xf32> to vector<36x16xf32>
    %143 = arith.subf %141, %142 : vector<36x16xf32>
    %cst_47 = arith.constant -7.500000e+00 : f32
    %144 = vector.broadcast %cst_47 : f32 to vector<36x16xf32>
    %145 = arith.mulf %144, %143 : vector<36x16xf32>
    %146 = arith.mulf %145, %143 : vector<36x16xf32>
    %147 = math.exp %146 : vector<36x16xf32>
    %c65 = arith.constant 65 : index
    %c0_48 = arith.constant 0 : index
    %148 = vector.load %arg4[%c65, %c0_48] : memref<344x32xf32, #tpu.memory_space<vmem>>, vector<3x16xf32>
    %c49 = arith.constant 49 : index
    %c0_49 = arith.constant 0 : index
    %149 = vector.load %arg4[%c49, %c0_49] : memref<344x32xf32, #tpu.memory_space<vmem>>, vector<16x16xf32>
    %150 = arith.truncf %147 : vector<36x16xf32> to vector<36x16xbf16>
    %151 = arith.truncf %149 : vector<16x16xf32> to vector<16x16xbf16>
    %cst_50 = arith.constant dense<0.000000e+00> : vector<36x16xf32>
    %152 = tpu.matmul %150, %151, %cst_50 {dimension_numbers = #tpu.dot_dimension_numbers<[1], [0], [0], [1], [0, 0, 1, 1], [], []>} : vector<36x16xbf16>, vector<16x16xbf16>, vector<36x16xf32> -> vector<36x16xf32>
    %153 = vector.extract_strided_slice %148 {offsets = [0, 0], sizes = [1, 16], strides = [1, 1]} : vector<3x16xf32> to vector<1x16xf32>
    %154 = vector.broadcast %153 : vector<1x16xf32> to vector<36x16xf32>
    %155 = arith.addf %152, %154 : vector<36x16xf32>
    %cst_51 = arith.constant dense<0.000000e+00> : vector<36xf32>
    %156 = vector.multi_reduction <add>, %155, %cst_51 [1] : vector<36x16xf32> to vector<36xf32>
    %157 = vector.shape_cast %156 : vector<36xf32> to vector<36x1xf32>
    %cst_52 = arith.constant 1.600000e+01 : f32
    %158 = vector.broadcast %cst_52 : f32 to vector<36x1xf32>
    %159 = arith.divf %157, %158 : vector<36x1xf32>
    %160 = vector.broadcast %159 : vector<36x1xf32> to vector<36x16xf32>
    %161 = arith.subf %155, %160 : vector<36x16xf32>
    %162 = arith.mulf %161, %161 : vector<36x16xf32>
    %cst_53 = arith.constant dense<0.000000e+00> : vector<36xf32>
    %163 = vector.multi_reduction <add>, %162, %cst_53 [1] : vector<36x16xf32> to vector<36xf32>
    %164 = vector.shape_cast %163 : vector<36xf32> to vector<36x1xf32>
    %cst_54 = arith.constant 1.600000e+01 : f32
    %165 = vector.broadcast %cst_54 : f32 to vector<36x1xf32>
    %166 = arith.divf %164, %165 : vector<36x1xf32>
    %cst_55 = arith.constant 9.99999974E-6 : f32
    %167 = vector.broadcast %cst_55 : f32 to vector<36x1xf32>
    %168 = arith.addf %166, %167 : vector<36x1xf32>
    %169 = math.rsqrt %168 : vector<36x1xf32>
    %170 = vector.broadcast %169 : vector<36x1xf32> to vector<36x16xf32>
    %171 = arith.mulf %161, %170 : vector<36x16xf32>
    %172 = vector.extract_strided_slice %148 {offsets = [1, 0], sizes = [1, 16], strides = [1, 1]} : vector<3x16xf32> to vector<1x16xf32>
    %173 = vector.broadcast %172 : vector<1x16xf32> to vector<36x16xf32>
    %174 = arith.mulf %171, %173 : vector<36x16xf32>
    %175 = vector.extract_strided_slice %148 {offsets = [2, 0], sizes = [1, 16], strides = [1, 1]} : vector<3x16xf32> to vector<1x16xf32>
    %176 = vector.broadcast %175 : vector<1x16xf32> to vector<36x16xf32>
    %177 = arith.addf %174, %176 : vector<36x16xf32>
    %cst_56 = arith.constant 5.000000e-01 : f32
    %178 = vector.broadcast %cst_56 : f32 to vector<36x16xf32>
    %179 = arith.mulf %178, %177 : vector<36x16xf32>
    %180 = math.tanh %179 : vector<36x16xf32>
    %cst_57 = arith.constant 5.000000e-01 : f32
    %181 = vector.broadcast %cst_57 : f32 to vector<36x16xf32>
    %182 = arith.mulf %181, %180 : vector<36x16xf32>
    %cst_58 = arith.constant 5.000000e-01 : f32
    %183 = vector.broadcast %cst_58 : f32 to vector<36x16xf32>
    %184 = arith.addf %182, %183 : vector<36x16xf32>
    %185 = arith.mulf %177, %184 : vector<36x16xf32>
    %c84 = arith.constant 84 : index
    %c0_59 = arith.constant 0 : index
    %186 = vector.load %arg4[%c84, %c0_59] : memref<344x32xf32, #tpu.memory_space<vmem>>, vector<3x32xf32>
    %c68 = arith.constant 68 : index
    %c0_60 = arith.constant 0 : index
    %187 = vector.load %arg4[%c68, %c0_60] : memref<344x32xf32, #tpu.memory_space<vmem>>, vector<16x32xf32>
    %188 = arith.truncf %185 : vector<36x16xf32> to vector<36x16xbf16>
    %189 = arith.truncf %187 : vector<16x32xf32> to vector<16x32xbf16>
    %cst_61 = arith.constant dense<0.000000e+00> : vector<36x32xf32>
    %190 = tpu.matmul %188, %189, %cst_61 {dimension_numbers = #tpu.dot_dimension_numbers<[1], [0], [0], [1], [0, 0, 1, 1], [], []>} : vector<36x16xbf16>, vector<16x32xbf16>, vector<36x32xf32> -> vector<36x32xf32>
    %191 = vector.extract_strided_slice %186 {offsets = [0, 0], sizes = [1, 32], strides = [1, 1]} : vector<3x32xf32> to vector<1x32xf32>
    %192 = vector.broadcast %191 : vector<1x32xf32> to vector<36x32xf32>
    %193 = arith.addf %190, %192 : vector<36x32xf32>
    %cst_62 = arith.constant dense<0.000000e+00> : vector<36xf32>
    %194 = vector.multi_reduction <add>, %193, %cst_62 [1] : vector<36x32xf32> to vector<36xf32>
    %195 = vector.shape_cast %194 : vector<36xf32> to vector<36x1xf32>
    %cst_63 = arith.constant 3.200000e+01 : f32
    %196 = vector.broadcast %cst_63 : f32 to vector<36x1xf32>
    %197 = arith.divf %195, %196 : vector<36x1xf32>
    %198 = vector.broadcast %197 : vector<36x1xf32> to vector<36x32xf32>
    %199 = arith.subf %193, %198 : vector<36x32xf32>
    %200 = arith.mulf %199, %199 : vector<36x32xf32>
    %cst_64 = arith.constant dense<0.000000e+00> : vector<36xf32>
    %201 = vector.multi_reduction <add>, %200, %cst_64 [1] : vector<36x32xf32> to vector<36xf32>
    %202 = vector.shape_cast %201 : vector<36xf32> to vector<36x1xf32>
    %cst_65 = arith.constant 3.200000e+01 : f32
    %203 = vector.broadcast %cst_65 : f32 to vector<36x1xf32>
    %204 = arith.divf %202, %203 : vector<36x1xf32>
    %cst_66 = arith.constant 9.99999974E-6 : f32
    %205 = vector.broadcast %cst_66 : f32 to vector<36x1xf32>
    %206 = arith.addf %204, %205 : vector<36x1xf32>
    %207 = math.rsqrt %206 : vector<36x1xf32>
    %208 = vector.broadcast %207 : vector<36x1xf32> to vector<36x32xf32>
    %209 = arith.mulf %199, %208 : vector<36x32xf32>
    %210 = vector.extract_strided_slice %186 {offsets = [1, 0], sizes = [1, 32], strides = [1, 1]} : vector<3x32xf32> to vector<1x32xf32>
    %211 = vector.broadcast %210 : vector<1x32xf32> to vector<36x32xf32>
    %212 = arith.mulf %209, %211 : vector<36x32xf32>
    %213 = vector.extract_strided_slice %186 {offsets = [2, 0], sizes = [1, 32], strides = [1, 1]} : vector<3x32xf32> to vector<1x32xf32>
    %214 = vector.broadcast %213 : vector<1x32xf32> to vector<36x32xf32>
    %215 = arith.addf %212, %214 : vector<36x32xf32>
    %cst_67 = arith.constant 5.000000e-01 : f32
    %216 = vector.broadcast %cst_67 : f32 to vector<36x32xf32>
    %217 = arith.mulf %216, %215 : vector<36x32xf32>
    %218 = math.tanh %217 : vector<36x32xf32>
    %cst_68 = arith.constant 5.000000e-01 : f32
    %219 = vector.broadcast %cst_68 : f32 to vector<36x32xf32>
    %220 = arith.mulf %219, %218 : vector<36x32xf32>
    %cst_69 = arith.constant 5.000000e-01 : f32
    %221 = vector.broadcast %cst_69 : f32 to vector<36x32xf32>
    %222 = arith.addf %220, %221 : vector<36x32xf32>
    %223 = arith.mulf %215, %222 : vector<36x32xf32>
    %c0_70 = arith.constant 0 : index
    %c0_71 = arith.constant 0 : index
    %224 = vector.load %arg3[%c0_70, %c0_71] : memref<198x128xf32, #tpu.memory_space<vmem>>, vector<32x128xf32>
    %c32 = arith.constant 32 : index
    %c0_72 = arith.constant 0 : index
    %225 = vector.load %arg3[%c32, %c0_72] : memref<198x128xf32, #tpu.memory_space<vmem>>, vector<1x128xf32>
    %c89 = arith.constant 89 : index
    %c0_73 = arith.constant 0 : index
    %226 = vector.load %arg4[%c89, %c0_73] : memref<344x32xf32, #tpu.memory_space<vmem>>, vector<32x32xf32>
    %c121 = arith.constant 121 : index
    %c0_74 = arith.constant 0 : index
    %227 = vector.load %arg4[%c121, %c0_74] : memref<344x32xf32, #tpu.memory_space<vmem>>, vector<5x32xf32>
    %228 = arith.truncf %55 : vector<4x32xf32> to vector<4x32xbf16>
    %229 = arith.truncf %224 : vector<32x128xf32> to vector<32x128xbf16>
    %cst_75 = arith.constant dense<0.000000e+00> : vector<4x128xf32>
    %230 = tpu.matmul %228, %229, %cst_75 {dimension_numbers = #tpu.dot_dimension_numbers<[1], [0], [0], [1], [0, 0, 1, 1], [], []>} : vector<4x32xbf16>, vector<32x128xbf16>, vector<4x128xf32> -> vector<4x128xf32>
    %231 = vector.broadcast %225 : vector<1x128xf32> to vector<4x128xf32>
    %232 = arith.addf %230, %231 : vector<4x128xf32>
    %233 = arith.truncf %139 : vector<12x32xf32> to vector<12x32xbf16>
    %234 = arith.truncf %226 : vector<32x32xf32> to vector<32x32xbf16>
    %cst_76 = arith.constant dense<0.000000e+00> : vector<12x32xf32>
    %235 = tpu.matmul %233, %234, %cst_76 {dimension_numbers = #tpu.dot_dimension_numbers<[1], [0], [0], [1], [0, 0, 1, 1], [], []>} : vector<12x32xbf16>, vector<32x32xbf16>, vector<12x32xf32> -> vector<12x32xf32>
    %236 = vector.extract_strided_slice %227 {offsets = [0, 0], sizes = [1, 32], strides = [1, 1]} : vector<5x32xf32> to vector<1x32xf32>
    %237 = vector.broadcast %236 : vector<1x32xf32> to vector<12x32xf32>
    %238 = arith.addf %235, %237 : vector<12x32xf32>
    %239 = arith.truncf %232 : vector<4x128xf32> to vector<4x128xbf16>
    %cst_77 = arith.constant dense<0.000000e+00> : vector<24x128xf32>
    %240 = tpu.matmul %10, %239, %cst_77 {dimension_numbers = #tpu.dot_dimension_numbers<[1], [0], [0], [1], [0, 0, 1, 1], [], []>} : vector<24x4xbf16>, vector<4x128xbf16>, vector<24x128xf32> -> vector<24x128xf32>
    %241 = vector.extract_strided_slice %240 {offsets = [0, 0], sizes = [12, 128], strides = [1, 1]} : vector<24x128xf32> to vector<12x128xf32>
    %242 = vector.extract_strided_slice %240 {offsets = [12, 0], sizes = [12, 128], strides = [1, 1]} : vector<24x128xf32> to vector<12x128xf32>
    %243 = vector.extract_strided_slice %241 {offsets = [0, 32], sizes = [12, 32], strides = [1, 1]} : vector<12x128xf32> to vector<12x32xf32>
    %244 = vector.extract_strided_slice %242 {offsets = [0, 64], sizes = [12, 32], strides = [1, 1]} : vector<12x128xf32> to vector<12x32xf32>
    %245 = arith.addf %243, %244 : vector<12x32xf32>
    %246 = arith.addf %245, %238 : vector<12x32xf32>
    %cst_78 = arith.constant 5.000000e-01 : f32
    %247 = vector.broadcast %cst_78 : f32 to vector<12x32xf32>
    %248 = arith.mulf %247, %246 : vector<12x32xf32>
    %249 = math.tanh %248 : vector<12x32xf32>
    %cst_79 = arith.constant 5.000000e-01 : f32
    %250 = vector.broadcast %cst_79 : f32 to vector<12x32xf32>
    %251 = arith.mulf %250, %249 : vector<12x32xf32>
    %cst_80 = arith.constant 5.000000e-01 : f32
    %252 = vector.broadcast %cst_80 : f32 to vector<12x32xf32>
    %253 = arith.addf %251, %252 : vector<12x32xf32>
    %254 = vector.extract_strided_slice %241 {offsets = [0, 0], sizes = [12, 32], strides = [1, 1]} : vector<12x128xf32> to vector<12x32xf32>
    %255 = arith.mulf %254, %253 : vector<12x32xf32>
    %256 = tpu.concatenate %255, %253 in 1 : vector<12x32xf32>, vector<12x32xf32> -> vector<12x64xf32>
    %257 = arith.truncf %256 : vector<12x64xf32> to vector<12x64xbf16>
    %cst_81 = arith.constant dense<0.000000e+00> : vector<4x64xf32>
    %258 = tpu.matmul %13, %257, %cst_81 {dimension_numbers = #tpu.dot_dimension_numbers<[1], [0], [0], [1], [0, 0, 1, 1], [], []>} : vector<4x12xbf16>, vector<12x64xbf16>, vector<4x64xf32> -> vector<4x64xf32>
    %259 = vector.extract_strided_slice %258 {offsets = [0, 0], sizes = [4, 32], strides = [1, 1]} : vector<4x64xf32> to vector<4x32xf32>
    %260 = vector.extract_strided_slice %258 {offsets = [0, 32], sizes = [4, 32], strides = [1, 1]} : vector<4x64xf32> to vector<4x32xf32>
    %cst_82 = arith.constant 9.99999997E-7 : f32
    %261 = vector.broadcast %cst_82 : f32 to vector<4x32xf32>
    %262 = arith.addf %260, %261 : vector<4x32xf32>
    %263 = arith.divf %259, %262 : vector<4x32xf32>
    %264 = vector.extract_strided_slice %232 {offsets = [0, 96], sizes = [4, 32], strides = [1, 1]} : vector<4x128xf32> to vector<4x32xf32>
    %265 = arith.addf %264, %263 : vector<4x32xf32>
    %266 = vector.extract_strided_slice %227 {offsets = [1, 0], sizes = [1, 32], strides = [1, 1]} : vector<5x32xf32> to vector<1x32xf32>
    %267 = vector.broadcast %266 : vector<1x32xf32> to vector<4x32xf32>
    %268 = arith.mulf %265, %267 : vector<4x32xf32>
    %269 = vector.extract_strided_slice %227 {offsets = [2, 0], sizes = [1, 32], strides = [1, 1]} : vector<5x32xf32> to vector<1x32xf32>
    %270 = vector.broadcast %269 : vector<1x32xf32> to vector<4x32xf32>
    %271 = arith.addf %268, %270 : vector<4x32xf32>
    %cst_83 = arith.constant 5.000000e-01 : f32
    %272 = vector.broadcast %cst_83 : f32 to vector<4x32xf32>
    %273 = arith.mulf %272, %271 : vector<4x32xf32>
    %274 = math.tanh %273 : vector<4x32xf32>
    %cst_84 = arith.constant 5.000000e-01 : f32
    %275 = vector.broadcast %cst_84 : f32 to vector<4x32xf32>
    %276 = arith.mulf %275, %274 : vector<4x32xf32>
    %cst_85 = arith.constant 5.000000e-01 : f32
    %277 = vector.broadcast %cst_85 : f32 to vector<4x32xf32>
    %278 = arith.addf %276, %277 : vector<4x32xf32>
    %279 = arith.mulf %271, %278 : vector<4x32xf32>
    %280 = arith.addf %55, %279 : vector<4x32xf32>
    %281 = vector.extract_strided_slice %227 {offsets = [3, 0], sizes = [1, 32], strides = [1, 1]} : vector<5x32xf32> to vector<1x32xf32>
    %282 = vector.broadcast %281 : vector<1x32xf32> to vector<12x32xf32>
    %283 = arith.mulf %246, %282 : vector<12x32xf32>
    %284 = vector.extract_strided_slice %227 {offsets = [4, 0], sizes = [1, 32], strides = [1, 1]} : vector<5x32xf32> to vector<1x32xf32>
    %285 = vector.broadcast %284 : vector<1x32xf32> to vector<12x32xf32>
    %286 = arith.addf %283, %285 : vector<12x32xf32>
    %cst_86 = arith.constant 5.000000e-01 : f32
    %287 = vector.broadcast %cst_86 : f32 to vector<12x32xf32>
    %288 = arith.mulf %287, %286 : vector<12x32xf32>
    %289 = math.tanh %288 : vector<12x32xf32>
    %cst_87 = arith.constant 5.000000e-01 : f32
    %290 = vector.broadcast %cst_87 : f32 to vector<12x32xf32>
    %291 = arith.mulf %290, %289 : vector<12x32xf32>
    %cst_88 = arith.constant 5.000000e-01 : f32
    %292 = vector.broadcast %cst_88 : f32 to vector<12x32xf32>
    %293 = arith.addf %291, %292 : vector<12x32xf32>
    %294 = arith.mulf %286, %293 : vector<12x32xf32>
    %295 = arith.addf %139, %294 : vector<12x32xf32>
    %c33 = arith.constant 33 : index
    %c0_89 = arith.constant 0 : index
    %296 = vector.load %arg3[%c33, %c0_89] : memref<198x128xf32, #tpu.memory_space<vmem>>, vector<32x128xf32>
    %c65_90 = arith.constant 65 : index
    %c0_91 = arith.constant 0 : index
    %297 = vector.load %arg3[%c65_90, %c0_91] : memref<198x128xf32, #tpu.memory_space<vmem>>, vector<1x128xf32>
    %c126 = arith.constant 126 : index
    %c0_92 = arith.constant 0 : index
    %298 = vector.load %arg4[%c126, %c0_92] : memref<344x32xf32, #tpu.memory_space<vmem>>, vector<32x32xf32>
    %c158 = arith.constant 158 : index
    %c0_93 = arith.constant 0 : index
    %299 = vector.load %arg4[%c158, %c0_93] : memref<344x32xf32, #tpu.memory_space<vmem>>, vector<5x32xf32>
    %300 = arith.truncf %295 : vector<12x32xf32> to vector<12x32xbf16>
    %301 = arith.truncf %296 : vector<32x128xf32> to vector<32x128xbf16>
    %cst_94 = arith.constant dense<0.000000e+00> : vector<12x128xf32>
    %302 = tpu.matmul %300, %301, %cst_94 {dimension_numbers = #tpu.dot_dimension_numbers<[1], [0], [0], [1], [0, 0, 1, 1], [], []>} : vector<12x32xbf16>, vector<32x128xbf16>, vector<12x128xf32> -> vector<12x128xf32>
    %303 = vector.broadcast %297 : vector<1x128xf32> to vector<12x128xf32>
    %304 = arith.addf %302, %303 : vector<12x128xf32>
    %305 = arith.truncf %223 : vector<36x32xf32> to vector<36x32xbf16>
    %306 = arith.truncf %298 : vector<32x32xf32> to vector<32x32xbf16>
    %cst_95 = arith.constant dense<0.000000e+00> : vector<36x32xf32>
    %307 = tpu.matmul %305, %306, %cst_95 {dimension_numbers = #tpu.dot_dimension_numbers<[1], [0], [0], [1], [0, 0, 1, 1], [], []>} : vector<36x32xbf16>, vector<32x32xbf16>, vector<36x32xf32> -> vector<36x32xf32>
    %308 = vector.extract_strided_slice %299 {offsets = [0, 0], sizes = [1, 32], strides = [1, 1]} : vector<5x32xf32> to vector<1x32xf32>
    %309 = vector.broadcast %308 : vector<1x32xf32> to vector<36x32xf32>
    %310 = arith.addf %307, %309 : vector<36x32xf32>
    %311 = arith.truncf %304 : vector<12x128xf32> to vector<12x128xbf16>
    %cst_96 = arith.constant dense<0.000000e+00> : vector<72x128xf32>
    %312 = tpu.matmul %14, %311, %cst_96 {dimension_numbers = #tpu.dot_dimension_numbers<[1], [0], [0], [1], [0, 0, 1, 1], [], []>} : vector<72x12xbf16>, vector<12x128xbf16>, vector<72x128xf32> -> vector<72x128xf32>
    %313 = vector.extract_strided_slice %312 {offsets = [0, 0], sizes = [36, 128], strides = [1, 1]} : vector<72x128xf32> to vector<36x128xf32>
    %314 = vector.extract_strided_slice %312 {offsets = [36, 0], sizes = [36, 128], strides = [1, 1]} : vector<72x128xf32> to vector<36x128xf32>
    %315 = vector.extract_strided_slice %313 {offsets = [0, 32], sizes = [36, 32], strides = [1, 1]} : vector<36x128xf32> to vector<36x32xf32>
    %316 = vector.extract_strided_slice %314 {offsets = [0, 64], sizes = [36, 32], strides = [1, 1]} : vector<36x128xf32> to vector<36x32xf32>
    %317 = arith.addf %315, %316 : vector<36x32xf32>
    %318 = arith.addf %317, %310 : vector<36x32xf32>
    %cst_97 = arith.constant 5.000000e-01 : f32
    %319 = vector.broadcast %cst_97 : f32 to vector<36x32xf32>
    %320 = arith.mulf %319, %318 : vector<36x32xf32>
    %321 = math.tanh %320 : vector<36x32xf32>
    %cst_98 = arith.constant 5.000000e-01 : f32
    %322 = vector.broadcast %cst_98 : f32 to vector<36x32xf32>
    %323 = arith.mulf %322, %321 : vector<36x32xf32>
    %cst_99 = arith.constant 5.000000e-01 : f32
    %324 = vector.broadcast %cst_99 : f32 to vector<36x32xf32>
    %325 = arith.addf %323, %324 : vector<36x32xf32>
    %326 = vector.extract_strided_slice %313 {offsets = [0, 0], sizes = [36, 32], strides = [1, 1]} : vector<36x128xf32> to vector<36x32xf32>
    %327 = arith.mulf %326, %325 : vector<36x32xf32>
    %328 = tpu.concatenate %327, %325 in 1 : vector<36x32xf32>, vector<36x32xf32> -> vector<36x64xf32>
    %329 = arith.truncf %328 : vector<36x64xf32> to vector<36x64xbf16>
    %cst_100 = arith.constant dense<0.000000e+00> : vector<12x64xf32>
    %330 = tpu.matmul %17, %329, %cst_100 {dimension_numbers = #tpu.dot_dimension_numbers<[1], [0], [0], [1], [0, 0, 1, 1], [], []>} : vector<12x36xbf16>, vector<36x64xbf16>, vector<12x64xf32> -> vector<12x64xf32>
    %331 = vector.extract_strided_slice %330 {offsets = [0, 0], sizes = [12, 32], strides = [1, 1]} : vector<12x64xf32> to vector<12x32xf32>
    %332 = vector.extract_strided_slice %330 {offsets = [0, 32], sizes = [12, 32], strides = [1, 1]} : vector<12x64xf32> to vector<12x32xf32>
    %cst_101 = arith.constant 9.99999997E-7 : f32
    %333 = vector.broadcast %cst_101 : f32 to vector<12x32xf32>
    %334 = arith.addf %332, %333 : vector<12x32xf32>
    %335 = arith.divf %331, %334 : vector<12x32xf32>
    %336 = vector.extract_strided_slice %304 {offsets = [0, 96], sizes = [12, 32], strides = [1, 1]} : vector<12x128xf32> to vector<12x32xf32>
    %337 = arith.addf %336, %335 : vector<12x32xf32>
    %338 = vector.extract_strided_slice %299 {offsets = [1, 0], sizes = [1, 32], strides = [1, 1]} : vector<5x32xf32> to vector<1x32xf32>
    %339 = vector.broadcast %338 : vector<1x32xf32> to vector<12x32xf32>
    %340 = arith.mulf %337, %339 : vector<12x32xf32>
    %341 = vector.extract_strided_slice %299 {offsets = [2, 0], sizes = [1, 32], strides = [1, 1]} : vector<5x32xf32> to vector<1x32xf32>
    %342 = vector.broadcast %341 : vector<1x32xf32> to vector<12x32xf32>
    %343 = arith.addf %340, %342 : vector<12x32xf32>
    %cst_102 = arith.constant 5.000000e-01 : f32
    %344 = vector.broadcast %cst_102 : f32 to vector<12x32xf32>
    %345 = arith.mulf %344, %343 : vector<12x32xf32>
    %346 = math.tanh %345 : vector<12x32xf32>
    %cst_103 = arith.constant 5.000000e-01 : f32
    %347 = vector.broadcast %cst_103 : f32 to vector<12x32xf32>
    %348 = arith.mulf %347, %346 : vector<12x32xf32>
    %cst_104 = arith.constant 5.000000e-01 : f32
    %349 = vector.broadcast %cst_104 : f32 to vector<12x32xf32>
    %350 = arith.addf %348, %349 : vector<12x32xf32>
    %351 = arith.mulf %343, %350 : vector<12x32xf32>
    %352 = arith.addf %295, %351 : vector<12x32xf32>
    %353 = vector.extract_strided_slice %299 {offsets = [3, 0], sizes = [1, 32], strides = [1, 1]} : vector<5x32xf32> to vector<1x32xf32>
    %354 = vector.broadcast %353 : vector<1x32xf32> to vector<36x32xf32>
    %355 = arith.mulf %318, %354 : vector<36x32xf32>
    %356 = vector.extract_strided_slice %299 {offsets = [4, 0], sizes = [1, 32], strides = [1, 1]} : vector<5x32xf32> to vector<1x32xf32>
    %357 = vector.broadcast %356 : vector<1x32xf32> to vector<36x32xf32>
    %358 = arith.addf %355, %357 : vector<36x32xf32>
    %cst_105 = arith.constant 5.000000e-01 : f32
    %359 = vector.broadcast %cst_105 : f32 to vector<36x32xf32>
    %360 = arith.mulf %359, %358 : vector<36x32xf32>
    %361 = math.tanh %360 : vector<36x32xf32>
    %cst_106 = arith.constant 5.000000e-01 : f32
    %362 = vector.broadcast %cst_106 : f32 to vector<36x32xf32>
    %363 = arith.mulf %362, %361 : vector<36x32xf32>
    %cst_107 = arith.constant 5.000000e-01 : f32
    %364 = vector.broadcast %cst_107 : f32 to vector<36x32xf32>
    %365 = arith.addf %363, %364 : vector<36x32xf32>
    %366 = arith.mulf %358, %365 : vector<36x32xf32>
    %367 = arith.addf %223, %366 : vector<36x32xf32>
    %c66 = arith.constant 66 : index
    %c0_108 = arith.constant 0 : index
    %368 = vector.load %arg3[%c66, %c0_108] : memref<198x128xf32, #tpu.memory_space<vmem>>, vector<32x128xf32>
    %c98 = arith.constant 98 : index
    %c0_109 = arith.constant 0 : index
    %369 = vector.load %arg3[%c98, %c0_109] : memref<198x128xf32, #tpu.memory_space<vmem>>, vector<1x128xf32>
    %c163 = arith.constant 163 : index
    %c0_110 = arith.constant 0 : index
    %370 = vector.load %arg4[%c163, %c0_110] : memref<344x32xf32, #tpu.memory_space<vmem>>, vector<32x32xf32>
    %c195 = arith.constant 195 : index
    %c0_111 = arith.constant 0 : index
    %371 = vector.load %arg4[%c195, %c0_111] : memref<344x32xf32, #tpu.memory_space<vmem>>, vector<5x32xf32>
    %372 = arith.truncf %280 : vector<4x32xf32> to vector<4x32xbf16>
    %373 = arith.truncf %368 : vector<32x128xf32> to vector<32x128xbf16>
    %cst_112 = arith.constant dense<0.000000e+00> : vector<4x128xf32>
    %374 = tpu.matmul %372, %373, %cst_112 {dimension_numbers = #tpu.dot_dimension_numbers<[1], [0], [0], [1], [0, 0, 1, 1], [], []>} : vector<4x32xbf16>, vector<32x128xbf16>, vector<4x128xf32> -> vector<4x128xf32>
    %375 = vector.broadcast %369 : vector<1x128xf32> to vector<4x128xf32>
    %376 = arith.addf %374, %375 : vector<4x128xf32>
    %377 = arith.truncf %352 : vector<12x32xf32> to vector<12x32xbf16>
    %378 = arith.truncf %370 : vector<32x32xf32> to vector<32x32xbf16>
    %cst_113 = arith.constant dense<0.000000e+00> : vector<12x32xf32>
    %379 = tpu.matmul %377, %378, %cst_113 {dimension_numbers = #tpu.dot_dimension_numbers<[1], [0], [0], [1], [0, 0, 1, 1], [], []>} : vector<12x32xbf16>, vector<32x32xbf16>, vector<12x32xf32> -> vector<12x32xf32>
    %380 = vector.extract_strided_slice %371 {offsets = [0, 0], sizes = [1, 32], strides = [1, 1]} : vector<5x32xf32> to vector<1x32xf32>
    %381 = vector.broadcast %380 : vector<1x32xf32> to vector<12x32xf32>
    %382 = arith.addf %379, %381 : vector<12x32xf32>
    %383 = arith.truncf %376 : vector<4x128xf32> to vector<4x128xbf16>
    %cst_114 = arith.constant dense<0.000000e+00> : vector<24x128xf32>
    %384 = tpu.matmul %10, %383, %cst_114 {dimension_numbers = #tpu.dot_dimension_numbers<[1], [0], [0], [1], [0, 0, 1, 1], [], []>} : vector<24x4xbf16>, vector<4x128xbf16>, vector<24x128xf32> -> vector<24x128xf32>
    %385 = vector.extract_strided_slice %384 {offsets = [0, 0], sizes = [12, 128], strides = [1, 1]} : vector<24x128xf32> to vector<12x128xf32>
    %386 = vector.extract_strided_slice %384 {offsets = [12, 0], sizes = [12, 128], strides = [1, 1]} : vector<24x128xf32> to vector<12x128xf32>
    %387 = vector.extract_strided_slice %385 {offsets = [0, 32], sizes = [12, 32], strides = [1, 1]} : vector<12x128xf32> to vector<12x32xf32>
    %388 = vector.extract_strided_slice %386 {offsets = [0, 64], sizes = [12, 32], strides = [1, 1]} : vector<12x128xf32> to vector<12x32xf32>
    %389 = arith.addf %387, %388 : vector<12x32xf32>
    %390 = arith.addf %389, %382 : vector<12x32xf32>
    %cst_115 = arith.constant 5.000000e-01 : f32
    %391 = vector.broadcast %cst_115 : f32 to vector<12x32xf32>
    %392 = arith.mulf %391, %390 : vector<12x32xf32>
    %393 = math.tanh %392 : vector<12x32xf32>
    %cst_116 = arith.constant 5.000000e-01 : f32
    %394 = vector.broadcast %cst_116 : f32 to vector<12x32xf32>
    %395 = arith.mulf %394, %393 : vector<12x32xf32>
    %cst_117 = arith.constant 5.000000e-01 : f32
    %396 = vector.broadcast %cst_117 : f32 to vector<12x32xf32>
    %397 = arith.addf %395, %396 : vector<12x32xf32>
    %398 = vector.extract_strided_slice %385 {offsets = [0, 0], sizes = [12, 32], strides = [1, 1]} : vector<12x128xf32> to vector<12x32xf32>
    %399 = arith.mulf %398, %397 : vector<12x32xf32>
    %400 = tpu.concatenate %399, %397 in 1 : vector<12x32xf32>, vector<12x32xf32> -> vector<12x64xf32>
    %401 = arith.truncf %400 : vector<12x64xf32> to vector<12x64xbf16>
    %cst_118 = arith.constant dense<0.000000e+00> : vector<4x64xf32>
    %402 = tpu.matmul %13, %401, %cst_118 {dimension_numbers = #tpu.dot_dimension_numbers<[1], [0], [0], [1], [0, 0, 1, 1], [], []>} : vector<4x12xbf16>, vector<12x64xbf16>, vector<4x64xf32> -> vector<4x64xf32>
    %403 = vector.extract_strided_slice %402 {offsets = [0, 0], sizes = [4, 32], strides = [1, 1]} : vector<4x64xf32> to vector<4x32xf32>
    %404 = vector.extract_strided_slice %402 {offsets = [0, 32], sizes = [4, 32], strides = [1, 1]} : vector<4x64xf32> to vector<4x32xf32>
    %cst_119 = arith.constant 9.99999997E-7 : f32
    %405 = vector.broadcast %cst_119 : f32 to vector<4x32xf32>
    %406 = arith.addf %404, %405 : vector<4x32xf32>
    %407 = arith.divf %403, %406 : vector<4x32xf32>
    %408 = vector.extract_strided_slice %376 {offsets = [0, 96], sizes = [4, 32], strides = [1, 1]} : vector<4x128xf32> to vector<4x32xf32>
    %409 = arith.addf %408, %407 : vector<4x32xf32>
    %410 = vector.extract_strided_slice %371 {offsets = [1, 0], sizes = [1, 32], strides = [1, 1]} : vector<5x32xf32> to vector<1x32xf32>
    %411 = vector.broadcast %410 : vector<1x32xf32> to vector<4x32xf32>
    %412 = arith.mulf %409, %411 : vector<4x32xf32>
    %413 = vector.extract_strided_slice %371 {offsets = [2, 0], sizes = [1, 32], strides = [1, 1]} : vector<5x32xf32> to vector<1x32xf32>
    %414 = vector.broadcast %413 : vector<1x32xf32> to vector<4x32xf32>
    %415 = arith.addf %412, %414 : vector<4x32xf32>
    %cst_120 = arith.constant 5.000000e-01 : f32
    %416 = vector.broadcast %cst_120 : f32 to vector<4x32xf32>
    %417 = arith.mulf %416, %415 : vector<4x32xf32>
    %418 = math.tanh %417 : vector<4x32xf32>
    %cst_121 = arith.constant 5.000000e-01 : f32
    %419 = vector.broadcast %cst_121 : f32 to vector<4x32xf32>
    %420 = arith.mulf %419, %418 : vector<4x32xf32>
    %cst_122 = arith.constant 5.000000e-01 : f32
    %421 = vector.broadcast %cst_122 : f32 to vector<4x32xf32>
    %422 = arith.addf %420, %421 : vector<4x32xf32>
    %423 = arith.mulf %415, %422 : vector<4x32xf32>
    %424 = arith.addf %280, %423 : vector<4x32xf32>
    %425 = vector.extract_strided_slice %371 {offsets = [3, 0], sizes = [1, 32], strides = [1, 1]} : vector<5x32xf32> to vector<1x32xf32>
    %426 = vector.broadcast %425 : vector<1x32xf32> to vector<12x32xf32>
    %427 = arith.mulf %390, %426 : vector<12x32xf32>
    %428 = vector.extract_strided_slice %371 {offsets = [4, 0], sizes = [1, 32], strides = [1, 1]} : vector<5x32xf32> to vector<1x32xf32>
    %429 = vector.broadcast %428 : vector<1x32xf32> to vector<12x32xf32>
    %430 = arith.addf %427, %429 : vector<12x32xf32>
    %cst_123 = arith.constant 5.000000e-01 : f32
    %431 = vector.broadcast %cst_123 : f32 to vector<12x32xf32>
    %432 = arith.mulf %431, %430 : vector<12x32xf32>
    %433 = math.tanh %432 : vector<12x32xf32>
    %cst_124 = arith.constant 5.000000e-01 : f32
    %434 = vector.broadcast %cst_124 : f32 to vector<12x32xf32>
    %435 = arith.mulf %434, %433 : vector<12x32xf32>
    %cst_125 = arith.constant 5.000000e-01 : f32
    %436 = vector.broadcast %cst_125 : f32 to vector<12x32xf32>
    %437 = arith.addf %435, %436 : vector<12x32xf32>
    %438 = arith.mulf %430, %437 : vector<12x32xf32>
    %439 = arith.addf %352, %438 : vector<12x32xf32>
    %c99 = arith.constant 99 : index
    %c0_126 = arith.constant 0 : index
    %440 = vector.load %arg3[%c99, %c0_126] : memref<198x128xf32, #tpu.memory_space<vmem>>, vector<32x128xf32>
    %c131 = arith.constant 131 : index
    %c0_127 = arith.constant 0 : index
    %441 = vector.load %arg3[%c131, %c0_127] : memref<198x128xf32, #tpu.memory_space<vmem>>, vector<1x128xf32>
    %c200 = arith.constant 200 : index
    %c0_128 = arith.constant 0 : index
    %442 = vector.load %arg4[%c200, %c0_128] : memref<344x32xf32, #tpu.memory_space<vmem>>, vector<32x32xf32>
    %c232 = arith.constant 232 : index
    %c0_129 = arith.constant 0 : index
    %443 = vector.load %arg4[%c232, %c0_129] : memref<344x32xf32, #tpu.memory_space<vmem>>, vector<5x32xf32>
    %444 = arith.truncf %439 : vector<12x32xf32> to vector<12x32xbf16>
    %445 = arith.truncf %440 : vector<32x128xf32> to vector<32x128xbf16>
    %cst_130 = arith.constant dense<0.000000e+00> : vector<12x128xf32>
    %446 = tpu.matmul %444, %445, %cst_130 {dimension_numbers = #tpu.dot_dimension_numbers<[1], [0], [0], [1], [0, 0, 1, 1], [], []>} : vector<12x32xbf16>, vector<32x128xbf16>, vector<12x128xf32> -> vector<12x128xf32>
    %447 = vector.broadcast %441 : vector<1x128xf32> to vector<12x128xf32>
    %448 = arith.addf %446, %447 : vector<12x128xf32>
    %449 = arith.truncf %367 : vector<36x32xf32> to vector<36x32xbf16>
    %450 = arith.truncf %442 : vector<32x32xf32> to vector<32x32xbf16>
    %cst_131 = arith.constant dense<0.000000e+00> : vector<36x32xf32>
    %451 = tpu.matmul %449, %450, %cst_131 {dimension_numbers = #tpu.dot_dimension_numbers<[1], [0], [0], [1], [0, 0, 1, 1], [], []>} : vector<36x32xbf16>, vector<32x32xbf16>, vector<36x32xf32> -> vector<36x32xf32>
    %452 = vector.extract_strided_slice %443 {offsets = [0, 0], sizes = [1, 32], strides = [1, 1]} : vector<5x32xf32> to vector<1x32xf32>
    %453 = vector.broadcast %452 : vector<1x32xf32> to vector<36x32xf32>
    %454 = arith.addf %451, %453 : vector<36x32xf32>
    %455 = arith.truncf %448 : vector<12x128xf32> to vector<12x128xbf16>
    %cst_132 = arith.constant dense<0.000000e+00> : vector<72x128xf32>
    %456 = tpu.matmul %14, %455, %cst_132 {dimension_numbers = #tpu.dot_dimension_numbers<[1], [0], [0], [1], [0, 0, 1, 1], [], []>} : vector<72x12xbf16>, vector<12x128xbf16>, vector<72x128xf32> -> vector<72x128xf32>
    %457 = vector.extract_strided_slice %456 {offsets = [0, 0], sizes = [36, 128], strides = [1, 1]} : vector<72x128xf32> to vector<36x128xf32>
    %458 = vector.extract_strided_slice %456 {offsets = [36, 0], sizes = [36, 128], strides = [1, 1]} : vector<72x128xf32> to vector<36x128xf32>
    %459 = vector.extract_strided_slice %457 {offsets = [0, 32], sizes = [36, 32], strides = [1, 1]} : vector<36x128xf32> to vector<36x32xf32>
    %460 = vector.extract_strided_slice %458 {offsets = [0, 64], sizes = [36, 32], strides = [1, 1]} : vector<36x128xf32> to vector<36x32xf32>
    %461 = arith.addf %459, %460 : vector<36x32xf32>
    %462 = arith.addf %461, %454 : vector<36x32xf32>
    %cst_133 = arith.constant 5.000000e-01 : f32
    %463 = vector.broadcast %cst_133 : f32 to vector<36x32xf32>
    %464 = arith.mulf %463, %462 : vector<36x32xf32>
    %465 = math.tanh %464 : vector<36x32xf32>
    %cst_134 = arith.constant 5.000000e-01 : f32
    %466 = vector.broadcast %cst_134 : f32 to vector<36x32xf32>
    %467 = arith.mulf %466, %465 : vector<36x32xf32>
    %cst_135 = arith.constant 5.000000e-01 : f32
    %468 = vector.broadcast %cst_135 : f32 to vector<36x32xf32>
    %469 = arith.addf %467, %468 : vector<36x32xf32>
    %470 = vector.extract_strided_slice %457 {offsets = [0, 0], sizes = [36, 32], strides = [1, 1]} : vector<36x128xf32> to vector<36x32xf32>
    %471 = arith.mulf %470, %469 : vector<36x32xf32>
    %472 = tpu.concatenate %471, %469 in 1 : vector<36x32xf32>, vector<36x32xf32> -> vector<36x64xf32>
    %473 = arith.truncf %472 : vector<36x64xf32> to vector<36x64xbf16>
    %cst_136 = arith.constant dense<0.000000e+00> : vector<12x64xf32>
    %474 = tpu.matmul %17, %473, %cst_136 {dimension_numbers = #tpu.dot_dimension_numbers<[1], [0], [0], [1], [0, 0, 1, 1], [], []>} : vector<12x36xbf16>, vector<36x64xbf16>, vector<12x64xf32> -> vector<12x64xf32>
    %475 = vector.extract_strided_slice %474 {offsets = [0, 0], sizes = [12, 32], strides = [1, 1]} : vector<12x64xf32> to vector<12x32xf32>
    %476 = vector.extract_strided_slice %474 {offsets = [0, 32], sizes = [12, 32], strides = [1, 1]} : vector<12x64xf32> to vector<12x32xf32>
    %cst_137 = arith.constant 9.99999997E-7 : f32
    %477 = vector.broadcast %cst_137 : f32 to vector<12x32xf32>
    %478 = arith.addf %476, %477 : vector<12x32xf32>
    %479 = arith.divf %475, %478 : vector<12x32xf32>
    %480 = vector.extract_strided_slice %448 {offsets = [0, 96], sizes = [12, 32], strides = [1, 1]} : vector<12x128xf32> to vector<12x32xf32>
    %481 = arith.addf %480, %479 : vector<12x32xf32>
    %482 = vector.extract_strided_slice %443 {offsets = [1, 0], sizes = [1, 32], strides = [1, 1]} : vector<5x32xf32> to vector<1x32xf32>
    %483 = vector.broadcast %482 : vector<1x32xf32> to vector<12x32xf32>
    %484 = arith.mulf %481, %483 : vector<12x32xf32>
    %485 = vector.extract_strided_slice %443 {offsets = [2, 0], sizes = [1, 32], strides = [1, 1]} : vector<5x32xf32> to vector<1x32xf32>
    %486 = vector.broadcast %485 : vector<1x32xf32> to vector<12x32xf32>
    %487 = arith.addf %484, %486 : vector<12x32xf32>
    %cst_138 = arith.constant 5.000000e-01 : f32
    %488 = vector.broadcast %cst_138 : f32 to vector<12x32xf32>
    %489 = arith.mulf %488, %487 : vector<12x32xf32>
    %490 = math.tanh %489 : vector<12x32xf32>
    %cst_139 = arith.constant 5.000000e-01 : f32
    %491 = vector.broadcast %cst_139 : f32 to vector<12x32xf32>
    %492 = arith.mulf %491, %490 : vector<12x32xf32>
    %cst_140 = arith.constant 5.000000e-01 : f32
    %493 = vector.broadcast %cst_140 : f32 to vector<12x32xf32>
    %494 = arith.addf %492, %493 : vector<12x32xf32>
    %495 = arith.mulf %487, %494 : vector<12x32xf32>
    %496 = arith.addf %439, %495 : vector<12x32xf32>
    %c132 = arith.constant 132 : index
    %c0_141 = arith.constant 0 : index
    %497 = vector.load %arg3[%c132, %c0_141] : memref<198x128xf32, #tpu.memory_space<vmem>>, vector<32x128xf32>
    %c164 = arith.constant 164 : index
    %c0_142 = arith.constant 0 : index
    %498 = vector.load %arg3[%c164, %c0_142] : memref<198x128xf32, #tpu.memory_space<vmem>>, vector<1x128xf32>
    %c237 = arith.constant 237 : index
    %c0_143 = arith.constant 0 : index
    %499 = vector.load %arg4[%c237, %c0_143] : memref<344x32xf32, #tpu.memory_space<vmem>>, vector<32x32xf32>
    %c269 = arith.constant 269 : index
    %c0_144 = arith.constant 0 : index
    %500 = vector.load %arg4[%c269, %c0_144] : memref<344x32xf32, #tpu.memory_space<vmem>>, vector<5x32xf32>
    %501 = arith.truncf %424 : vector<4x32xf32> to vector<4x32xbf16>
    %502 = arith.truncf %497 : vector<32x128xf32> to vector<32x128xbf16>
    %cst_145 = arith.constant dense<0.000000e+00> : vector<4x128xf32>
    %503 = tpu.matmul %501, %502, %cst_145 {dimension_numbers = #tpu.dot_dimension_numbers<[1], [0], [0], [1], [0, 0, 1, 1], [], []>} : vector<4x32xbf16>, vector<32x128xbf16>, vector<4x128xf32> -> vector<4x128xf32>
    %504 = vector.broadcast %498 : vector<1x128xf32> to vector<4x128xf32>
    %505 = arith.addf %503, %504 : vector<4x128xf32>
    %506 = arith.truncf %496 : vector<12x32xf32> to vector<12x32xbf16>
    %507 = arith.truncf %499 : vector<32x32xf32> to vector<32x32xbf16>
    %cst_146 = arith.constant dense<0.000000e+00> : vector<12x32xf32>
    %508 = tpu.matmul %506, %507, %cst_146 {dimension_numbers = #tpu.dot_dimension_numbers<[1], [0], [0], [1], [0, 0, 1, 1], [], []>} : vector<12x32xbf16>, vector<32x32xbf16>, vector<12x32xf32> -> vector<12x32xf32>
    %509 = vector.extract_strided_slice %500 {offsets = [0, 0], sizes = [1, 32], strides = [1, 1]} : vector<5x32xf32> to vector<1x32xf32>
    %510 = vector.broadcast %509 : vector<1x32xf32> to vector<12x32xf32>
    %511 = arith.addf %508, %510 : vector<12x32xf32>
    %512 = arith.truncf %505 : vector<4x128xf32> to vector<4x128xbf16>
    %cst_147 = arith.constant dense<0.000000e+00> : vector<24x128xf32>
    %513 = tpu.matmul %10, %512, %cst_147 {dimension_numbers = #tpu.dot_dimension_numbers<[1], [0], [0], [1], [0, 0, 1, 1], [], []>} : vector<24x4xbf16>, vector<4x128xbf16>, vector<24x128xf32> -> vector<24x128xf32>
    %514 = vector.extract_strided_slice %513 {offsets = [0, 0], sizes = [12, 128], strides = [1, 1]} : vector<24x128xf32> to vector<12x128xf32>
    %515 = vector.extract_strided_slice %513 {offsets = [12, 0], sizes = [12, 128], strides = [1, 1]} : vector<24x128xf32> to vector<12x128xf32>
    %516 = vector.extract_strided_slice %514 {offsets = [0, 32], sizes = [12, 32], strides = [1, 1]} : vector<12x128xf32> to vector<12x32xf32>
    %517 = vector.extract_strided_slice %515 {offsets = [0, 64], sizes = [12, 32], strides = [1, 1]} : vector<12x128xf32> to vector<12x32xf32>
    %518 = arith.addf %516, %517 : vector<12x32xf32>
    %519 = arith.addf %518, %511 : vector<12x32xf32>
    %cst_148 = arith.constant 5.000000e-01 : f32
    %520 = vector.broadcast %cst_148 : f32 to vector<12x32xf32>
    %521 = arith.mulf %520, %519 : vector<12x32xf32>
    %522 = math.tanh %521 : vector<12x32xf32>
    %cst_149 = arith.constant 5.000000e-01 : f32
    %523 = vector.broadcast %cst_149 : f32 to vector<12x32xf32>
    %524 = arith.mulf %523, %522 : vector<12x32xf32>
    %cst_150 = arith.constant 5.000000e-01 : f32
    %525 = vector.broadcast %cst_150 : f32 to vector<12x32xf32>
    %526 = arith.addf %524, %525 : vector<12x32xf32>
    %527 = vector.extract_strided_slice %514 {offsets = [0, 0], sizes = [12, 32], strides = [1, 1]} : vector<12x128xf32> to vector<12x32xf32>
    %528 = arith.mulf %527, %526 : vector<12x32xf32>
    %529 = tpu.concatenate %528, %526 in 1 : vector<12x32xf32>, vector<12x32xf32> -> vector<12x64xf32>
    %530 = arith.truncf %529 : vector<12x64xf32> to vector<12x64xbf16>
    %cst_151 = arith.constant dense<0.000000e+00> : vector<4x64xf32>
    %531 = tpu.matmul %13, %530, %cst_151 {dimension_numbers = #tpu.dot_dimension_numbers<[1], [0], [0], [1], [0, 0, 1, 1], [], []>} : vector<4x12xbf16>, vector<12x64xbf16>, vector<4x64xf32> -> vector<4x64xf32>
    %532 = vector.extract_strided_slice %531 {offsets = [0, 0], sizes = [4, 32], strides = [1, 1]} : vector<4x64xf32> to vector<4x32xf32>
    %533 = vector.extract_strided_slice %531 {offsets = [0, 32], sizes = [4, 32], strides = [1, 1]} : vector<4x64xf32> to vector<4x32xf32>
    %cst_152 = arith.constant 9.99999997E-7 : f32
    %534 = vector.broadcast %cst_152 : f32 to vector<4x32xf32>
    %535 = arith.addf %533, %534 : vector<4x32xf32>
    %536 = arith.divf %532, %535 : vector<4x32xf32>
    %537 = vector.extract_strided_slice %505 {offsets = [0, 96], sizes = [4, 32], strides = [1, 1]} : vector<4x128xf32> to vector<4x32xf32>
    %538 = arith.addf %537, %536 : vector<4x32xf32>
    %539 = vector.extract_strided_slice %500 {offsets = [1, 0], sizes = [1, 32], strides = [1, 1]} : vector<5x32xf32> to vector<1x32xf32>
    %540 = vector.broadcast %539 : vector<1x32xf32> to vector<4x32xf32>
    %541 = arith.mulf %538, %540 : vector<4x32xf32>
    %542 = vector.extract_strided_slice %500 {offsets = [2, 0], sizes = [1, 32], strides = [1, 1]} : vector<5x32xf32> to vector<1x32xf32>
    %543 = vector.broadcast %542 : vector<1x32xf32> to vector<4x32xf32>
    %544 = arith.addf %541, %543 : vector<4x32xf32>
    %cst_153 = arith.constant 5.000000e-01 : f32
    %545 = vector.broadcast %cst_153 : f32 to vector<4x32xf32>
    %546 = arith.mulf %545, %544 : vector<4x32xf32>
    %547 = math.tanh %546 : vector<4x32xf32>
    %cst_154 = arith.constant 5.000000e-01 : f32
    %548 = vector.broadcast %cst_154 : f32 to vector<4x32xf32>
    %549 = arith.mulf %548, %547 : vector<4x32xf32>
    %cst_155 = arith.constant 5.000000e-01 : f32
    %550 = vector.broadcast %cst_155 : f32 to vector<4x32xf32>
    %551 = arith.addf %549, %550 : vector<4x32xf32>
    %552 = arith.mulf %544, %551 : vector<4x32xf32>
    %553 = arith.addf %424, %552 : vector<4x32xf32>
    %554 = vector.extract_strided_slice %500 {offsets = [3, 0], sizes = [1, 32], strides = [1, 1]} : vector<5x32xf32> to vector<1x32xf32>
    %555 = vector.broadcast %554 : vector<1x32xf32> to vector<12x32xf32>
    %556 = arith.mulf %519, %555 : vector<12x32xf32>
    %557 = vector.extract_strided_slice %500 {offsets = [4, 0], sizes = [1, 32], strides = [1, 1]} : vector<5x32xf32> to vector<1x32xf32>
    %558 = vector.broadcast %557 : vector<1x32xf32> to vector<12x32xf32>
    %559 = arith.addf %556, %558 : vector<12x32xf32>
    %cst_156 = arith.constant 5.000000e-01 : f32
    %560 = vector.broadcast %cst_156 : f32 to vector<12x32xf32>
    %561 = arith.mulf %560, %559 : vector<12x32xf32>
    %562 = math.tanh %561 : vector<12x32xf32>
    %cst_157 = arith.constant 5.000000e-01 : f32
    %563 = vector.broadcast %cst_157 : f32 to vector<12x32xf32>
    %564 = arith.mulf %563, %562 : vector<12x32xf32>
    %cst_158 = arith.constant 5.000000e-01 : f32
    %565 = vector.broadcast %cst_158 : f32 to vector<12x32xf32>
    %566 = arith.addf %564, %565 : vector<12x32xf32>
    %567 = arith.mulf %559, %566 : vector<12x32xf32>
    %568 = arith.addf %496, %567 : vector<12x32xf32>
    %c165 = arith.constant 165 : index
    %c0_159 = arith.constant 0 : index
    %569 = vector.load %arg3[%c165, %c0_159] : memref<198x128xf32, #tpu.memory_space<vmem>>, vector<32x128xf32>
    %c197 = arith.constant 197 : index
    %c0_160 = arith.constant 0 : index
    %570 = vector.load %arg3[%c197, %c0_160] : memref<198x128xf32, #tpu.memory_space<vmem>>, vector<1x128xf32>
    %c274 = arith.constant 274 : index
    %c0_161 = arith.constant 0 : index
    %571 = vector.load %arg4[%c274, %c0_161] : memref<344x32xf32, #tpu.memory_space<vmem>>, vector<32x32xf32>
    %c306 = arith.constant 306 : index
    %c0_162 = arith.constant 0 : index
    %572 = vector.load %arg4[%c306, %c0_162] : memref<344x32xf32, #tpu.memory_space<vmem>>, vector<5x32xf32>
    %573 = arith.truncf %553 : vector<4x32xf32> to vector<4x32xbf16>
    %574 = arith.truncf %569 : vector<32x128xf32> to vector<32x128xbf16>
    %cst_163 = arith.constant dense<0.000000e+00> : vector<4x128xf32>
    %575 = tpu.matmul %573, %574, %cst_163 {dimension_numbers = #tpu.dot_dimension_numbers<[1], [0], [0], [1], [0, 0, 1, 1], [], []>} : vector<4x32xbf16>, vector<32x128xbf16>, vector<4x128xf32> -> vector<4x128xf32>
    %576 = vector.broadcast %570 : vector<1x128xf32> to vector<4x128xf32>
    %577 = arith.addf %575, %576 : vector<4x128xf32>
    %578 = arith.truncf %568 : vector<12x32xf32> to vector<12x32xbf16>
    %579 = arith.truncf %571 : vector<32x32xf32> to vector<32x32xbf16>
    %cst_164 = arith.constant dense<0.000000e+00> : vector<12x32xf32>
    %580 = tpu.matmul %578, %579, %cst_164 {dimension_numbers = #tpu.dot_dimension_numbers<[1], [0], [0], [1], [0, 0, 1, 1], [], []>} : vector<12x32xbf16>, vector<32x32xbf16>, vector<12x32xf32> -> vector<12x32xf32>
    %581 = vector.extract_strided_slice %572 {offsets = [0, 0], sizes = [1, 32], strides = [1, 1]} : vector<5x32xf32> to vector<1x32xf32>
    %582 = vector.broadcast %581 : vector<1x32xf32> to vector<12x32xf32>
    %583 = arith.addf %580, %582 : vector<12x32xf32>
    %584 = arith.truncf %577 : vector<4x128xf32> to vector<4x128xbf16>
    %cst_165 = arith.constant dense<0.000000e+00> : vector<24x128xf32>
    %585 = tpu.matmul %10, %584, %cst_165 {dimension_numbers = #tpu.dot_dimension_numbers<[1], [0], [0], [1], [0, 0, 1, 1], [], []>} : vector<24x4xbf16>, vector<4x128xbf16>, vector<24x128xf32> -> vector<24x128xf32>
    %586 = vector.extract_strided_slice %585 {offsets = [0, 0], sizes = [12, 128], strides = [1, 1]} : vector<24x128xf32> to vector<12x128xf32>
    %587 = vector.extract_strided_slice %585 {offsets = [12, 0], sizes = [12, 128], strides = [1, 1]} : vector<24x128xf32> to vector<12x128xf32>
    %588 = vector.extract_strided_slice %586 {offsets = [0, 32], sizes = [12, 32], strides = [1, 1]} : vector<12x128xf32> to vector<12x32xf32>
    %589 = vector.extract_strided_slice %587 {offsets = [0, 64], sizes = [12, 32], strides = [1, 1]} : vector<12x128xf32> to vector<12x32xf32>
    %590 = arith.addf %588, %589 : vector<12x32xf32>
    %591 = arith.addf %590, %583 : vector<12x32xf32>
    %cst_166 = arith.constant 5.000000e-01 : f32
    %592 = vector.broadcast %cst_166 : f32 to vector<12x32xf32>
    %593 = arith.mulf %592, %591 : vector<12x32xf32>
    %594 = math.tanh %593 : vector<12x32xf32>
    %cst_167 = arith.constant 5.000000e-01 : f32
    %595 = vector.broadcast %cst_167 : f32 to vector<12x32xf32>
    %596 = arith.mulf %595, %594 : vector<12x32xf32>
    %cst_168 = arith.constant 5.000000e-01 : f32
    %597 = vector.broadcast %cst_168 : f32 to vector<12x32xf32>
    %598 = arith.addf %596, %597 : vector<12x32xf32>
    %599 = vector.extract_strided_slice %586 {offsets = [0, 0], sizes = [12, 32], strides = [1, 1]} : vector<12x128xf32> to vector<12x32xf32>
    %600 = arith.mulf %599, %598 : vector<12x32xf32>
    %601 = tpu.concatenate %600, %598 in 1 : vector<12x32xf32>, vector<12x32xf32> -> vector<12x64xf32>
    %602 = arith.truncf %601 : vector<12x64xf32> to vector<12x64xbf16>
    %cst_169 = arith.constant dense<0.000000e+00> : vector<4x64xf32>
    %603 = tpu.matmul %13, %602, %cst_169 {dimension_numbers = #tpu.dot_dimension_numbers<[1], [0], [0], [1], [0, 0, 1, 1], [], []>} : vector<4x12xbf16>, vector<12x64xbf16>, vector<4x64xf32> -> vector<4x64xf32>
    %604 = vector.extract_strided_slice %603 {offsets = [0, 0], sizes = [4, 32], strides = [1, 1]} : vector<4x64xf32> to vector<4x32xf32>
    %605 = vector.extract_strided_slice %603 {offsets = [0, 32], sizes = [4, 32], strides = [1, 1]} : vector<4x64xf32> to vector<4x32xf32>
    %cst_170 = arith.constant 9.99999997E-7 : f32
    %606 = vector.broadcast %cst_170 : f32 to vector<4x32xf32>
    %607 = arith.addf %605, %606 : vector<4x32xf32>
    %608 = arith.divf %604, %607 : vector<4x32xf32>
    %609 = vector.extract_strided_slice %577 {offsets = [0, 96], sizes = [4, 32], strides = [1, 1]} : vector<4x128xf32> to vector<4x32xf32>
    %610 = arith.addf %609, %608 : vector<4x32xf32>
    %611 = vector.extract_strided_slice %572 {offsets = [1, 0], sizes = [1, 32], strides = [1, 1]} : vector<5x32xf32> to vector<1x32xf32>
    %612 = vector.broadcast %611 : vector<1x32xf32> to vector<4x32xf32>
    %613 = arith.mulf %610, %612 : vector<4x32xf32>
    %614 = vector.extract_strided_slice %572 {offsets = [2, 0], sizes = [1, 32], strides = [1, 1]} : vector<5x32xf32> to vector<1x32xf32>
    %615 = vector.broadcast %614 : vector<1x32xf32> to vector<4x32xf32>
    %616 = arith.addf %613, %615 : vector<4x32xf32>
    %cst_171 = arith.constant 5.000000e-01 : f32
    %617 = vector.broadcast %cst_171 : f32 to vector<4x32xf32>
    %618 = arith.mulf %617, %616 : vector<4x32xf32>
    %619 = math.tanh %618 : vector<4x32xf32>
    %cst_172 = arith.constant 5.000000e-01 : f32
    %620 = vector.broadcast %cst_172 : f32 to vector<4x32xf32>
    %621 = arith.mulf %620, %619 : vector<4x32xf32>
    %cst_173 = arith.constant 5.000000e-01 : f32
    %622 = vector.broadcast %cst_173 : f32 to vector<4x32xf32>
    %623 = arith.addf %621, %622 : vector<4x32xf32>
    %624 = arith.mulf %616, %623 : vector<4x32xf32>
    %625 = arith.addf %553, %624 : vector<4x32xf32>
    %cst_174 = arith.constant dense<0.000000e+00> : vector<32xf32>
    %626 = vector.multi_reduction <add>, %625, %cst_174 [0] : vector<4x32xf32> to vector<32xf32>
    %627 = vector.shape_cast %626 : vector<32xf32> to vector<1x32xf32>
    %cst_175 = arith.constant 4.000000e+00 : f32
    %628 = vector.broadcast %cst_175 : f32 to vector<1x32xf32>
    %629 = arith.divf %627, %628 : vector<1x32xf32>
    %c311 = arith.constant 311 : index
    %c0_176 = arith.constant 0 : index
    %630 = vector.load %arg4[%c311, %c0_176] : memref<344x32xf32, #tpu.memory_space<vmem>>, vector<32x1xf32>
    %cst_177 = arith.constant dense<0.000000e+00> : vector<1x1xf32>
    %631 = tpu.matmul %629, %630, %cst_177 {dimension_numbers = #tpu.dot_dimension_numbers<[1], [0], [0], [1], [0, 0, 1, 1], [], []>} : vector<1x32xf32>, vector<32x1xf32>, vector<1x1xf32> -> vector<1x1xf32>
    %c343 = arith.constant 343 : index
    %c0_178 = arith.constant 0 : index
    %632 = vector.load %arg4[%c343, %c0_178] : memref<344x32xf32, #tpu.memory_space<vmem>>, vector<1x1xf32>
    %633 = arith.addf %631, %632 : vector<1x1xf32>
    %c0_179 = arith.constant 0 : index
    %c0_180 = arith.constant 0 : index
    %c0_181 = arith.constant 0 : index
    %634 = vector.load %arg5[%c0_179, %c0_180, %c0_181] : memref<1x1x1xf32, #tpu.memory_space<vmem>>, vector<1x1x1xf32>
    %635 = vector.shape_cast %634 : vector<1x1x1xf32> to vector<1x1xf32>
    %636 = vector.shape_cast %633 : vector<1x1xf32> to vector<1x1x1xf32>
    tpu.vector_store %arg5[%c0_179, %c0_180, %c0_181], %636 {strides = array<i32>} : memref<1x1x1xf32, #tpu.memory_space<vmem>>, vector<1x1x1xf32>,
    return
  }
  func.func @transform_0(%arg0: i32) -> (i32, i32, i32) {
    %c0_i32 = arith.constant 0 : i32
    %c0_i32_0 = arith.constant 0 : i32
    %c0_i32_1 = arith.constant 0 : i32
    return %arg0, %c0_i32, %c0_i32_0 : i32, i32, i32
  }
  func.func @transform_1(%arg0: i32) -> (i32, i32, i32) {
    %c0_i32 = arith.constant 0 : i32
    %c0_i32_0 = arith.constant 0 : i32
    %c0_i32_1 = arith.constant 0 : i32
    return %arg0, %c0_i32, %c0_i32_0 : i32, i32, i32
  }
  func.func @transform_2(%arg0: i32) -> (i32, i32) {
    %c0_i32 = arith.constant 0 : i32
    %c0_i32_0 = arith.constant 0 : i32
    %c0_i32_1 = arith.constant 0 : i32
    return %c0_i32, %c0_i32_0 : i32, i32
  }
  func.func @transform_3(%arg0: i32) -> (i32, i32) {
    %c0_i32 = arith.constant 0 : i32
    %c0_i32_0 = arith.constant 0 : i32
    %c0_i32_1 = arith.constant 0 : i32
    return %c0_i32, %c0_i32_0 : i32, i32
  }
  func.func @transform_4(%arg0: i32) -> (i32, i32, i32) {
    %c0_i32 = arith.constant 0 : i32
    %c0_i32_0 = arith.constant 0 : i32
    %c0_i32_1 = arith.constant 0 : i32
    return %arg0, %c0_i32, %c0_i32_0 : i32, i32, i32
  }
}

</mosaic_0001>

<bundles_post_ra>
// kernel: tpu_custom_call.1
= control target key start
LH: loop header
LB: loop body
LE: loop exit
PB: predicated region body
PF: predicated region fallthrough
CT: control target
= control target key end

     0   :  { %s2985_s15 = smov 0   ;;  %s4015_s0 = inlined_call_operand.vmem [shape: f32[2,52,8], index: 0, kind: input, shape index: {}]   ;;  %s4016_s1 = inlined_call_operand.vmem [shape: f32[2,96,12], index: 1, kind: input, shape index: {}]   ;;  %s4017_s2 = inlined_call_operand.vmem [shape: f32[198,128], index: 2, kind: input, shape index: {}]   ;;  %s4018_s3 = inlined_call_operand.vmem [shape: f32[344,32], index: 3, kind: input, shape index: {}]   ;;  %s4019_s4 = inlined_call_operand.vmem [shape: f32[2,1,1], index: 4, kind: output, shape index: {}]  }
   0x1 LB: > { %s2689_s16 = sadd.s32 4294967295, %s2952_s15   ;;  %p2693_p0 = scmp.ge.s32.totalorder %s2952_s15, 1  ;;  %s2952_s15 = sphi %s2985_s15, %s14_s15  }
   0x2   : > { %p172_p1 = scmp.lt.s32.totalorder %s2952_s15, 3 }
   0x4   : > { %p173_p2 = pnand %p2693_p0, %p172_p1 }
   0x5   : > { %p201_p3 = scmp.lt.s32.totalorder (!%p173_p2), %s2689_s16, 1  ;;  %s2957_s21 = smov (!%p173_p2), 96  }
   0x6   : > { %176 = sbr.rel (%p173_p2) target bundleno = 6252 (0x186c), region = 36  ;;  %s2958_s28 = smov (!%p173_p2), 32  }
   0xb   : > { %vm239_vm0 = vcmask 1043456   ;;  %v336_v0 = vld [vmem:[%s4018_s3] sm:$0xff]  ;;  %v2954_v1 = vmov 0   ;;  %s4023_s16 = smov (!%p201_p3, %s2689_s16), 1  ;;  %vm340_vm1 = vcmask 64512   ;;  %v422_v8 = vld [vmem:[%s4018_s3 + $0xb] sm:$0xff] }
   0xc   : > { %2765 = vset.pattern.permute.xlu0 %v2954_v1  ;;  %v338_v2 = vpack.c.bf16 %v336_v0, %v336_v0  ;;  %2767 = vset.pattern.permute.xlu1 %v2954_v1  ;;  %s2748_s19 = smul.u32 56, %s4023_s16  ;;  %v423_v9 = vld [vmem:[%s4018_s3 + $0x13] sm:$0xff]  ;;  %v3020_v15 = vld [vmem:[%s4018_s3 + $0x8] sm:$0x7]  ;;  %vm360_vm2 = vcmask 257024   ;;  %vm427_vm3 = vcmask 130048   ;;  %s213_s5 = scalar_lea.vmem %s4019_s4, %s4023_s16 }
   0xd   : > { %2766 = vset.pattern.permute.xlu2 %v2954_v1  ;;  %v425_v10 = vpack.c.bf16 %v423_v9, %v422_v8  ;;  %v2768_v11 = vld [vmem:[%s4018_s3 + $0x57] ss:$0 sm:$0xff]  ;;  %v339_v19 = vperm.slane %v3020_v15, 0  ;;  %v2955_v32 = vmov 32.0   ;;  %v3029_v37 = vld [vmem:[%s4018_s3 + $0x1b] sm:$0x7] }
   0xe   : > { %v345_v3 = vsel %vm239_vm0, %v338_v2, 0  ;;  %s3003_s22 = scalar_lea.vmem %s4015_s0, %s2748_s19  ;;  %v426_v38 = vperm.slane %v3029_v37, 0  ;;  %vm448_vm5 = vcmask 125952   ;;  %v2956_v52 = vmov 16.0   ;;  %s2749_s7 = smul.u32 96, %s4023_s16 }
   0xf   : > { %354 = vmatpush.bf16.msra.mxu0 %v345_v3  ;;  %v216_v4 = vld [vmem:[%s3003_s22 + $0x4] sm:$0xff]  ;;  %v215_v5 = vld [vmem:[%s3003_s22] sm:$0xf]  ;;  %v217_v7 = vld [vmem:[%s3003_s22 + $0xc] sm:$0xf]  ;;  %438 = vmatpush.bf16.msra.mxu1 %v425_v10  ;;  %vm536_vm10 = vcmask 261120  }
  0x10   : > { %402 = vperm.xlu0 %2765, %v216_v4   ;;  %v337_v6 = vpack.c.bf16 %v215_v5, %v215_v5  ;;  %v222_v31 = vld [vmem:[%s3003_s22 + $0x30] sm:$0xf]  ;;  %v219_v55 = vld [vmem:[%s3003_s22 + $0x18] sm:$0xff]  ;;  %v220_v10 = vld [vmem:[%s3003_s22 + $0x20] sm:$0xff]  ;;  %s3144_s10 = scalar_lea.vmem %s4016_s1, %s2749_s7 }
  0x11   : > { %v218_v8 = vld [vmem:[%s3003_s22 + $0x10] sm:$0xff] }
  0x12   : > { %2696 = vmatmul.msk.bf16.vlgmr.msra.gmra.mxu0 %vm340_vm1, %v337_v6 }
  0x18   : > { %407 = vperm.xlu0 %2765, %v217_v7  }
  0x82   : > { %v403_v12 = vpop.permute.xlu0 %402 }
  0x83   : > { %v411_v13 = vsub.f32 %v403_v12, %v2768_v11 }
  0x85   : > { %v413_v14 = vmul.f32 -1.875, %v411_v13 }
  0x87   : > { %v415_v16 = vmul.f32 %v413_v14, %v411_v13  ;;  %v221_v13 = vld [vmem:[%s3003_s22 + $0x28] sm:$0xff] }
  0x89   : > { %v417_v21 = vmul.f32 1.442695, %v415_v16 }
  0x8a   : > { %v408_v17 = vpop.permute.xlu0 %407 }
  0x8b   : > { %v412_v18 = vsub.f32 %v408_v17, %v2768_v11  ;;  %2776 = vpow2.f32 %v417_v21 }
  0x8d   : > { %v414_v20 = vmul.f32 -1.875, %v412_v18 }
  0x8f   : > { %v416_v22 = vmul.f32 %v414_v20, %v412_v18  ;;  %v356_v23 = vpop.f32.mrf.mxu0  ;;  %v390_v20 = vperm.slane %v3020_v15, 1 }
  0x90   : > { %v357_v24 = vadd.f32 %v356_v23, %v339_v19 }
  0x91   : > { %v419_v25 = vmul.f32 1.442695, %v416_v22  ;;  %v2777_v28 = vpop.eup %2776  ;;  %v392_v22 = vperm.slane %v3020_v15, 2  ;;  %v1023_v15 = vld [vmem:[%s4017_s2] sm:$0xff] }
  0x92   : > { %v361_v26 = vsel %vm360_vm2, %v357_v24, 0.0 }
  0x93   : > { %2778 = vpow2.f32 %v419_v25  ;;  %362 = vadd.xlane.f32.xlu0 %v361_v26  ;;  %v1025_v26 = vld [vmem:[%s4017_s2 + $0x10] sm:$0xff] }
  0x94   : > { %2780 = vrcp.f32 %v2955_v32 }
  0x95   : > { %2782 = vrcp.f32 %v2956_v52 }
  0x97   : > { %v358_v27 = vpop.f32.mrf.mxu0 }
  0x98   : > { %v1026_v27 = vld [vmem:[%s4017_s2 + $0x18] sm:$0xff] }
  0x99   : > { %v2779_v29 = vpop.eup %2778 }
  0x9a   : > { %v424_v30 = vpack.c.bf16 %v2779_v29, %v2777_v28  ;;  %v2781_v33 = vpop.eup %2780  ;;  %v1035_v29 = vpack.c.bf16 %v1026_v27, %v1025_v26 }
  0x9b   : > { %v365_v34 = vmul.f32 32.0, %v2781_v33  ;;  %vm369_vm4 = vweird.f32 %v2781_v33  ;;  %v2783_v53 = vpop.eup %2782 }
  0x9c   : > { %2697 = vmatmul.msk.bf16.vlgmr.msra.gmra.mxu1 %vm427_vm3, %v424_v30  ;;  %v453_v54 = vmul.f32 16.0, %v2783_v53  ;;  %vm457_vm6 = vweird.f32 %v2783_v53 }
  0x9d   : > { %v366_v35 = vsub.f32 1.0, %v365_v34  ;;  %1046 = vmatpush.bf16.msrb.mxu1 %v1035_v29 }
  0x9e   : > { %v454_v56 = vsub.f32 1.0, %v453_v54 }
  0x9f   : > { %v367_v36 = vmul.f32 %v2781_v33, %v366_v35 }
  0xa0   : > { %v455_v57 = vmul.f32 %v2783_v53, %v454_v56 }
  0xa1   : > { %v368_v39 = vadd.f32 %v2781_v33, %v367_v36  ;;  %v650_v36 = vld [vmem:[%s4018_s3 + $0x31] sm:$0xff] }
  0xa2   : > { %v456_v58 = vadd.f32 %v2783_v53, %v455_v57  ;;  %v514_v57 = vld [vmem:[%s4018_s3 + $0x1e] sm:$0xff] }
  0xa3   : > { %v3032_v42 = vsel %vm369_vm4, %v2781_v33, %v368_v39  ;;  %vm1082_vm4 = vcmask 1041408  }
  0xa4   : > { %v3039_v59 = vsel %vm457_vm6, %v2783_v53, %v456_v58  ;;  %v515_v58 = vld [vmem:[%s4018_s3 + $0x26] sm:$0xff]  ;;  %vm1075_vm6 = vcmask 31744  }
  0xa7   : > { %620 = vperm.xlu0 %2765, %v222_v31   ;;  %v1024_v31 = vld [vmem:[%s4017_s2 + $0x8] sm:$0xff] }
  0xa8   : > { %v1034_v33 = vpack.c.bf16 %v1024_v31, %v1023_v15 }
  0xaa   : > { %1047 = vmatpush.bf16.msrb.mxu1 %v1034_v33 }
 0x106   : > { %v363_v44 = vpop.xlane.xlu0 %362 }
 0x107   : > { %v371_v45 = vmul.f32 %v3032_v42, %v363_v44 }
 0x109   : > { %v372_v47 = vsub.f32 %v357_v24, %v371_v45  ;;  %v3086_v45 = vld [vmem:[%s4018_s3 + $0x58] ss:$0 sm:$0xff] }
 0x10b   : > { %v373_v50 = vmul.f32 %v372_v47, %v372_v47 }
 0x10d   : > { %v374_v51 = vsel %vm360_vm2, %v373_v50, 0.0 }
 0x119   : > { %v440_v40 = vpop.f32.mrf.mxu1 }
 0x11a   : > { %v441_v41 = vadd.f32 %v440_v40, %v426_v38 }
 0x11c   : > { %v445_v43 = vsel %vm427_vm3, %v441_v41, 0.0 }
 0x11d   : > { %446 = vadd.xlane.f32.xlu1 %v445_v43 }
 0x121   : > { %v442_v46 = vpop.f32.mrf.mxu1 }
 0x122   : > { %v443_v48 = vadd.f32 %v442_v46, %v426_v38  ;;  %v651_v38 = vld [vmem:[%s4018_s3 + $0x39] sm:$0xff] }
 0x123   : > { %v655_v39 = vpack.c.bf16 %v651_v38, %v650_v36 }
 0x124   : > { %v449_v49 = vsel %vm448_vm5, %v443_v48, 0.0 }
 0x125   : > { %450 = vadd.xlane.f32.xlu1 %v449_v49  ;;  %673 = vmatpush.bf16.msra.mxu3 %v655_v39 }
 0x12d   : > { %375 = vadd.xlane.f32.xlu1 %v374_v51 }
 0x146   : > { %605 = vperm.xlu1 %2767, %v219_v55  }
 0x190   : > { %v447_v60 = vpop.xlane.xlu1 %446 }
 0x191   : > { %v459_v61 = vmul.f32 %v3039_v59, %v447_v60 }
 0x193   : > { %v3042_v62 = vsub.f32 %v441_v41, %v459_v61  ;;  %v517_v61 = vpack.c.bf16 %v515_v58, %v514_v57 }
 0x195   : > { %v463_v63 = vmul.f32 %v3042_v62, %v3042_v62  ;;  %529 = vmatpush.bf16.msra.mxu2 %v517_v61 }
 0x197   : > { %v465_v0 = vsel %vm427_vm3, %v463_v63, 0.0 }
 0x198   : > { %466 = vadd.xlane.f32.xlu2 %v465_v0  ;;  %v451_v1 = vpop.xlane.xlu1 %450 }
 0x199   : > { %v460_v2 = vmul.f32 %v3039_v59, %v451_v1 }
 0x19b   : > { %v3048_v3 = vsub.f32 %v443_v48, %v460_v2 }
 0x19d   : > { %v464_v4 = vmul.f32 %v3048_v3, %v3048_v3 }
 0x19f   : > { %v468_v5 = vsel %vm448_vm5, %v464_v4, 0.0 }
 0x1a0   : > { %469 = vadd.xlane.f32.xlu2 %v468_v5  ;;  %v376_v6 = vpop.xlane.xlu1 %375 }
 0x1a1   : > { %v377_v7 = vmul.f32 %v376_v6, %v3032_v42  ;;  %v497_v6 = vperm.slane %v3029_v37, 1 }
 0x1a3   : > { %v378_v9 = vadd.f32 1e-05, %v377_v7 }
 0x1a5   : > { %2784 = vrsqrt.f32 %v378_v9  ;;  %vm385_vm7 = vweird.f32 %v378_v9 }
 0x1ab   : > { %v2785_v11 = vpop.eup %2784 }
 0x1ac   : > { %v380_v12 = vmul.f32 %v2785_v11, %v378_v9  ;;  %vm386_vm8 = vweird.f32 %v2785_v11 }
 0x1ad   : > { %vm387_vm9 = vmor %vm385_vm7, %vm386_vm8 }
 0x1ae   : > { %v381_v14 = vmul.f32 %v2785_v11, %v380_v12 }
 0x1b0   : > { %v382_v16 = vmul.f32 0.5, %v381_v14 }
 0x1b2   : > { %v383_v17 = vsub.f32 1.5, %v382_v16 }
 0x1b4   : > { %v384_v18 = vmul.f32 %v2785_v11, %v383_v17 }
 0x1b6   : > { %v388_v19 = vsel %vm387_vm9, %v2785_v11, %v384_v18 }
 0x1b7   : > { %v389_v21 = vmul.f32 %v388_v19, %v372_v47 }
 0x1b8   : > { %600 = vperm.xlu2 %2766, %v218_v8   ;;  %v606_v44 = vpop.permute.xlu1 %605 }
 0x1b9   : > { %v391_v23 = vmul.f32 %v390_v20, %v389_v21  ;;  %v625_v46 = vsub.f32 %v606_v44, %v3086_v45 }
 0x1bb   : > { %v393_v24 = vadd.f32 %v392_v22, %v391_v23  ;;  %v630_v51 = vmul.f32 -7.5, %v625_v46 }
 0x1bd   : > { %v394_v25 = vmul.f32 0.5, %v393_v24  ;;  %v635_v54 = vmul.f32 %v630_v51, %v625_v46 }
 0x1bf   : > { %2786 = vtanh.f32 %v394_v25  ;;  %v641_v2 = vmul.f32 1.442695, %v635_v54 }
 0x1c0   : > { %610 = vperm.xlu2 %2766, %v220_v10   ;;  %v500_v10 = vperm.slane %v3029_v37, 2 }
 0x1c5   : > { %v2787_v28 = vpop.eup %2786 }
 0x1c6   : > { %v396_v30 = vmul.f32 0.5, %v2787_v28 }
 0x1c8   : > { %615 = vperm.xlu2 %2766, %v221_v13   ;;  %v397_v32 = vadd.f32 0.5, %v396_v30 }
 0x1ca   : > { %v3071_v34 = vmul.f32 %v397_v32, %v393_v24  ;;  %v621_v32 = vpop.permute.xlu0 %620 }
 0x1cb   : > { %v628_v38 = vsub.f32 %v621_v32, %v3086_v45 }
 0x1cc   : > { %v1033_v35 = vpack.c.bf16 %v3071_v34, %v3071_v34 }
 0x1ce   : > { %2705 = vmatmul.msk.bf16.vlgmr.msrb.gmra.mxu1 %vm536_vm10, %v1033_v35 }
 0x20b   : > { %v467_v40 = vpop.xlane.xlu2 %466 }
 0x20c   : > { %v471_v41 = vmul.f32 %v467_v40, %v3039_v59  ;;  %v633_v40 = vmul.f32 -7.5, %v628_v38 }
 0x20e   : > { %v473_v43 = vadd.f32 1e-05, %v471_v41 }
 0x210   : > { %2788 = vrsqrt.f32 %v473_v43  ;;  %vm481_vm12 = vweird.f32 %v473_v43 }
 0x213   : > { %v470_v47 = vpop.xlane.xlu2 %469 }
 0x214   : > { %v472_v48 = vmul.f32 %v470_v47, %v3039_v59 }
 0x216   : > { %v2789_v49 = vpop.eup %2788  ;;  %v474_v50 = vadd.f32 1e-05, %v472_v48  ;;  %v638_v48 = vmul.f32 %v633_v40, %v628_v38 }
 0x217   : > { %v476_v52 = vmul.f32 %v2789_v49, %v473_v43  ;;  %vm482_vm11 = vweird.f32 %v2789_v49 }
 0x218   : > { %2790 = vrsqrt.f32 %v474_v50  ;;  %vm483_vm13 = vmor %vm481_vm12, %vm482_vm11  ;;  %vm491_vm15 = vweird.f32 %v474_v50 }
 0x219   : > { %v477_v53 = vmul.f32 %v2789_v49, %v476_v52  ;;  %2792 = vpow2.f32 %v641_v2 }
 0x21b   : > { %v478_v55 = vmul.f32 0.5, %v477_v53  ;;  %v601_v56 = vpop.permute.xlu2 %600  ;;  %v647_v53 = vmul.f32 1.442695, %v638_v48 }
 0x21c   : > { %v624_v60 = vsub.f32 %v601_v56, %v3086_v45  ;;  %v2770_v56 = vld [vmem:[%s4017_s2 + $0x20] ss:$0 sm:$0xff] }
 0x21d   : > { %v479_v63 = vsub.f32 1.5, %v478_v55 }
 0x21e   : > { %v2791_v0 = vpop.eup %2790  ;;  %v629_v1 = vmul.f32 -7.5, %v624_v60 }
 0x21f   : > { %v480_v4 = vmul.f32 %v2789_v49, %v479_v63  ;;  %v486_v5 = vmul.f32 %v2791_v0, %v474_v50  ;;  %vm492_vm14 = vweird.f32 %v2791_v0  ;;  %v2793_v22 = vpop.eup %2792 }
 0x220   : > { %v634_v7 = vmul.f32 %v629_v1, %v624_v60  ;;  %vm493_vm1 = vmor %vm491_vm15, %vm492_vm14  ;;  %v3119_v1 = vld [vmem:[%s4018_s3 + $0x41] sm:$0x7] }
 0x221   : > { %v484_v8 = vsel %vm483_vm13, %v2789_v49, %v480_v4  ;;  %v487_v9 = vmul.f32 %v2791_v0, %v486_v5  ;;  %v656_v2 = vperm.slane %v3119_v1, 0 }
 0x222   : > { %v495_v11 = vmul.f32 %v484_v8, %v3042_v62  ;;  %v639_v12 = vmul.f32 1.442695, %v634_v7 }
 0x223   : > { %v488_v13 = vmul.f32 0.5, %v487_v9  ;;  %v611_v14 = vpop.permute.xlu2 %610 }
 0x224   : > { %2794 = vpow2.f32 %v639_v12  ;;  %v626_v16 = vsub.f32 %v611_v14, %v3086_v45  ;;  %v498_v17 = vmul.f32 %v497_v6, %v495_v11 }
 0x225   : > { %v489_v18 = vsub.f32 1.5, %v488_v13 }
 0x226   : > { %v631_v19 = vmul.f32 -7.5, %v626_v16  ;;  %v501_v20 = vadd.f32 %v500_v10, %v498_v17 }
 0x227   : > { %v490_v21 = vmul.f32 %v2791_v0, %v489_v18 }
 0x228   : > { %v503_v23 = vmul.f32 0.5, %v501_v20  ;;  %v636_v24 = vmul.f32 %v631_v19, %v626_v16 }
 0x229   : > { %v494_v37 = vsel %vm493_vm1, %v2791_v0, %v490_v21 }
 0x22a   : > { %v2795_v62 = vpop.eup %2794  ;;  %v496_v25 = vmul.f32 %v494_v37, %v3048_v3  ;;  %2796 = vtanh.f32 %v503_v23  ;;  %v643_v30 = vmul.f32 1.442695, %v636_v24 }
 0x22b   : > { %v616_v26 = vpop.permute.xlu2 %615  ;;  %v652_v27 = vpack.c.bf16 %v2793_v22, %v2795_v62 }
 0x22c   : > { %v627_v28 = vsub.f32 %v616_v26, %v3086_v45  ;;  %v499_v29 = vmul.f32 %v497_v6, %v496_v25  ;;  %2798 = vpow2.f32 %v643_v30  ;;  %v3127_v6 = vld [vmem:[%s4018_s3 + $0x2e] sm:$0x7]  ;;  %v223_v26 = vld [vmem:[%s3144_s10] sm:$0xff] }
 0x22d   : > { %2699 = vmatmul.msk.bf16.vlgmr.msra.gmra.mxu3 %vm427_vm3, %v652_v27  ;;  %v518_v8 = vperm.slane %v3127_v6, 0  ;;  %v3149_v27 = vld [vmem:[%s3144_s10 + $0x8] sm:$0xff] }
 0x22e   : > { %v632_v15 = vmul.f32 -7.5, %v627_v28  ;;  %v502_v31 = vadd.f32 %v500_v10, %v499_v29 }
 0x230   : > { %v637_v33 = vmul.f32 %v632_v15, %v627_v28  ;;  %v504_v35 = vmul.f32 0.5, %v502_v31  ;;  %v2797_v36 = vpop.eup %2796  ;;  %v3152_v28 = vpack.c.bf16 %v3149_v27, %v223_v26 }
 0x231   : > { %v507_v3 = vmul.f32 0.5, %v2797_v36  ;;  %v3167_v36 = vld [vmem:[%s3144_s10 + $0x10] sm:$0xff] }
 0x232   : > { %v645_v39 = vmul.f32 1.442695, %v637_v33  ;;  %2800 = vtanh.f32 %v504_v35  ;;  %v2799_v41 = vpop.eup %2798 }
 0x233   : > { %v509_v46 = vadd.f32 0.5, %v507_v3  ;;  %v3172_v3 = vpack.c.bf16 %v3167_v36, %v3167_v36 }
 0x234   : > { %2802 = vpow2.f32 %v645_v39 }
 0x235   : > { %v511_v51 = vmul.f32 %v509_v46, %v501_v20  ;;  %2804 = vpow2.f32 %v647_v53 }
 0x238   : > { %v2801_v43 = vpop.eup %2800 }
 0x239   : > { %v508_v44 = vmul.f32 0.5, %v2801_v43 }
 0x23a   : > { %v2803_v47 = vpop.eup %2802 }
 0x23b   : > { %v653_v49 = vpack.c.bf16 %v2803_v47, %v2799_v41  ;;  %v510_v50 = vadd.f32 0.5, %v508_v44  ;;  %v2805_v45 = vpop.eup %2804 }
 0x23c   : > { %v654_v55 = vpack.c.bf16 %v2805_v45, %v2805_v45 }
 0x23d   : > { %2700 = vmatmul.msk.bf16.gmra.mxu3 %vm427_vm3, %v653_v49  ;;  %v512_v52 = vmul.f32 %v510_v50, %v502_v31 }
 0x23f   : > { %v516_v54 = vpack.c.bf16 %v512_v52, %v511_v51 }
 0x241   : > { %2698 = vmatmul.msk.bf16.vlgmr.msra.gmra.mxu2 %vm427_vm3, %v516_v54 }
 0x24b   : > { %v1049_v57 = vpop.f32.mrf.mxu1 }
 0x24c   : > { %v3111_v58 = vadd.f32 %v2770_v56, %v1049_v57 }
 0x24d   : > { %2701 = vmatmul.msk.bf16.gmra.mxu3 %vm427_vm3, %v654_v55 }
 0x24e   : > { %v1074_v60 = vpack.c.bf16 %v3111_v58, %v3111_v58 }
 0x250   : > { %v1084_v61 = vsel %vm1082_vm4, %v1074_v60, 0 }
 0x251   : > { %1093 = vmatpush.bf16.msra.mxu1 %v1084_v61 }
 0x253   : > { %v1051_v63 = vpop.f32.mrf.mxu1 }
 0x254   : > { %2707 = vmatmul.msk.bf16.vlgmr.msra.gmra.mxu1 %vm1075_vm6, %v3152_v28 }
 0x264   : > { %2708 = vmatmul.msk.bf16.gmra.mxu1 %vm1075_vm6, %v3172_v3 }
 0x2b0   : > { %v675_v0 = vpop.f32.mrf.mxu3 }
 0x2b1   : > { %v676_v19 = vadd.f32 %v675_v0, %v656_v2  ;;  %v1030_v0 = vld [vmem:[%s4018_s3 + $0x69] sm:$0xff] }
 0x2b3   : > { %v689_v20 = vsel %vm427_vm3, %v676_v19, 0.0 }
 0x2b8   : > { %v677_v4 = vpop.f32.mrf.mxu3 }
 0x2b9   : > { %v3122_v5 = vadd.f32 %v677_v4, %v656_v2 }
 0x2bb   : > { %v692_v40 = vsel %vm427_vm3, %v3122_v5, 0.0 }
 0x2c0   : > { %v680_v7 = vpop.f32.mrf.mxu3 }
 0x2c1   : > { %v681_v22 = vadd.f32 %v680_v7, %v656_v2 }
 0x2c3   : > { %v695_v23 = vsel %vm427_vm3, %v681_v22, 0.0 }
 0x2c4   : > { %v531_v9 = vpop.f32.mrf.mxu2 }
 0x2c5   : > { %v532_v10 = vadd.f32 %v531_v9, %v518_v8 }
 0x2c7   : > { %v537_v11 = vsel %vm536_vm10, %v532_v10, 0.0 }
 0x2c8   : > { %538 = vadd.xlane.f32.xlu1 %v537_v11  ;;  %v682_v12 = vpop.f32.mrf.mxu3 }
 0x2c9   : > { %v3131_v13 = vadd.f32 %v682_v12, %v656_v2  ;;  %v1028_v12 = vld [vmem:[%s4018_s3 + $0x59] sm:$0xff] }
 0x2cb   : > { %v698_v48 = vsel %vm427_vm3, %v3131_v13, 0.0 }
 0x2cc   : > { %v533_v14 = vpop.f32.mrf.mxu2 }
 0x2cd   : > { %v534_v16 = vadd.f32 %v533_v14, %v518_v8  ;;  %v1029_v14 = vld [vmem:[%s4018_s3 + $0x61] sm:$0xff] }
 0x2cf   : > { %v540_v17 = vsel %vm360_vm2, %v534_v16, 0.0 }
 0x2d0   : > { %541 = vadd.xlane.f32.xlu2 %v540_v17  ;;  %v685_v18 = vpop.f32.mrf.mxu3  ;;  %v1054_v17 = vpack.c.bf16 %v1029_v14, %v1028_v12 }
 0x2d1   : > { %v3136_v37 = vadd.f32 %v685_v18, %v656_v2  ;;  %v3193_v55 = vpop.f32.mrf.mxu1  ;;  %v1031_v2 = vld [vmem:[%s4018_s3 + $0x71] sm:$0xff] }
 0x2d2   : > { %v1055_v4 = vpack.c.bf16 %v1031_v2, %v1030_v0 }
 0x2d3   : > { %v701_v24 = vsel %vm448_vm5, %v3136_v37, 0.0 }
 0x2d4   : > { %1066 = vmatpush.bf16.msrb.mxu2 %v1055_v4 }
 0x2d8   : > { %690 = vadd.xlane.f32.xlu2 %v689_v20  ;;  %v687_v21 = vpop.f32.mrf.mxu3  ;;  %1067 = vmatpush.bf16.msrb.mxu2 %v1054_v17 }
 0x2d9   : > { %v3202_v8 = vpop.f32.mrf.mxu1 }
 0x2e0   : > { %696 = vadd.xlane.f32.xlu2 %v695_v23 }
 0x2e8   : > { %702 = vadd.xlane.f32.xlu2 %v701_v24  ;;  %v581_v24 = vperm.slane %v3127_v6, 1 }
 0x33b   : > { %v539_v62 = vpop.xlane.xlu1 %538 }
 0x33c   : > { %v543_v25 = vmul.f32 %v539_v62, %v3032_v42 }
 0x33e   : > { %v3154_v29 = vsub.f32 %v532_v10, %v543_v25 }
 0x340   : > { %v547_v30 = vmul.f32 %v3154_v29, %v3154_v29 }
 0x342   : > { %v549_v15 = vsel %vm536_vm10, %v547_v30, 0.0  ;;  %v1100_v30 = vpop.f32.mrf.mxu1 }
 0x343   : > { %v542_v31 = vpop.xlane.xlu2 %541  ;;  %550 = vadd.xlane.f32.xlu0 %v549_v15  ;;  %v584_v15 = vperm.slane %v3127_v6, 2 }
 0x344   : > { %v544_v32 = vmul.f32 %v542_v31, %v3032_v42 }
 0x346   : > { %v3162_v33 = vsub.f32 %v534_v16, %v544_v32 }
 0x348   : > { %v548_v35 = vmul.f32 %v3162_v33, %v3162_v33 }
 0x34a   : > { %v552_v38 = vsel %vm360_vm2, %v548_v35, 0.0 }
 0x34b   : > { %553 = vadd.xlane.f32.xlu1 %v552_v38  ;;  %v691_v39 = vpop.xlane.xlu2 %690 }
 0x34c   : > { %v704_v43 = vmul.f32 %v691_v39, %v3039_v59 }
 0x34e   : > { %v3182_v47 = vsub.f32 %v676_v19, %v704_v43  ;;  %v1107_v43 = vrot.slane %v1100_v30, 4 }
 0x350   : > { %v714_v51 = vmul.f32 %v3182_v47, %v3182_v47 }
 0x352   : > { %v719_v52 = vsel %vm427_vm3, %v714_v51, 0.0 }
 0x353   : > { %693 = vadd.xlane.f32.xlu1 %v692_v40  ;;  %v697_v41 = vpop.xlane.xlu2 %696 }
 0x354   : > { %v706_v44 = vmul.f32 %v697_v41, %v3039_v59  ;;  %v1106_v41 = vrot.slane %v3202_v8, 4 }
 0x356   : > { %v3180_v46 = vsub.f32 %v681_v22, %v706_v44 }
 0x358   : > { %v716_v49 = vmul.f32 %v3180_v46, %v3180_v46 }
 0x35a   : > { %v725_v50 = vsel %vm427_vm3, %v716_v49, 0.0 }
 0x35b   : > { %699 = vadd.xlane.f32.xlu1 %v698_v48  ;;  %726 = vadd.xlane.f32.xlu2 %v725_v50  ;;  %v703_v9 = vpop.xlane.xlu2 %702  ;;  %v1108_v48 = vsel %vm239_vm0, %v1106_v41, %v1107_v43 }
 0x35c   : > { %v708_v20 = vmul.f32 %v703_v9, %v3039_v59 }
 0x35e   : > { %v3220_v31 = vsub.f32 %v3136_v37, %v708_v20 }
 0x360   : > { %v718_v37 = vmul.f32 %v3220_v31, %v3220_v31 }
 0x363   : > { %720 = vadd.xlane.f32.xlu1 %v719_v52 }
 0x373   : > { %1109 = vrot.lane.b32.xlu2 %v1108_v48, %s2957_s21 }
 0x3b6   : > { %v551_v53 = vpop.xlane.xlu0 %550 }
 0x3b7   : > { %v555_v54 = vmul.f32 %v551_v53, %v3032_v42  ;;  %v1102_v53 = vpop.f32.mrf.mxu1 }
 0x3b9   : > { %v557_v45 = vadd.f32 1e-05, %v555_v54 }
 0x3bb   : > { %2806 = vrsqrt.f32 %v557_v45  ;;  %vm565_vm8 = vweird.f32 %v557_v45 }
 0x3be   : > { %v554_v56 = vpop.xlane.xlu1 %553 }
 0x3bf   : > { %v556_v57 = vmul.f32 %v554_v56, %v3032_v42 }
 0x3c1   : > { %v2807_v60 = vpop.eup %2806  ;;  %v558_v61 = vadd.f32 1e-05, %v556_v57 }
 0x3c2   : > { %v560_v63 = vmul.f32 %v2807_v60, %v557_v45  ;;  %vm566_vm7 = vweird.f32 %v2807_v60  ;;  %v731_v45 = vsel %vm448_vm5, %v718_v37, 0.0 }
 0x3c3   : > { %2808 = vrsqrt.f32 %v558_v61  ;;  %vm567_vm9 = vmor %vm565_vm8, %vm566_vm7  ;;  %vm575_vm12 = vweird.f32 %v558_v61 }
 0x3c4   : > { %v561_v7 = vmul.f32 %v2807_v60, %v560_v63 }
 0x3c6   : > { %v562_v10 = vmul.f32 0.5, %v561_v7  ;;  %v694_v11 = vpop.xlane.xlu1 %693 }
 0x3c7   : > { %v705_v16 = vmul.f32 %v694_v11, %v3039_v59 }
 0x3c8   : > { %v563_v18 = vsub.f32 1.5, %v562_v10 }
 0x3c9   : > { %v2809_v19 = vpop.eup %2808  ;;  %v3213_v21 = vsub.f32 %v3122_v5, %v705_v16 }
 0x3ca   : > { %v564_v22 = vmul.f32 %v2807_v60, %v563_v18  ;;  %v570_v23 = vmul.f32 %v2809_v19, %v558_v61  ;;  %vm576_vm11 = vweird.f32 %v2809_v19 }
 0x3cb   : > { %v715_v62 = vmul.f32 %v3213_v21, %v3213_v21  ;;  %vm577_vm13 = vmor %vm575_vm12, %vm576_vm11 }
 0x3cc   : > { %v568_v25 = vsel %vm567_vm9, %v2807_v60, %v564_v22  ;;  %v571_v26 = vmul.f32 %v2809_v19, %v570_v23 }
 0x3cd   : > { %v579_v5 = vmul.f32 %v568_v25, %v3154_v29  ;;  %v722_v32 = vsel %vm427_vm3, %v715_v62, 0.0 }
 0x3ce   : > { %v572_v35 = vmul.f32 0.5, %v571_v26  ;;  %723 = vadd.xlane.f32.xlu0 %v722_v32  ;;  %v700_v38 = vpop.xlane.xlu1 %699  ;;  %v727_v16 = vpop.xlane.xlu2 %726 }
 0x3cf   : > { %v582_v39 = vmul.f32 %v581_v24, %v579_v5  ;;  %v707_v40 = vmul.f32 %v700_v38, %v3039_v59  ;;  %v736_v18 = vmul.f32 %v727_v16, %v3039_v59  ;;  %v838_v5 = vld [vmem:[%s4018_s3 + $0x4c] sm:$0xff] }
 0x3d0   : > { %v573_v44 = vsub.f32 1.5, %v572_v35 }
 0x3d1   : > { %v3227_v6 = vsub.f32 %v3131_v13, %v707_v40  ;;  %v585_v29 = vadd.f32 %v584_v15, %v582_v39  ;;  %v741_v20 = vadd.f32 1e-05, %v736_v18 }
 0x3d2   : > { %v574_v49 = vmul.f32 %v2809_v19, %v573_v44 }
 0x3d3   : > { %v717_v50 = vmul.f32 %v3227_v6, %v3227_v6  ;;  %v587_v51 = vmul.f32 0.5, %v585_v29  ;;  %vm770_vm1 = vweird.f32 %v741_v20 }
 0x3d4   : > { %v578_v52 = vsel %vm577_vm13, %v2809_v19, %v574_v49 }
 0x3d5   : > { %v580_v13 = vmul.f32 %v578_v52, %v3162_v33  ;;  %v728_v54 = vsel %vm427_vm3, %v717_v50, 0.0  ;;  %2810 = vtanh.f32 %v587_v51  ;;  %v3259_v50 = vperm.slane %v3119_v1, 1 }
 0x3d6   : > { %729 = vadd.xlane.f32.xlu1 %v728_v54  ;;  %732 = vadd.xlane.f32.xlu0 %v731_v45  ;;  %v721_v11 = vpop.xlane.xlu1 %720 }
 0x3d7   : > { %v583_v56 = vmul.f32 %v581_v24, %v580_v13  ;;  %v734_v12 = vmul.f32 %v721_v11, %v3039_v59 }
 0x3d9   : > { %v586_v57 = vadd.f32 %v584_v15, %v583_v56  ;;  %v739_v14 = vadd.f32 1e-05, %v734_v12  ;;  %v837_v15 = vld [vmem:[%s4018_s3 + $0x44] sm:$0xff]  ;;  %v3263_v56 = vperm.slane %v3119_v1, 2 }
 0x3da   : > { %v842_v35 = vpack.c.bf16 %v838_v5, %v837_v15 }
 0x3db   : > { %v588_v60 = vmul.f32 0.5, %v586_v57  ;;  %v2811_v61 = vpop.eup %2810  ;;  %vm750_vm5 = vweird.f32 %v739_v14 }
 0x3dc   : > { %v591_v63 = vmul.f32 0.5, %v2811_v61  ;;  %860 = vmatpush.bf16.msrb.mxu0 %v842_v35 }
 0x3dd   : > { %2812 = vtanh.f32 %v588_v60 }
 0x3de   : > { %v593_v4 = vadd.f32 0.5, %v591_v63  ;;  %2814 = vrsqrt.f32 %v739_v14 }
 0x3df   : > { %2816 = vrsqrt.f32 %v741_v20 }
 0x3e0   : > { %v3238_v9 = vmul.f32 %v593_v4, %v585_v29 }
 0x3e3   : > { %v2813_v0 = vpop.eup %2812 }
 0x3e4   : > { %v592_v2 = vmul.f32 0.5, %v2813_v0  ;;  %v2815_v17 = vpop.eup %2814 }
 0x3e5   : > { %v745_v19 = vmul.f32 %v2815_v17, %v739_v14  ;;  %v2817_v24 = vpop.eup %2816  ;;  %vm751_vm14 = vweird.f32 %v2815_v17 }
 0x3e6   : > { %v594_v7 = vadd.f32 0.5, %v592_v2  ;;  %v765_v26 = vmul.f32 %v2817_v24, %v741_v20  ;;  %vm752_vm15 = vmor %vm750_vm5, %vm751_vm14  ;;  %vm771_vm7 = vweird.f32 %v2817_v24 }
 0x3e7   : > { %v746_v22 = vmul.f32 %v2815_v17, %v745_v19  ;;  %vm3266_vm8 = vmor %vm770_vm1, %vm771_vm7  ;;  %v3277_v19 = vld [vmem:[%s4018_s3 + $0x79] sm:$0x1f] }
 0x3e8   : > { %v3240_v33 = vmul.f32 %v594_v7, %v586_v57  ;;  %v766_v39 = vmul.f32 %v2817_v24, %v765_v26 }
 0x3e9   : > { %v747_v23 = vmul.f32 0.5, %v746_v22 }
 0x3ea   : > { %v1053_v10 = vpack.c.bf16 %v3240_v33, %v3238_v9  ;;  %v767_v44 = vmul.f32 0.5, %v766_v39 }
 0x3eb   : > { %v748_v62 = vsub.f32 1.5, %v747_v23  ;;  %v1223_v23 = vperm.slane %v3277_v19, 4 }
 0x3ec   : > { %2706 = vmatmul.msk.bf16.vlgmr.msrb.gmra.mxu2 %vm536_vm10, %v1053_v10  ;;  %v768_v13 = vsub.f32 1.5, %v767_v44 }
 0x3ed   : > { %v749_v32 = vmul.f32 %v2815_v17, %v748_v62 }
 0x3ef   : > { %1111 = vrot.lane.b32.xlu1 %v1107_v43, %s2957_s21  ;;  %v753_v40 = vsel %vm752_vm15, %v2815_v17, %v749_v32 }
 0x3f0   : > { %v794_v37 = vmul.f32 %v753_v40, %v3182_v47 }
 0x3f2   : > { %v800_v54 = vmul.f32 %v3259_v50, %v794_v37 }
 0x3f4   : > { %v806_v57 = vadd.f32 %v3263_v56, %v800_v54 }
 0x3f6   : > { %v811_v10 = vmul.f32 0.5, %v806_v57 }
 0x3f7   : > { %1225 = vrot.lane.b32.xlu1 %v1223_v23, %s2958_s28 }
 0x441   : > { %v724_v25 = vpop.xlane.xlu0 %723 }
 0x442   : > { %v735_v30 = vmul.f32 %v724_v25, %v3039_v59 }
 0x444   : > { %v740_v38 = vadd.f32 1e-05, %v735_v30 }
 0x446   : > { %2818 = vrsqrt.f32 %v740_v38  ;;  %vm760_vm11 = vweird.f32 %v740_v38 }
 0x449   : > { %v730_v41 = vpop.xlane.xlu1 %729  ;;  %v733_v43 = vpop.xlane.xlu0 %732 }
 0x44a   : > { %v737_v29 = vmul.f32 %v730_v41, %v3039_v59  ;;  %v738_v48 = vmul.f32 %v733_v43, %v3039_v59  ;;  %v769_v59 = vmul.f32 %v2817_v24, %v768_v13  ;;  %v1056_v13 = vperm.slane %v3277_v19, 0 }
 0x44c   : > { %v2819_v49 = vpop.eup %2818  ;;  %v742_v51 = vadd.f32 1e-05, %v737_v29  ;;  %v743_v52 = vadd.f32 1e-05, %v738_v48  ;;  %v773_v1 = vsel %vm3266_vm8, %v2817_v24, %v769_v59  ;;  %vm1148_vm8 = vcmask 97280  }
 0x44d   : > { %v755_v53 = vmul.f32 %v2819_v49, %v740_v38  ;;  %vm761_vm9 = vweird.f32 %v2819_v49  ;;  %v796_v17 = vmul.f32 %v773_v1, %v3180_v46 }
 0x44e   : > { %2820 = vrsqrt.f32 %v742_v51  ;;  %vm762_vm12 = vmor %vm760_vm11, %vm761_vm9  ;;  %vm780_vm5 = vweird.f32 %v742_v51  ;;  %vm790_vm1 = vweird.f32 %v743_v52 }
 0x44f   : > { %v756_v45 = vmul.f32 %v2819_v49, %v755_v53  ;;  %2822 = vrsqrt.f32 %v743_v52  ;;  %v802_v26 = vmul.f32 %v3259_v50, %v796_v17 }
 0x450   : > { %2824 = vtanh.f32 %v811_v10 }
 0x451   : > { %v757_v47 = vmul.f32 0.5, %v756_v45  ;;  %v808_v38 = vadd.f32 %v3263_v56, %v802_v26 }
 0x453   : > { %v758_v61 = vsub.f32 1.5, %v757_v47  ;;  %v813_v44 = vmul.f32 0.5, %v808_v38 }
 0x454   : > { %v2821_v63 = vpop.eup %2820 }
 0x455   : > { %v2823_v0 = vpop.eup %2822  ;;  %v759_v2 = vmul.f32 %v2819_v49, %v758_v61  ;;  %v775_v4 = vmul.f32 %v2821_v63, %v742_v51  ;;  %vm781_vm13 = vweird.f32 %v2821_v63 }
 0x456   : > { %v785_v7 = vmul.f32 %v2823_v0, %v743_v52  ;;  %vm782_vm14 = vmor %vm780_vm5, %vm781_vm13  ;;  %v2825_v15 = vpop.eup %2824  ;;  %vm791_vm15 = vweird.f32 %v2823_v0 }
 0x457   : > { %v763_v11 = vsel %vm762_vm12, %v2819_v49, %v759_v2  ;;  %v776_v12 = vmul.f32 %v2821_v63, %v775_v4  ;;  %v821_v39 = vmul.f32 0.5, %v2825_v15  ;;  %vm792_vm7 = vmor %vm790_vm1, %vm791_vm15  ;;  %v1216_v2 = vperm.slane %v3277_v19, 3 }
 0x458   : > { %v795_v14 = vmul.f32 %v763_v11, %v3213_v21  ;;  %v786_v16 = vmul.f32 %v2823_v0, %v785_v7 }
 0x459   : > { %v777_v18 = vmul.f32 0.5, %v776_v12  ;;  %v826_v48 = vadd.f32 0.5, %v821_v39 }
 0x45a   : > { %v801_v20 = vmul.f32 %v3259_v50, %v795_v14  ;;  %v787_v22 = vmul.f32 0.5, %v786_v16 }
 0x45b   : > { %v778_v24 = vsub.f32 1.5, %v777_v18  ;;  %v831_v51 = vmul.f32 %v826_v48, %v806_v57  ;;  %v1110_v18 = vpop.permute.xlu2 %1109 }
 0x45c   : > { %v807_v62 = vadd.f32 %v3263_v56, %v801_v20  ;;  %v788_v21 = vsub.f32 1.5, %v787_v22  ;;  %v1115_v26 = vadd.f32 %v1110_v18, %v3193_v55 }
 0x45d   : > { %v779_v46 = vmul.f32 %v2821_v63, %v778_v24 }
 0x45e   : > { %v812_v25 = vmul.f32 0.5, %v807_v62  ;;  %v789_v32 = vmul.f32 %v2823_v0, %v788_v21 }
 0x45f   : > { %v783_v30 = vsel %vm782_vm14, %v2821_v63, %v779_v46 }
 0x460   : > { %v797_v5 = vmul.f32 %v783_v30, %v3227_v6  ;;  %2826 = vtanh.f32 %v812_v25  ;;  %v793_v41 = vsel %vm792_vm7, %v2823_v0, %v789_v32 }
 0x461   : > { %v798_v6 = vmul.f32 %v793_v41, %v3220_v31  ;;  %v1112_v20 = vpop.permute.xlu1 %1111 }
 0x462   : > { %v803_v35 = vmul.f32 %v3259_v50, %v797_v5  ;;  %v1116_v22 = vadd.f32 %v1112_v20, %v3202_v8 }
 0x463   : > { %v804_v52 = vmul.f32 %v3259_v50, %v798_v6 }
 0x464   : > { %v809_v40 = vadd.f32 %v3263_v56, %v803_v35 }
 0x465   : > { %v810_v61 = vadd.f32 %v3263_v56, %v804_v52 }
 0x466   : > { %v2827_v43 = vpop.eup %2826  ;;  %v814_v37 = vmul.f32 0.5, %v809_v40 }
 0x467   : > { %v822_v29 = vmul.f32 0.5, %v2827_v43  ;;  %v815_v0 = vmul.f32 0.5, %v810_v61 }
 0x468   : > { %2828 = vtanh.f32 %v814_v37 }
 0x469   : > { %v827_v49 = vadd.f32 0.5, %v822_v29  ;;  %2830 = vtanh.f32 %v813_v44  ;;  %v1226_v32 = vpop.permute.xlu1 %1225 }
 0x46a   : > { %2832 = vtanh.f32 %v815_v0  ;;  %v240_v0 = vrot.slane %v3149_v27, 4 }
 0x46b   : > { %v832_v53 = vmul.f32 %v827_v49, %v807_v62 }
 0x46d   : > { %v839_v54 = vpack.c.bf16 %v832_v53, %v831_v51  ;;  %v3309_v51 = vld [vmem:[%s4018_s3 + $0x54] sm:$0x7] }
 0x46e   : > { %v2829_v45 = vpop.eup %2828 }
 0x46f   : > { %2702 = vmatmul.msk.bf16.vlgmr.msrb.gmra.mxu0 %vm427_vm3, %v839_v54  ;;  %v1069_v47 = vpop.f32.mrf.mxu2  ;;  %v2831_v59 = vpop.eup %2830  ;;  %v824_v63 = vmul.f32 0.5, %v2829_v45  ;;  %v843_v54 = vperm.slane %v3309_v51, 0 }
 0x470   : > { %v1070_v60 = vadd.f32 %v1069_v47, %v1056_v13  ;;  %v823_v31 = vmul.f32 0.5, %v2831_v59  ;;  %v2833_v56 = vpop.eup %2832 }
 0x471   : > { %v829_v57 = vadd.f32 0.5, %v824_v63  ;;  %v825_v12 = vmul.f32 0.5, %v2833_v56 }
 0x472   : > { %1119 = vrot.lane.b32.xlu0 %v1070_v60, %s2958_s28  ;;  %v828_v1 = vadd.f32 0.5, %v823_v31 }
 0x473   : > { %v834_v7 = vmul.f32 %v829_v57, %v809_v40  ;;  %v830_v14 = vadd.f32 0.5, %v825_v12  ;;  %v241_v57 = vrot.slane %v3167_v36, 4 }
 0x474   : > { %v833_v10 = vmul.f32 %v828_v1, %v808_v38 }
 0x475   : > { %v835_v16 = vmul.f32 %v830_v14, %v810_v61 }
 0x476   : > { %v840_v11 = vpack.c.bf16 %v834_v7, %v833_v10 }
 0x477   : > { %v1071_v4 = vpop.f32.mrf.mxu2  ;;  %v841_v17 = vpack.c.bf16 %v835_v16, %v835_v16 }
 0x478   : > { %v1072_v50 = vadd.f32 %v1071_v4, %v1056_v13 }
 0x47a   : > { %1121 = vrot.lane.b32.xlu2 %v1072_v50, %s2958_s28  ;;  %1218 = vrot.lane.b32.xlu0 %v1216_v2, %s2958_s28  ;;  %v242_v2 = vsel %vm239_vm0, %v240_v0, %v241_v57 }
 0x47f   : > { %2703 = vmatmul.msk.bf16.gmra.mxu0 %vm427_vm3, %v840_v11 }
 0x48f   : > { %2704 = vmatmul.msk.bf16.gmra.mxu0 %vm427_vm3, %v841_v17  ;;  %vm1152_vm3 = vcmask 1045504  }
 0x4d4   : > { %v1122_v23 = vpop.permute.xlu2 %1121 }
 0x4d5   : > { %v1126_v24 = vadd.f32 %v1122_v23, %v1116_v22 }
 0x4d7   : > { %v1128_v62 = vmul.f32 0.5, %v1126_v24 }
 0x4d9   : > { %2834 = vtanh.f32 %v1128_v62 }
 0x4df   : > { %v2835_v46 = vpop.eup %2834 }
 0x4e0   : > { %v1132_v21 = vmul.f32 0.5, %v2835_v46 }
 0x4e2   : > { %v3300_v25 = vadd.f32 0.5, %v1132_v21  ;;  %v1250_v21 = vld [vmem:[%s4017_s2 + $0x21] sm:$0xff] }
 0x4e4   : > { %1139 = vrot.lane.b32.xlu0 %v3300_v25, %s2957_s21  ;;  %v1120_v30 = vpop.permute.xlu0 %1119 }
 0x4e5   : > { %v1125_v15 = vadd.f32 %v1120_v30, %v1115_v26  ;;  %v1251_v26 = vld [vmem:[%s4017_s2 + $0x29] sm:$0xff] }
 0x4e6   : > { %v1261_v30 = vpack.c.bf16 %v1251_v26, %v1250_v21  ;;  %v3402_v26 = vperm.slane %v3309_v51, 1 }
 0x4e7   : > { %v1127_v5 = vmul.f32 0.5, %v1125_v15 }
 0x4e9   : > { %2836 = vtanh.f32 %v1127_v5 }
 0x4ec   : > { %v862_v35 = vpop.f32.mrf.mxu0  ;;  %v1219_v38 = vpop.permute.xlu0 %1218 }
 0x4ed   : > { %v1221_v39 = vmul.f32 %v1219_v38, %v1125_v15  ;;  %v1222_v40 = vmul.f32 %v1219_v38, %v1126_v24  ;;  %v863_v7 = vadd.f32 %v862_v35, %v843_v54 }
 0x4ef   : > { %v2837_v41 = vpop.eup %2836  ;;  %v1228_v43 = vadd.f32 %v1226_v32, %v1221_v39  ;;  %v1229_v44 = vadd.f32 %v1226_v32, %v1222_v40  ;;  %v876_v56 = vsel %vm536_vm10, %v863_v7, 0.0 }
 0x4f0   : > { %v1131_v37 = vmul.f32 0.5, %v2837_v41 }
 0x4f1   : > { %v1230_v29 = vmul.f32 0.5, %v1228_v43  ;;  %v1231_v48 = vmul.f32 0.5, %v1229_v44 }
 0x4f2   : > { %v1133_v6 = vadd.f32 0.5, %v1131_v37 }
 0x4f3   : > { %2838 = vtanh.f32 %v1230_v29 }
 0x4f4   : > { %2840 = vtanh.f32 %v1231_v48  ;;  %v864_v49 = vpop.f32.mrf.mxu0  ;;  %1137 = vrot.lane.b32.xlu2 %v1133_v6, %s2957_s21 }
 0x4f5   : > { %v865_v10 = vadd.f32 %v864_v49, %v843_v54 }
 0x4f7   : > { %v879_v11 = vsel %vm536_vm10, %v865_v10, 0.0 }
 0x4f9   : > { %v2839_v53 = vpop.eup %2838 }
 0x4fa   : > { %v2841_v13 = vpop.eup %2840  ;;  %v1234_v52 = vmul.f32 0.5, %v2839_v53 }
 0x4fb   : > { %v1235_v45 = vmul.f32 0.5, %v2841_v13 }
 0x4fc   : > { %v1236_v47 = vadd.f32 0.5, %v1234_v52  ;;  %v867_v59 = vpop.f32.mrf.mxu0 }
 0x4fd   : > { %v1237_v60 = vadd.f32 0.5, %v1235_v45  ;;  %v3312_v61 = vadd.f32 %v867_v59, %v843_v54 }
 0x4fe   : > { %v1238_v63 = vmul.f32 %v1236_v47, %v1228_v43 }
 0x4ff   : > { %v1239_v31 = vmul.f32 %v1237_v60, %v1229_v44  ;;  %v882_v46 = vsel %vm536_vm10, %v3312_v61, 0.0 }
 0x500   : > { %1242 = vrot.lane.b32.xlu1 %v1238_v63, %s2957_s21 }
 0x501   : > { %1244 = vrot.lane.b32.xlu2 %v1239_v31, %s2957_s21 }
 0x504   : > { %v869_v4 = vpop.f32.mrf.mxu0 }
 0x505   : > { %v870_v27 = vadd.f32 %v869_v4, %v843_v54 }
 0x506   : > { %245 = vxpose.xlu0.b32.start [1/2] (short) (narrow) %v242_v2, 8 }
 0x507   : > { %v885_v14 = vsel %vm536_vm10, %v870_v27, 0.0 }
 0x50c   : > { %v872_v1 = vpop.f32.mrf.mxu0 }
 0x50d   : > { %v873_v36 = vadd.f32 %v872_v1, %v843_v54 }
 0x50e   : > { %246 = vxpose.xlu0.b32.end [2/2] (short) (narrow) %v241_v57, 8 }
 0x50f   : > { %v888_v12 = vsel %vm360_vm2, %v873_v36, 0.0 }
 0x514   : > { %v874_v50 = vpop.f32.mrf.mxu0 }
 0x52a   : > { %880 = vadd.xlane.f32.xlu2 %v879_v11  ;;  %877 = vadd.xlane.f32.xlu1 %v876_v56 }
 0x532   : > { %889 = vadd.xlane.f32.xlu2 %v888_v12  ;;  %886 = vadd.xlane.f32.xlu1 %v885_v14  ;;  %v1255_v14 = vld [vmem:[%s4018_s3 + $0x7e] sm:$0xff] }
 0x54e   : > { %v1138_v16 = vpop.permute.xlu2 %1137 }
 0x54f   : > { %v1143_v17 = vmul.f32 %v1138_v16, %v3193_v55  ;;  %v1252_v55 = vld [vmem:[%s4017_s2 + $0x31] sm:$0xff]  ;;  %v1256_v16 = vld [vmem:[%s4018_s3 + $0x86] sm:$0xff] }
 0x551   : > { %v1145_v22 = vsel %vm536_vm10, %v1143_v17, %v1133_v6  ;;  %v1284_v17 = vpack.c.bf16 %v1256_v16, %v1255_v14  ;;  %v229_v14 = vld [vmem:[%s3144_s10 + $0x30] sm:$0xff] }
 0x556   : > { %v1140_v18 = vpop.permute.xlu0 %1139 }
 0x557   : > { %v1144_v20 = vmul.f32 %v1140_v18, %v3202_v8  ;;  %v1253_v8 = vld [vmem:[%s4017_s2 + $0x39] sm:$0xff] }
 0x559   : > { %v1146_v23 = vsel %vm536_vm10, %v1144_v20, %v3300_v25  ;;  %v1262_v25 = vpack.c.bf16 %v1253_v8, %v1252_v55 }
 0x55a   : > { %v1147_v24 = vpack.c.bf16 %v1146_v23, %v1145_v22 }
 0x55b   : > { %v1245_v15 = vpop.permute.xlu2 %1244 }
 0x55c   : > { %v1154_v62 = vsel %vm1152_vm3, %v1147_v24, 0  ;;  %v3369_v47 = vadd.f32 %v1245_v15, %v3240_v33 }
 0x55d   : > { %1163 = vmatpush.bf16.msra.mxu2 %v1154_v62 }
 0x561   : > { %1273 = vmatpush.bf16.msrb.mxu2 %v1262_v25 }
 0x565   : > { %1274 = vmatpush.bf16.msrb.mxu2 %v1261_v30 }
 0x572   : > { %v1243_v5 = vpop.permute.xlu1 %1242 }
 0x573   : > { %v3366_v45 = vadd.f32 %v1243_v5, %v3238_v9  ;;  %v3405_v5 = vperm.slane %v3309_v51, 2 }
 0x575   : > { %v1260_v59 = vpack.c.bf16 %v3369_v47, %v3366_v45 }
 0x57f   : > { %883 = vadd.xlane.f32.xlu0 %v882_v46 }
 0x59d   : > { %v881_v32 = vpop.xlane.xlu2 %880  ;;  %v878_v35 = vpop.xlane.xlu1 %877 }
 0x59e   : > { %v892_v38 = vmul.f32 %v881_v32, %v3032_v42  ;;  %v891_v39 = vmul.f32 %v878_v35, %v3032_v42 }
 0x5a0   : > { %v3345_v40 = vsub.f32 %v865_v10, %v892_v38  ;;  %v3347_v41 = vsub.f32 %v863_v7, %v891_v39  ;;  %v1258_v10 = vld [vmem:[%s4018_s3 + $0x96] sm:$0xff] }
 0x5a2   : > { %v902_v43 = vmul.f32 %v3345_v40, %v3345_v40  ;;  %v901_v44 = vmul.f32 %v3347_v41, %v3347_v41 }
 0x5a4   : > { %v909_v37 = vsel %vm536_vm10, %v902_v43, 0.0  ;;  %v906_v29 = vsel %vm536_vm10, %v901_v44, 0.0 }
 0x5a5   : > { %910 = vadd.xlane.f32.xlu2 %v909_v37  ;;  %907 = vadd.xlane.f32.xlu1 %v906_v29  ;;  %v887_v48 = vpop.xlane.xlu1 %886  ;;  %v890_v60 = vpop.xlane.xlu2 %889 }
 0x5a6   : > { %v894_v6 = vmul.f32 %v887_v48, %v3032_v42  ;;  %v895_v0 = vmul.f32 %v890_v60, %v3032_v42 }
 0x5a8   : > { %v3356_v49 = vsub.f32 %v870_v27, %v894_v6  ;;  %v3381_v2 = vsub.f32 %v873_v36, %v895_v0  ;;  %v2771_v0 = vld [vmem:[%s4017_s2 + $0x41] ss:$0 sm:$0xff] }
 0x5aa   : > { %v261_v53 = vpop.trf.xlu0  ;;  %v904_v13 = vmul.f32 %v3356_v49, %v3356_v49  ;;  %v905_v4 = vmul.f32 %v3381_v2, %v3381_v2 }
 0x5ab   : > { %v3360_v52 = vpack.c.bf16 %v261_v53, %v261_v53 }
 0x5ac   : > { %v915_v54 = vsel %vm536_vm10, %v904_v13, 0.0  ;;  %v918_v1 = vsel %vm360_vm2, %v905_v4, 0.0 }
 0x5ad   : > { %916 = vadd.xlane.f32.xlu2 %v915_v54  ;;  %2709 = vmatmul.msk.bf16.vlgmr.msra.gmra.mxu2 %vm1148_vm8, %v3360_v52 }
 0x5bd   : > { %2710 = vmatmul.msk.bf16.vlgmr.msrb.gmra.mxu2 %vm536_vm10, %v1260_v59 }
 0x5f2   : > { %v884_v63 = vpop.xlane.xlu0 %883 }
 0x5f3   : > { %v893_v31 = vmul.f32 %v884_v63, %v3032_v42 }
 0x5f5   : > { %v3377_v57 = vsub.f32 %v3312_v61, %v893_v31  ;;  %v1257_v61 = vld [vmem:[%s4018_s3 + $0x8e] sm:$0xff] }
 0x5f6   : > { %v1285_v27 = vpack.c.bf16 %v1258_v10, %v1257_v61 }
 0x5f7   : > { %v903_v9 = vmul.f32 %v3377_v57, %v3377_v57 }
 0x5f8   : > { %1302 = vmatpush.bf16.msrb.mxu3 %v1285_v27 }
 0x5f9   : > { %v912_v33 = vsel %vm536_vm10, %v903_v9, 0.0 }
 0x5fa   : > { %913 = vadd.xlane.f32.xlu1 %v912_v33 }
 0x5fc   : > { %1303 = vmatpush.bf16.msrb.mxu3 %v1284_v17 }
 0x602   : > { %919 = vadd.xlane.f32.xlu1 %v918_v1 }
 0x618   : > { %v911_v50 = vpop.xlane.xlu2 %910  ;;  %v908_v7 = vpop.xlane.xlu1 %907 }
 0x619   : > { %v922_v11 = vmul.f32 %v911_v50, %v3032_v42  ;;  %v921_v56 = vmul.f32 %v908_v7, %v3032_v42  ;;  %v226_v50 = vld [vmem:[%s3144_s10 + $0x18] sm:$0xff]  ;;  %v227_v7 = vld [vmem:[%s3144_s10 + $0x20] sm:$0xff] }
 0x61b   : > { %v927_v36 = vadd.f32 1e-05, %v922_v11  ;;  %v926_v12 = vadd.f32 1e-05, %v921_v56  ;;  %v3434_v56 = vpack.c.bf16 %v227_v7, %v226_v50 }
 0x61d   : > { %2842 = vrsqrt.f32 %v927_v36  ;;  %vm947_vm12 = vweird.f32 %v927_v36  ;;  %vm937_vm5 = vweird.f32 %v926_v12 }
 0x61e   : > { %2844 = vrsqrt.f32 %v926_v12 }
 0x620   : > { %v917_v61 = vpop.xlane.xlu2 %916 }
 0x621   : > { %v924_v27 = vmul.f32 %v917_v61, %v3032_v42 }
 0x623   : > { %v2843_v18 = vpop.eup %2842 }
 0x624   : > { %v2845_v20 = vpop.eup %2844  ;;  %v942_v22 = vmul.f32 %v2843_v18, %v927_v36  ;;  %vm948_vm9 = vweird.f32 %v2843_v18  ;;  %v929_v36 = vadd.f32 1e-05, %v924_v27 }
 0x625   : > { %v932_v23 = vmul.f32 %v2845_v20, %v926_v12  ;;  %vm938_vm11 = vweird.f32 %v2845_v20  ;;  %vm949_vm13 = vmor %vm947_vm12, %vm948_vm9  ;;  %v228_v12 = vld [vmem:[%s3144_s10 + $0x28] sm:$0xff] }
 0x626   : > { %v943_v24 = vmul.f32 %v2843_v18, %v942_v22  ;;  %vm939_vm14 = vmor %vm937_vm5, %vm938_vm11  ;;  %v3441_v17 = vpack.c.bf16 %v229_v14, %v228_v12  ;;  %vm967_vm1 = vweird.f32 %v929_v36 }
 0x627   : > { %v933_v62 = vmul.f32 %v2845_v20, %v932_v23  ;;  %v3446_v23 = vld [vmem:[%s3144_s10 + $0x38] sm:$0xff] }
 0x628   : > { %v944_v46 = vmul.f32 0.5, %v943_v24  ;;  %v3449_v24 = vld [vmem:[%s3144_s10 + $0x40] sm:$0xff] }
 0x629   : > { %v934_v55 = vmul.f32 0.5, %v933_v62 }
 0x62a   : > { %v945_v8 = vsub.f32 1.5, %v944_v46 }
 0x62b   : > { %v935_v21 = vsub.f32 1.5, %v934_v55  ;;  %v3453_v55 = vpack.c.bf16 %v3449_v24, %v3446_v23 }
 0x62c   : > { %v946_v25 = vmul.f32 %v2843_v18, %v945_v8 }
 0x62d   : > { %v936_v30 = vmul.f32 %v2845_v20, %v935_v21 }
 0x62e   : > { %v950_v15 = vsel %vm949_vm13, %v2843_v18, %v946_v25 }
 0x62f   : > { %v982_v32 = vmul.f32 %v950_v15, %v3345_v40  ;;  %v940_v35 = vsel %vm939_vm14, %v2845_v20, %v936_v30 }
 0x630   : > { %v981_v38 = vmul.f32 %v940_v35, %v3347_v41  ;;  %v3409_v39 = vpop.f32.mrf.mxu2 }
 0x631   : > { %v988_v43 = vmul.f32 %v3402_v26, %v982_v32 }
 0x632   : > { %v987_v44 = vmul.f32 %v3402_v26, %v981_v38 }
 0x633   : > { %v994_v37 = vadd.f32 %v3405_v5, %v988_v43 }
 0x634   : > { %v993_v29 = vadd.f32 %v3405_v5, %v987_v44 }
 0x635   : > { %v999_v48 = vmul.f32 0.5, %v994_v37 }
 0x636   : > { %v998_v6 = vmul.f32 0.5, %v993_v29 }
 0x637   : > { %2846 = vtanh.f32 %v999_v48 }
 0x638   : > { %v1167_v51 = vpop.f32.mrf.mxu2  ;;  %2848 = vtanh.f32 %v998_v6 }
 0x639   : > { %2850 = vrsqrt.f32 %v929_v36 }
 0x63d   : > { %v2847_v40 = vpop.eup %2846 }
 0x63e   : > { %v2849_v53 = vpop.eup %2848  ;;  %v1009_v41 = vmul.f32 0.5, %v2847_v40 }
 0x63f   : > { %v1008_v13 = vmul.f32 0.5, %v2849_v53  ;;  %v2851_v16 = vpop.eup %2850 }
 0x640   : > { %v1276_v54 = vpop.f32.mrf.mxu2  ;;  %v1014_v59 = vadd.f32 0.5, %v1009_v41  ;;  %v962_v18 = vmul.f32 %v2851_v16, %v929_v36  ;;  %vm968_vm15 = vweird.f32 %v2851_v16 }
 0x641   : > { %v1013_v60 = vadd.f32 0.5, %v1008_v13  ;;  %v3425_v4 = vadd.f32 %v2771_v0, %v1276_v54  ;;  %vm969_vm7 = vmor %vm967_vm1, %vm968_vm15 }
 0x642   : > { %v3415_v63 = vmul.f32 %v1014_v59, %v994_v37  ;;  %v963_v20 = vmul.f32 %v2851_v16, %v962_v18  ;;  %v3461_v37 = vld [vmem:[%s3144_s10 + $0x48] sm:$0xff] }
 0x643   : > { %v3417_v31 = vmul.f32 %v1013_v60, %v993_v29  ;;  %v3464_v29 = vld [vmem:[%s3144_s10 + $0x50] sm:$0xff] }
 0x644   : > { %v964_v22 = vmul.f32 0.5, %v963_v20  ;;  %v3469_v40 = vpack.c.bf16 %v3464_v29, %v3461_v37 }
 0x645   : > { %v1281_v9 = vpack.c.bf16 %v3415_v63, %v3417_v31 }
 0x646   : > { %v965_v62 = vsub.f32 1.5, %v964_v22 }
 0x647   : > { %2711 = vmatmul.msk.bf16.vlgmr.msrb.gmra.mxu3 %vm536_vm10, %v1281_v9 }
 0x648   : > { %v1278_v33 = vpop.f32.mrf.mxu2  ;;  %v966_v21 = vmul.f32 %v2851_v16, %v965_v62 }
 0x649   : > { %v3427_v1 = vadd.f32 %v2771_v0, %v1278_v33 }
 0x64a   : > { %v970_v30 = vsel %vm969_vm7, %v2851_v16, %v966_v21 }
 0x64b   : > { %v1319_v10 = vpack.c.bf16 %v3427_v1, %v3425_v4  ;;  %v984_v32 = vmul.f32 %v970_v30, %v3356_v49 }
 0x64d   : > { %v1336_v11 = vsel %vm1152_vm3, %v1319_v10, 0  ;;  %v990_v48 = vmul.f32 %v3402_v26, %v984_v32 }
 0x64e   : > { %1345 = vmatpush.bf16.msra.mxu0 %v1336_v11  ;;  %v3478_v11 = vld [vmem:[%s3144_s10 + $0x58] sm:$0xff] }
 0x64f   : > { %v996_v49 = vadd.f32 %v3405_v5, %v990_v48 }
 0x651   : > { %2714 = vmatmul.msk.bf16.vlgmr.msra.gmra.mxu0 %vm1148_vm8, %v3434_v56  ;;  %v1001_v54 = vmul.f32 0.5, %v996_v49 }
 0x661   : > { %2715 = vmatmul.msk.bf16.gmra.mxu0 %vm1148_vm8, %v3441_v17 }
 0x66d   : > { %v914_v46 = vpop.xlane.xlu1 %913 }
 0x66e   : > { %v923_v8 = vmul.f32 %v914_v46, %v3032_v42 }
 0x670   : > { %v928_v25 = vadd.f32 1e-05, %v923_v8 }
 0x671   : > { %2716 = vmatmul.msk.bf16.gmra.mxu0 %vm1148_vm8, %v3453_v55 }
 0x672   : > { %2852 = vrsqrt.f32 %v928_v25  ;;  %vm957_vm11 = vweird.f32 %v928_v25 }
 0x675   : > { %v920_v15 = vpop.xlane.xlu1 %919 }
 0x676   : > { %v925_v35 = vmul.f32 %v920_v15, %v3032_v42 }
 0x678   : > { %v2853_v38 = vpop.eup %2852  ;;  %v930_v43 = vadd.f32 1e-05, %v925_v35 }
 0x679   : > { %v952_v44 = vmul.f32 %v2853_v38, %v928_v25  ;;  %vm958_vm9 = vweird.f32 %v2853_v38 }
 0x67a   : > { %2854 = vrsqrt.f32 %v930_v43  ;;  %vm959_vm12 = vmor %vm957_vm11, %vm958_vm9  ;;  %vm977_vm5 = vweird.f32 %v930_v43  ;;  %vm1483_vm11 = vcmask 293888  }
 0x67b   : > { %v953_v6 = vmul.f32 %v2853_v38, %v952_v44  ;;  %2856 = vtanh.f32 %v1001_v54  ;;  %v3514_v54 = vld [vmem:[%s4018_s3 + $0x9e] sm:$0x1f] }
 0x67d   : > { %v954_v51 = vmul.f32 0.5, %v953_v6 }
 0x67f   : > { %v955_v53 = vsub.f32 1.5, %v954_v51 }
 0x680   : > { %v2855_v42 = vpop.eup %2854 }
 0x681   : > { %v956_v41 = vmul.f32 %v2853_v38, %v955_v53  ;;  %v972_v13 = vmul.f32 %v2855_v42, %v930_v43  ;;  %2717 = vmatmul.msk.bf16.gmra.mxu0 %vm1148_vm8, %v3469_v40  ;;  %vm978_vm13 = vweird.f32 %v2855_v42  ;;  %v2857_v36 = vpop.eup %2856 }
 0x682   : > { %vm979_vm14 = vmor %vm977_vm5, %vm978_vm13  ;;  %v1011_v16 = vmul.f32 0.5, %v2857_v36 }
 0x683   : > { %v960_v59 = vsel %vm959_vm12, %v2853_v38, %v956_v41  ;;  %v973_v60 = vmul.f32 %v2855_v42, %v972_v13 }
 0x684   : > { %v983_v0 = vmul.f32 %v960_v59, %v3377_v57  ;;  %v3483_v57 = vpack.c.bf16 %v3478_v11, %v3478_v11  ;;  %v1016_v46 = vadd.f32 0.5, %v1011_v16  ;;  %v1286_v59 = vperm.slane %v3514_v54, 0 }
 0x685   : > { %v974_v9 = vmul.f32 0.5, %v973_v60 }
 0x686   : > { %v989_v33 = vmul.f32 %v3402_v26, %v983_v0  ;;  %v3491_v21 = vmul.f32 %v1016_v46, %v996_v49 }
 0x687   : > { %v975_v50 = vsub.f32 1.5, %v974_v9 }
 0x688   : > { %v995_v7 = vadd.f32 %v3405_v5, %v989_v33 }
 0x689   : > { %v976_v61 = vmul.f32 %v2855_v42, %v975_v50 }
 0x68a   : > { %v1000_v10 = vmul.f32 0.5, %v995_v7 }
 0x68b   : > { %v980_v27 = vsel %vm979_vm14, %v2855_v42, %v976_v61 }
 0x68c   : > { %v985_v12 = vmul.f32 %v980_v27, %v3381_v2  ;;  %2858 = vtanh.f32 %v1000_v10 }
 0x68e   : > { %v991_v14 = vmul.f32 %v3402_v26, %v985_v12 }
 0x690   : > { %v997_v18 = vadd.f32 %v3405_v5, %v991_v14 }
 0x691   : > { %2718 = vmatmul.msk.bf16.gmra.mxu0 %vm1148_vm8, %v3483_v57 }
 0x692   : > { %v2859_v20 = vpop.eup %2858  ;;  %v1002_v22 = vmul.f32 0.5, %v997_v18 }
 0x693   : > { %v1010_v62 = vmul.f32 0.5, %v2859_v20 }
 0x694   : > { %2860 = vtanh.f32 %v1002_v22 }
 0x695   : > { %v1015_v8 = vadd.f32 0.5, %v1010_v62 }
 0x697   : > { %v3489_v2 = vmul.f32 %v1015_v8, %v995_v7 }
 0x699   : > { %v1282_v25 = vpack.c.bf16 %v3491_v21, %v3489_v2 }
 0x69a   : > { %v2861_v26 = vpop.eup %2860 }
 0x69b   : > { %2712 = vmatmul.msk.bf16.gmra.mxu3 %vm536_vm10, %v1282_v25  ;;  %v1012_v5 = vmul.f32 0.5, %v2861_v26 }
 0x69d   : > { %v1017_v30 = vadd.f32 0.5, %v1012_v5 }
 0x69f   : > { %v3496_v15 = vmul.f32 %v1017_v30, %v997_v18 }
 0x6a1   : > { %v1283_v32 = vpack.c.bf16 %v3496_v15, %v3496_v15 }
 0x6ab   : > { %2713 = vmatmul.msk.bf16.gmra.mxu3 %vm536_vm10, %v1283_v32 }
 0x6ca   : > { %v1305_v53 = vpop.f32.mrf.mxu3 }
 0x6cb   : > { %v1306_v20 = vadd.f32 %v1305_v53, %v1286_v59 }
 0x6ce   : > { %v3501_v35 = vpop.f32.mrf.mxu0 }
 0x6d2   : > { %v1307_v41 = vpop.f32.mrf.mxu3 }
 0x6d3   : > { %v1308_v62 = vadd.f32 %v1307_v41, %v1286_v59 }
 0x6d6   : > { %v3503_v38 = vpop.f32.mrf.mxu0 }
 0x6de   : > { %v3505_v43 = vpop.f32.mrf.mxu0 }
 0x6e6   : > { %v3507_v44 = vpop.f32.mrf.mxu0 }
 0x6ee   : > { %v3509_v48 = vpop.f32.mrf.mxu0 }
 0x6ef   : > { %v1376_v36 = vrot.slane %v3509_v48, 4 }
 0x6f6   : > { %v1359_v6 = vpop.f32.mrf.mxu0 }
 0x6f7   : > { %v1377_v12 = vrot.slane %v1359_v6, 4 }
 0x6f9   : > { %v1378_v18 = vsel %vm239_vm0, %v1376_v36, %v1377_v12 }
 0x6fe   : > { %v1362_v51 = vpop.f32.mrf.mxu0 }
 0x6ff   : > { %v1379_v33 = vrot.slane %v1362_v51, 4 }
 0x701   : > { %v1380_v22 = vsel %vm239_vm0, %v1377_v12, %v1379_v33 }
 0x706   : > { %v1364_v49 = vpop.f32.mrf.mxu0 }
 0x707   : > { %v1381_v9 = vrot.slane %v1364_v49, 4 }
 0x709   : > { %v1382_v7 = vsel %vm239_vm0, %v1379_v33, %v1381_v9 }
 0x70e   : > { %v1367_v42 = vpop.f32.mrf.mxu0 }
 0x70f   : > { %v1383_v10 = vrot.slane %v1367_v42, 4 }
 0x711   : > { %v1384_v46 = vsel %vm239_vm0, %v1381_v9, %v1383_v10 }
 0x716   : > { %v1369_v13 = vpop.f32.mrf.mxu0 }
 0x71e   : > { %v1310_v60 = vpop.f32.mrf.mxu3 }
 0x71f   : > { %v1311_v0 = vadd.f32 %v1310_v60, %v1286_v59 }
 0x721   : > { %1414 = vrot.lane.b32.xlu2 %v1311_v0, %s2958_s28 }
 0x726   : > { %v1312_v50 = vpop.f32.mrf.mxu3 }
 0x727   : > { %v1313_v16 = vadd.f32 %v1312_v50, %v1286_v59 }
 0x729   : > { %1389 = vrot.lane.b32.xlu2 %v1382_v7, %s2957_s21 }
 0x72e   : > { %v1315_v61 = vpop.f32.mrf.mxu3 }
 0x72f   : > { %v1316_v27 = vadd.f32 %v1315_v61, %v1286_v59 }
 0x731   : > { %1393 = vrot.lane.b32.xlu2 %v1383_v10, %s2957_s21  ;;  %1418 = vrot.lane.b32.xlu1 %v1316_v27, %s2958_s28 }
 0x736   : > { %v1317_v14 = vpop.f32.mrf.mxu3 }
 0x739   : > { %1385 = vrot.lane.b32.xlu2 %v1378_v18, %s2957_s21  ;;  %1416 = vrot.lane.b32.xlu1 %v1313_v16, %s2958_s28  ;;  %v288_v18 = vrot.slane %v3446_v23, 4 }
 0x741   : > { %1410 = vrot.lane.b32.xlu2 %v1306_v20, %s2958_s28  ;;  %1387 = vrot.lane.b32.xlu1 %v1380_v22, %s2957_s21  ;;  %v289_v20 = vrot.slane %v3449_v24, 4  ;;  %v293_v24 = vrot.slane %v3464_v29, 4 }
 0x749   : > { %1412 = vrot.lane.b32.xlu1 %v1308_v62, %s2958_s28  ;;  %v291_v62 = vrot.slane %v3461_v37, 4 }
 0x751   : > { %1391 = vrot.lane.b32.xlu1 %v1384_v46, %s2957_s21 }
 0x77b   : > { %v1415_v8 = vpop.permute.xlu2 %1414 }
 0x783   : > { %v1390_v25 = vpop.permute.xlu2 %1389 }
 0x784   : > { %v1402_v30 = vadd.f32 %v1390_v25, %v3505_v43  ;;  %v290_v25 = vsel %vm239_vm0, %v288_v18, %v289_v20 }
 0x786   : > { %v3534_v51 = vadd.f32 %v1415_v8, %v1402_v30 }
 0x788   : > { %v1432_v42 = vmul.f32 0.5, %v3534_v51 }
 0x78b   : > { %v1394_v26 = vpop.permute.xlu2 %1393 }
 0x78c   : > { %v1404_v41 = vadd.f32 %v1394_v26, %v3509_v48 }
 0x793   : > { %v1386_v5 = vpop.permute.xlu2 %1385 }
 0x794   : > { %v1400_v32 = vadd.f32 %v1386_v5, %v3501_v35 }
 0x79b   : > { %v1411_v6 = vpop.permute.xlu2 %1410 }
 0x79c   : > { %v3536_v49 = vadd.f32 %v1411_v6, %v1400_v32  ;;  %v292_v32 = vsel %vm239_vm0, %v289_v20, %v291_v62  ;;  %v294_v6 = vsel %vm239_vm0, %v291_v62, %v293_v24 }
 0x79e   : > { %v1430_v53 = vmul.f32 0.5, %v3536_v49 }
 0x7a0   : > { %2862 = vtanh.f32 %v1430_v53 }
 0x7a1   : > { %2864 = vtanh.f32 %v1432_v42 }
 0x7a3   : > { %v1419_v13 = vpop.permute.xlu1 %1418 }
 0x7a4   : > { %v3541_v59 = vadd.f32 %v1419_v13, %v1404_v41  ;;  %v295_v13 = vrot.slane %v3478_v11, 4 }
 0x7a6   : > { %v2863_v60 = vpop.eup %2862  ;;  %v1434_v0 = vmul.f32 0.5, %v3541_v59 }
 0x7a7   : > { %v1440_v9 = vmul.f32 0.5, %v2863_v60  ;;  %v2865_v50 = vpop.eup %2864 }
 0x7a8   : > { %2866 = vtanh.f32 %v1434_v0  ;;  %v1442_v61 = vmul.f32 0.5, %v2865_v50  ;;  %v296_v0 = vsel %vm239_vm0, %v293_v24, %v295_v13  ;;  %v1169_v50 = vadd.f32 1e-06, %v3409_v39 }
 0x7a9   : > { %v3544_v33 = vadd.f32 0.5, %v1440_v9 }
 0x7aa   : > { %v1447_v36 = vadd.f32 0.5, %v1442_v61 }
 0x7ab   : > { %1455 = vrot.lane.b32.xlu1 %v3544_v33, %s2957_s21  ;;  %v1417_v7 = vpop.permute.xlu1 %1416 }
 0x7ae   : > { %v2867_v10 = vpop.eup %2866 }
 0x7af   : > { %v1444_v27 = vmul.f32 0.5, %v2867_v10 }
 0x7b1   : > { %v1449_v12 = vadd.f32 0.5, %v1444_v27 }
 0x7b3   : > { %1459 = vrot.lane.b32.xlu1 %v1447_v36, %s2957_s21  ;;  %1463 = vrot.lane.b32.xlu2 %v1449_v12, %s2957_s21  ;;  %v1388_v14 = vpop.permute.xlu1 %1387 }
 0x7b4   : > { %v1401_v46 = vadd.f32 %v1388_v14, %v3503_v38 }
 0x7bb   : > { %v1413_v16 = vpop.permute.xlu1 %1412 }
 0x7bc   : > { %v3556_v26 = vadd.f32 %v1413_v16, %v1401_v46 }
 0x7be   : > { %v1431_v23 = vmul.f32 0.5, %v3556_v26 }
 0x7c3   : > { %v1392_v22 = vpop.permute.xlu1 %1391 }
 0x7c4   : > { %v1403_v8 = vadd.f32 %v1392_v22, %v3507_v44 }
 0x7c6   : > { %v3558_v5 = vadd.f32 %v1417_v7, %v1403_v8 }
 0x7c8   : > { %v1433_v30 = vmul.f32 0.5, %v3558_v5 }
 0x7ca   : > { %2868 = vtanh.f32 %v1433_v30 }
 0x7cb   : > { %2870 = vtanh.f32 %v1431_v23 }
 0x7d0   : > { %v2869_v37 = vpop.eup %2868 }
 0x7d1   : > { %v1443_v53 = vmul.f32 0.5, %v2869_v37  ;;  %v2871_v41 = vpop.eup %2870 }
 0x7d2   : > { %v1441_v60 = vmul.f32 0.5, %v2871_v41 }
 0x7d3   : > { %v1448_v42 = vadd.f32 0.5, %v1443_v53 }
 0x7d4   : > { %v1446_v9 = vadd.f32 0.5, %v1441_v60 }
 0x7d5   : > { %1461 = vrot.lane.b32.xlu2 %v1448_v42, %s2957_s21 }
 0x7dd   : > { %1457 = vrot.lane.b32.xlu2 %v1446_v9, %s2957_s21 }
 0x7e5   : > { %1171 = vrot.lane.b32.xlu2 %v1169_v50, %s2957_s21 }
 0x7e8   : > { %302 = vxpose.xlu1.b32.start [1/5] (short) (narrow) %v290_v25, 16 }
 0x7f0   : > { %303 = vxpose.xlu1.b32.cont [2/5] (short) (narrow) %v292_v32, 16 }
 0x7f8   : > { %304 = vxpose.xlu1.b32.cont [3/5] (short) (narrow) %v294_v6, 16 }
 0x800   : > { %305 = vxpose.xlu1.b32.cont [4/5] (short) (narrow) %v296_v0, 16 }
 0x808   : > { %306 = vxpose.xlu1.b32.end [5/5] (short) (narrow) %v295_v13, 16 }
 0x80d   : > { %v1464_v29 = vpop.permute.xlu2 %1463 }
 0x80e   : > { %v1474_v11 = vmul.f32 %v1464_v29, %v3509_v48  ;;  %v1194_v48 = vperm.slane %v3277_v19, 1 }
 0x810   : > { %v1479_v7 = vsel %vm536_vm10, %v1474_v11, %v1449_v12  ;;  %1196 = vrot.lane.b32.xlu2 %v1194_v48, %s2957_s21  ;;  %v1659_v48 = vld [vmem:[%s4017_s2 + $0x4a] sm:$0xff] }
 0x811   : > { %v1482_v61 = vpack.c.bf16 %v1479_v7, %v1479_v7 }
 0x813   : > { %v1488_v10 = vsel %vm1082_vm4, %v1482_v61, 0 }
 0x814   : > { %1495 = vmatpush.bf16.msrb.mxu1 %v1488_v10 }
 0x81d   : > { %v1456_v27 = vpop.permute.xlu1 %1455 }
 0x81e   : > { %v1470_v12 = vmul.f32 %v1456_v27, %v3501_v35 }
 0x825   : > { %v1460_v14 = vpop.permute.xlu1 %1459 }
 0x826   : > { %v1472_v16 = vmul.f32 %v1460_v14, %v3505_v43  ;;  %v1200_v43 = vperm.slane %v3277_v19, 2 }
 0x828   : > { %v1477_v22 = vsel %vm536_vm10, %v1472_v16, %v1447_v36  ;;  %1202 = vrot.lane.b32.xlu2 %v1200_v43, %s2957_s21 }
 0x82f   : > { %v1462_v18 = vpop.permute.xlu2 %1461 }
 0x830   : > { %v1473_v20 = vmul.f32 %v1462_v18, %v3507_v44  ;;  %v1475_v44 = vsel %vm536_vm10, %v1470_v12, %v3544_v33  ;;  %v1660_v18 = vld [vmem:[%s4017_s2 + $0x52] sm:$0xff] }
 0x832   : > { %v1478_v62 = vsel %vm536_vm10, %v1473_v20, %v1448_v42  ;;  %v1661_v20 = vld [vmem:[%s4017_s2 + $0x5a] sm:$0xff] }
 0x833   : > { %v1481_v46 = vpack.c.bf16 %v1478_v62, %v1477_v22 }
 0x835   : > { %1496 = vmatpush.bf16.msrb.mxu1 %v1481_v46  ;;  %v1658_v46 = vld [vmem:[%s4017_s2 + $0x42] sm:$0xff] }
 0x836   : > { %v1669_v12 = vpack.c.bf16 %v1659_v48, %v1658_v46 }
 0x837   : > { %v1458_v8 = vpop.permute.xlu2 %1457 }
 0x838   : > { %v1471_v25 = vmul.f32 %v1458_v8, %v3503_v38 }
 0x83a   : > { %v1476_v36 = vsel %vm536_vm10, %v1471_v25, %v1446_v9 }
 0x83b   : > { %v1480_v30 = vpack.c.bf16 %v1476_v36, %v1475_v44 }
 0x83d   : > { %1497 = vmatpush.bf16.msrb.mxu1 %v1480_v30 }
 0x83f   : > { %v1172_v32 = vpop.permute.xlu2 %1171 }
 0x840   : > { %2872 = vrcp.f32 %v1172_v32  ;;  %v1185_v35 = vand.u32 2147483648, %v1172_v32  ;;  %v1183_v38 = vand.u32 2147483647, %v1172_v32  ;;  %vm1179_vm1 = vweird.f32 %v1172_v32 }
 0x842   : > { %v1186_v53 = vor.u32 1.1754944e-38, %v1185_v35  ;;  %vm1184_vm9 = vcmp.eq.f32.partialorder %v1183_v38, 8.507059e+37 }
 0x846   : > { %v2873_v23 = vpop.eup %2872 }
 0x847   : > { %v1175_v24 = vmul.f32 %v2873_v23, %v1172_v32  ;;  %vm1180_vm15 = vweird.f32 %v2873_v23 }
 0x848   : > { %vm1181_vm7 = vmor %vm1179_vm1, %vm1180_vm15 }
 0x849   : > { %v1176_v37 = vsub.f32 1.0, %v1175_v24 }
 0x84b   : > { %v1177_v6 = vmul.f32 %v2873_v23, %v1176_v37 }
 0x84d   : > { %v1178_v19 = vadd.f32 %v2873_v23, %v1177_v6 }
 0x84f   : > { %v1182_v33 = vsel %vm1181_vm7, %v2873_v23, %v1178_v19 }
 0x850   : > { %v1187_v42 = vsel %vm1184_vm9, %v1186_v53, %v1182_v33 }
 0x851   : > { %v1188_v41 = vmul.f32 %v1187_v42, %v3409_v39 }
 0x853   : > { %1190 = vrot.lane.b32.xlu0 %v1188_v41, %s2957_s21 }
 0x86a   : > { %v1197_v9 = vpop.permute.xlu2 %1196 }
 0x882   : > { %v1203_v11 = vpop.permute.xlu2 %1202 }
 0x88c   : > { %v318_v13 = vpop.trf.xlu1 }
 0x894   : > { %v319_v60 = vpop.trf.xlu1 }
 0x895   : > { %v3589_v0 = vpack.c.bf16 %v319_v60, %v318_v13 }
 0x897   : > { %2719 = vmatmul.msk.bf16.vlgmr.msrb.gmra.mxu1 %vm1483_vm11, %v3589_v0 }
 0x8c5   : > { %v1191_v50 = vpop.permute.xlu0 %1190 }
 0x8c6   : > { %v1193_v29 = vadd.f32 %v1191_v50, %v3111_v58  ;;  %v1670_v58 = vpack.c.bf16 %v1661_v20, %v1660_v18 }
 0x8c8   : > { %v1199_v7 = vmul.f32 %v1197_v9, %v1193_v29  ;;  %1681 = vmatpush.bf16.msra.mxu2 %v1670_v58 }
 0x8ca   : > { %v1205_v61 = vadd.f32 %v1203_v11, %v1199_v7 }
 0x8cc   : > { %v1206_v10 = vmul.f32 0.5, %v1205_v61  ;;  %1682 = vmatpush.bf16.msra.mxu2 %v1669_v12 }
 0x8ce   : > { %2874 = vtanh.f32 %v1206_v10 }
 0x8d4   : > { %v2875_v39 = vpop.eup %2874 }
 0x8d5   : > { %v1208_v27 = vmul.f32 0.5, %v2875_v39 }
 0x8d7   : > { %v1209_v14 = vadd.f32 0.5, %v1208_v27  ;;  %v1561_v27 = vperm.slane %v3514_v54, 2 }
 0x8d9   : > { %v1210_v16 = vmul.f32 %v1209_v14, %v1205_v61  ;;  %v1554_v14 = vperm.slane %v3514_v54, 1 }
 0x8db   : > { %1212 = vrot.lane.b32.xlu2 %v1210_v16, %s2958_s28  ;;  %v2772_v16 = vld [vmem:[%s4017_s2 + $0x62] ss:$0 sm:$0xff] }
 0x914   : > { %v1499_v22 = vpop.f32.mrf.mxu1 }
 0x915   : > { %v1504_v62 = vadd.f32 1e-06, %v1499_v22 }
 0x917   : > { %1508 = vrot.lane.b32.xlu0 %v1504_v62, %s2957_s21 }
 0x91c   : > { %v1501_v8 = vpop.f32.mrf.mxu1 }
 0x91d   : > { %v1505_v25 = vadd.f32 1e-06, %v1501_v8 }
 0x91f   : > { %1510 = vrot.lane.b32.xlu2 %v1505_v25, %s2957_s21 }
 0x935   : > { %v1213_v43 = vpop.permute.xlu2 %1212 }
 0x936   : > { %v3610_v44 = vadd.f32 %v1213_v43, %v3071_v34 }
 0x938   : > { %v1668_v36 = vpack.c.bf16 %v3610_v44, %v3610_v44 }
 0x93a   : > { %2720 = vmatmul.msk.bf16.vlgmr.msra.gmra.mxu2 %vm536_vm10, %v1668_v36 }
 0x979   : > { %v1511_v30 = vpop.permute.xlu2 %1510 }
 0x97a   : > { %2876 = vrcp.f32 %v1511_v30  ;;  %v1540_v37 = vand.u32 2147483648, %v1511_v30  ;;  %v1538_v6 = vand.u32 2147483647, %v1511_v30  ;;  %vm1534_vm13 = vweird.f32 %v1511_v30 }
 0x97c   : > { %v1541_v19 = vor.u32 1.1754944e-38, %v1540_v37  ;;  %vm1539_vm14 = vcmp.eq.f32.partialorder %v1538_v6, 8.507059e+37 }
 0x980   : > { %v2877_v32 = vpop.eup %2876 }
 0x981   : > { %v1530_v23 = vmul.f32 %v2877_v32, %v1511_v30  ;;  %vm1535_vm12 = vweird.f32 %v2877_v32 }
 0x982   : > { %vm1536_vm5 = vmor %vm1534_vm13, %vm1535_vm12 }
 0x983   : > { %v1531_v24 = vsub.f32 1.0, %v1530_v23 }
 0x985   : > { %v1532_v35 = vmul.f32 %v2877_v32, %v1531_v24 }
 0x987   : > { %v1533_v38 = vadd.f32 %v2877_v32, %v1532_v35 }
 0x989   : > { %v1509_v34 = vpop.permute.xlu0 %1508  ;;  %v1537_v53 = vsel %vm1536_vm5, %v2877_v32, %v1533_v38 }
 0x98a   : > { %2878 = vrcp.f32 %v1509_v34  ;;  %v1542_v33 = vsel %vm1539_vm14, %v1541_v19, %v1537_v53  ;;  %v1525_v9 = vand.u32 2147483648, %v1509_v34  ;;  %v1523_v29 = vand.u32 2147483647, %v1509_v34 }
 0x98b   : > { %v1543_v42 = vmul.f32 %v1542_v33, %v1501_v8  ;;  %vm1519_vm1 = vweird.f32 %v1509_v34 }
 0x98c   : > { %v1526_v7 = vor.u32 1.1754944e-38, %v1525_v9  ;;  %vm1524_vm9 = vcmp.eq.f32.partialorder %v1523_v29, 8.507059e+37 }
 0x98d   : > { %1548 = vrot.lane.b32.xlu2 %v1543_v42, %s2957_s21 }
 0x990   : > { %v2879_v41 = vpop.eup %2878 }
 0x991   : > { %v1515_v13 = vmul.f32 %v2879_v41, %v1509_v34  ;;  %vm1520_vm15 = vweird.f32 %v2879_v41 }
 0x992   : > { %vm1521_vm7 = vmor %vm1519_vm1, %vm1520_vm15 }
 0x993   : > { %v1516_v60 = vsub.f32 1.0, %v1515_v13  ;;  %v1666_v13 = vld [vmem:[%s4018_s3 + $0xbb] sm:$0xff] }
 0x995   : > { %v1517_v50 = vmul.f32 %v2879_v41, %v1516_v60  ;;  %1563 = vrot.lane.b32.xlu2 %v1561_v27, %s2957_s21 }
 0x997   : > { %v1518_v11 = vadd.f32 %v2879_v41, %v1517_v50 }
 0x999   : > { %v1522_v61 = vsel %vm1521_vm7, %v2879_v41, %v1518_v11  ;;  %v1665_v41 = vld [vmem:[%s4018_s3 + $0xb3] sm:$0xff] }
 0x99a   : > { %v1527_v10 = vsel %vm1524_vm9, %v1526_v7, %v1522_v61  ;;  %v1690_v60 = vpack.c.bf16 %v1666_v13, %v1665_v41  ;;  %v1663_v61 = vld [vmem:[%s4018_s3 + $0xa3] sm:$0xff] }
 0x99b   : > { %v1528_v39 = vmul.f32 %v1527_v10, %v1499_v22  ;;  %v1664_v10 = vld [vmem:[%s4018_s3 + $0xab] sm:$0xff] }
 0x99c   : > { %1701 = vmatpush.bf16.msra.mxu1 %v1690_v60 }
 0x99d   : > { %1546 = vrot.lane.b32.xlu0 %v1528_v39, %s2957_s21  ;;  %v1689_v39 = vpack.c.bf16 %v1664_v10, %v1663_v61 }
 0x9a0   : > { %1702 = vmatpush.bf16.msra.mxu1 %v1689_v39 }
 0x9a5   : > { %1556 = vrot.lane.b32.xlu0 %v1554_v14, %s2957_s21 }
 0x9bd   : > { %v1684_v18 = vpop.f32.mrf.mxu2 }
 0x9be   : > { %v3624_v20 = vadd.f32 %v2772_v16, %v1684_v18 }
 0x9c0   : > { %v1709_v58 = vpack.c.bf16 %v3624_v20, %v3624_v20 }
 0x9c2   : > { %v1711_v22 = vsel %vm1082_vm4, %v1709_v58, 0 }
 0x9c3   : > { %1720 = vmatpush.bf16.msrb.mxu2 %v1711_v22  ;;  %v3669_v22 = vld [vmem:[%s4018_s3 + $0xc3] sm:$0x1f] }
 0x9c5   : > { %v1686_v62 = vpop.f32.mrf.mxu2 }
 0x9c6   : > { %2722 = vmatmul.msk.bf16.vlgmr.msrb.gmra.mxu2 %vm1075_vm6, %v3152_v28  ;;  %v1691_v62 = vperm.slane %v3669_v22, 0 }
 0x9d6   : > { %2723 = vmatmul.msk.bf16.gmra.mxu2 %vm1075_vm6, %v3172_v3 }
 0x9e7   : > { %v1549_v46 = vpop.permute.xlu2 %1548 }
 0x9e8   : > { %v1553_v12 = vadd.f32 %v1549_v46, %v3427_v1 }
 0x9ef   : > { %v1564_v43 = vpop.permute.xlu2 %1563 }
 0xa0f   : > { %v1547_v48 = vpop.permute.xlu0 %1546 }
 0xa10   : > { %v1552_v8 = vadd.f32 %v1547_v48, %v3425_v4 }
 0xa17   : > { %v1557_v25 = vpop.permute.xlu0 %1556 }
 0xa18   : > { %v1559_v36 = vmul.f32 %v1557_v25, %v1552_v8  ;;  %v1560_v30 = vmul.f32 %v1557_v25, %v1553_v12  ;;  %v1845_v8 = vperm.slane %v3669_v22, 4  ;;  %v1588_v25 = vperm.slane %v3514_v54, 3 }
 0xa1a   : > { %v1566_v32 = vadd.f32 %v1564_v43, %v1559_v36  ;;  %v1567_v23 = vadd.f32 %v1564_v43, %v1560_v30 }
 0xa1c   : > { %v1568_v24 = vmul.f32 0.5, %v1566_v32  ;;  %v1569_v37 = vmul.f32 0.5, %v1567_v23 }
 0xa1e   : > { %2880 = vtanh.f32 %v1568_v24 }
 0xa1f   : > { %2882 = vtanh.f32 %v1569_v37 }
 0xa24   : > { %v2881_v35 = vpop.eup %2880 }
 0xa25   : > { %v2883_v6 = vpop.eup %2882  ;;  %v1572_v38 = vmul.f32 0.5, %v2881_v35 }
 0xa26   : > { %v1573_v19 = vmul.f32 0.5, %v2883_v6 }
 0xa27   : > { %v1574_v34 = vadd.f32 0.5, %v1572_v38 }
 0xa28   : > { %v1575_v53 = vadd.f32 0.5, %v1573_v19 }
 0xa29   : > { %v1576_v33 = vmul.f32 %v1574_v34, %v1566_v32 }
 0xa2a   : > { %v1577_v1 = vmul.f32 %v1575_v53, %v1567_v23 }
 0xa2b   : > { %1580 = vrot.lane.b32.xlu0 %v1576_v33, %s2958_s28 }
 0xa2c   : > { %1582 = vrot.lane.b32.xlu2 %v1577_v1, %s2958_s28 }
 0xa49   : > { %v3637_v4 = vpop.f32.mrf.mxu2 }
 0xa51   : > { %v3639_v42 = vpop.f32.mrf.mxu2 }
 0xa52   : > { %v1733_v9 = vrot.slane %v3639_v42, 4 }
 0xa59   : > { %v1727_v50 = vpop.f32.mrf.mxu2 }
 0xa5a   : > { %v1734_v29 = vrot.slane %v1727_v50, 4 }
 0xa5c   : > { %v1735_v11 = vsel %vm239_vm0, %v1733_v9, %v1734_v29  ;;  %1738 = vrot.lane.b32.xlu2 %v1734_v29, %s2957_s21 }
 0xa5d   : > { %1736 = vrot.lane.b32.xlu0 %v1735_v11, %s2957_s21 }
 0xa61   : > { %v1729_v7 = vpop.f32.mrf.mxu2 }
 0xa86   : > { %v1583_v27 = vpop.permute.xlu2 %1582 }
 0xa87   : > { %v3658_v16 = vadd.f32 %v1583_v27, %v3369_v47  ;;  %v1838_v47 = vperm.slane %v3669_v22, 3 }
 0xa9d   : > { %v1581_v14 = vpop.permute.xlu0 %1580 }
 0xa9e   : > { %v3661_v18 = vadd.f32 %v1581_v14, %v3366_v45 }
 0xaa0   : > { %v1688_v58 = vpack.c.bf16 %v3658_v16, %v3661_v18 }
 0xaa2   : > { %2721 = vmatmul.msk.bf16.vlgmr.msra.gmra.mxu1 %vm536_vm10, %v1688_v58 }
 0xab6   : > { %v1739_v43 = vpop.permute.xlu2 %1738 }
 0xab7   : > { %v1743_v35 = vadd.f32 %v1739_v43, %v3639_v42 }
 0xacf   : > { %v1737_v36 = vpop.permute.xlu0 %1736 }
 0xad0   : > { %v1742_v30 = vadd.f32 %v1737_v36, %v3637_v4 }
 0xb1f   : > { %v1704_v46 = vpop.f32.mrf.mxu1 }
 0xb20   : > { %v1705_v48 = vadd.f32 %v1704_v46, %v1691_v62 }
 0xb22   : > { %1746 = vrot.lane.b32.xlu0 %v1705_v48, %s2958_s28 }
 0xb27   : > { %v1706_v45 = vpop.f32.mrf.mxu1 }
 0xb28   : > { %v1707_v12 = vadd.f32 %v1706_v45, %v1691_v62  ;;  %v1598_v62 = vperm.slane %v3514_v54, 4  ;;  %v1874_v45 = vld [vmem:[%s4017_s2 + $0x73] sm:$0xff]  ;;  %v1872_v54 = vld [vmem:[%s4017_s2 + $0x63] sm:$0xff] }
 0xb2a   : > { %1748 = vrot.lane.b32.xlu2 %v1707_v12, %s2958_s28  ;;  %1840 = vrot.lane.b32.xlu0 %v1838_v47, %s2958_s28  ;;  %v1875_v12 = vld [vmem:[%s4017_s2 + $0x7b] sm:$0xff] }
 0xb32   : > { %1847 = vrot.lane.b32.xlu2 %v1845_v8, %s2958_s28  ;;  %v1884_v8 = vpack.c.bf16 %v1875_v12, %v1874_v45 }
 0xb34   : > { %1895 = vmatpush.bf16.msra.mxu3 %v1884_v8 }
 0xb3a   : > { %1590 = vrot.lane.b32.xlu2 %v1588_v25, %s2958_s28  ;;  %v1873_v25 = vld [vmem:[%s4017_s2 + $0x6b] sm:$0xff] }
 0xb3b   : > { %v1883_v43 = vpack.c.bf16 %v1873_v25, %v1872_v54 }
 0xb3d   : > { %1896 = vmatpush.bf16.msra.mxu3 %v1883_v43 }
 0xb84   : > { %v1749_v32 = vpop.permute.xlu2 %1748 }
 0xb85   : > { %v1753_v6 = vadd.f32 %v1749_v32, %v1743_v35 }
 0xb87   : > { %v1755_v39 = vmul.f32 0.5, %v1753_v6 }
 0xb8c   : > { %v1848_v53 = vpop.permute.xlu2 %1847 }
 0xb94   : > { %v1747_v23 = vpop.permute.xlu0 %1746 }
 0xb95   : > { %v1752_v24 = vadd.f32 %v1747_v23, %v1742_v30 }
 0xb97   : > { %v1754_v37 = vmul.f32 0.5, %v1752_v24 }
 0xb99   : > { %2884 = vtanh.f32 %v1754_v37 }
 0xb9c   : > { %v1841_v38 = vpop.permute.xlu0 %1840 }
 0xb9d   : > { %v1843_v19 = vmul.f32 %v1841_v38, %v1752_v24  ;;  %v1844_v34 = vmul.f32 %v1841_v38, %v1753_v6  ;;  %v1591_v24 = vpop.permute.xlu2 %1590 }
 0xb9e   : > { %v1594_v35 = vmul.f32 %v1591_v24, %v3556_v26  ;;  %v1593_v6 = vmul.f32 %v1591_v24, %v3536_v49  ;;  %v1596_v38 = vmul.f32 %v1591_v24, %v3558_v5  ;;  %v1597_v26 = vmul.f32 %v1591_v24, %v3541_v59 }
 0xb9f   : > { %v2885_v33 = vpop.eup %2884  ;;  %v1850_v1 = vadd.f32 %v1848_v53, %v1843_v19  ;;  %v1851_v41 = vadd.f32 %v1848_v53, %v1844_v34  ;;  %v1595_v19 = vmul.f32 %v1591_v24, %v3534_v51 }
 0xba0   : > { %v1758_v13 = vmul.f32 0.5, %v2885_v33 }
 0xba1   : > { %v1852_v60 = vmul.f32 0.5, %v1850_v1  ;;  %v1853_v9 = vmul.f32 0.5, %v1851_v41 }
 0xba2   : > { %v1760_v50 = vadd.f32 0.5, %v1758_v13 }
 0xba3   : > { %2886 = vtanh.f32 %v1852_v60 }
 0xba4   : > { %2888 = vtanh.f32 %v1853_v9  ;;  %1764 = vrot.lane.b32.xlu2 %v1760_v50, %s2957_s21 }
 0xba5   : > { %2890 = vtanh.f32 %v1755_v39 }
 0xba9   : > { %v2887_v29 = vpop.eup %2886 }
 0xbaa   : > { %v2889_v11 = vpop.eup %2888  ;;  %v1856_v7 = vmul.f32 0.5, %v2887_v29 }
 0xbab   : > { %v1857_v61 = vmul.f32 0.5, %v2889_v11  ;;  %v2891_v46 = vpop.eup %2890 }
 0xbac   : > { %v1858_v10 = vadd.f32 0.5, %v1856_v7  ;;  %v1759_v48 = vmul.f32 0.5, %v2891_v46 }
 0xbad   : > { %v1859_v27 = vadd.f32 0.5, %v1857_v61 }
 0xbae   : > { %v1860_v14 = vmul.f32 %v1858_v10, %v1850_v1  ;;  %v1761_v47 = vadd.f32 0.5, %v1759_v48 }
 0xbaf   : > { %v1861_v58 = vmul.f32 %v1859_v27, %v1851_v41 }
 0xbb0   : > { %1864 = vrot.lane.b32.xlu0 %v1860_v14, %s2957_s21 }
 0xbb1   : > { %1866 = vrot.lane.b32.xlu1 %v1861_v58, %s2957_s21 }
 0xbb8   : > { %1600 = vrot.lane.b32.xlu0 %v1598_v62, %s2958_s28 }
 0xbc0   : > { %1766 = vrot.lane.b32.xlu0 %v1761_v47, %s2957_s21 }
 0xbfe   : > { %v1765_v60 = vpop.permute.xlu2 %1764 }
 0xbff   : > { %v1770_v49 = vmul.f32 %v1765_v60, %v3637_v4 }
 0xc01   : > { %v1772_v7 = vsel %vm536_vm10, %v1770_v49, %v1760_v50 }
 0xc22   : > { %v1865_v36 = vpop.permute.xlu0 %1864 }
 0xc23   : > { %v1867_v30 = vpop.permute.xlu1 %1866  ;;  %v3701_v32 = vadd.f32 %v1865_v36, %v3661_v18 }
 0xc24   : > { %v3704_v23 = vadd.f32 %v1867_v30, %v3658_v16 }
 0xc26   : > { %v1882_v37 = vpack.c.bf16 %v3704_v23, %v3701_v32 }
 0xc28   : > { %2725 = vmatmul.msk.bf16.vlgmr.msra.gmra.mxu3 %vm536_vm10, %v1882_v37  ;;  %v1879_v37 = vld [vmem:[%s4018_s3 + $0xd8] sm:$0xff] }
 0xc2a   : > { %v1601_v34 = vpop.permute.xlu0 %1600 }
 0xc2b   : > { %v1604_v18 = vadd.f32 %v1601_v34, %v1594_v35  ;;  %v1603_v53 = vadd.f32 %v1601_v34, %v1593_v6  ;;  %v1606_v33 = vadd.f32 %v1601_v34, %v1596_v38  ;;  %v1605_v16 = vadd.f32 %v1601_v34, %v1595_v19  ;;  %v1880_v35 = vld [vmem:[%s4018_s3 + $0xe0] sm:$0xff]  ;;  %v1877_v38 = vld [vmem:[%s4018_s3 + $0xc8] sm:$0xff]  ;;  %v1878_v19 = vld [vmem:[%s4018_s3 + $0xd0] sm:$0xff] }
 0xc2c   : > { %v1607_v51 = vadd.f32 %v1601_v34, %v1597_v26  ;;  %v1907_v6 = vpack.c.bf16 %v1880_v35, %v1879_v37  ;;  %v1906_v34 = vpack.c.bf16 %v1878_v19, %v1877_v38 }
 0xc2d   : > { %v1609_v1 = vmul.f32 0.5, %v1604_v18  ;;  %v1608_v41 = vmul.f32 0.5, %v1603_v53  ;;  %v1611_v13 = vmul.f32 0.5, %v1606_v33  ;;  %v1610_v9 = vmul.f32 0.5, %v1605_v16 }
 0xc2e   : > { %v1612_v14 = vmul.f32 0.5, %v1607_v51 }
 0xc2f   : > { %2892 = vtanh.f32 %v1609_v1 }
 0xc30   : > { %2894 = vtanh.f32 %v1608_v41  ;;  %v2773_v41 = vld [vmem:[%s4017_s2 + $0x83] ss:$0 sm:$0xff] }
 0xc31   : > { %2896 = vtanh.f32 %v1611_v13 }
 0xc32   : > { %v1767_v5 = vpop.permute.xlu0 %1766  ;;  %2898 = vtanh.f32 %v1610_v9 }
 0xc33   : > { %v1771_v29 = vmul.f32 %v1767_v5, %v3639_v42  ;;  %2900 = vtanh.f32 %v1612_v14 }
 0xc35   : > { %v2893_v11 = vpop.eup %2892  ;;  %v1773_v61 = vsel %vm536_vm10, %v1771_v29, %v1761_v47 }
 0xc36   : > { %v2895_v10 = vpop.eup %2894  ;;  %v1774_v39 = vpack.c.bf16 %v1773_v61, %v1772_v7  ;;  %v1619_v27 = vmul.f32 0.5, %v2893_v11 }
 0xc37   : > { %v2897_v58 = vpop.eup %2896  ;;  %v1618_v62 = vmul.f32 0.5, %v2895_v10 }
 0xc38   : > { %v2899_v59 = vpop.eup %2898  ;;  %v1776_v4 = vsel %vm1152_vm3, %v1774_v39, 0  ;;  %v1624_v46 = vadd.f32 0.5, %v1619_v27  ;;  %v1621_v12 = vmul.f32 0.5, %v2897_v58 }
 0xc39   : > { %1785 = vmatpush.bf16.msrb.mxu1 %v1776_v4  ;;  %v1623_v48 = vadd.f32 0.5, %v1618_v62  ;;  %v1620_v8 = vmul.f32 0.5, %v2899_v59  ;;  %v2901_v54 = vpop.eup %2900 }
 0xc3a   : > { %v1629_v45 = vmul.f32 %v1624_v46, %v1604_v18  ;;  %v1626_v50 = vadd.f32 0.5, %v1621_v12  ;;  %v1622_v36 = vmul.f32 0.5, %v2901_v54 }
 0xc3b   : > { %v1628_v42 = vmul.f32 %v1623_v48, %v1603_v53  ;;  %v1625_v47 = vadd.f32 0.5, %v1620_v8 }
 0xc3c   : > { %1640 = vrot.lane.b32.xlu0 %v1629_v45, %s2957_s21  ;;  %2724 = vmatmul.msk.bf16.vlgmr.msrb.gmra.mxu1 %vm1148_vm8, %v3360_v52  ;;  %v1631_v25 = vmul.f32 %v1626_v50, %v1606_v33  ;;  %v1627_v30 = vadd.f32 0.5, %v1622_v36 }
 0xc3d   : > { %1638 = vrot.lane.b32.xlu2 %v1628_v42, %s2957_s21  ;;  %v1630_v43 = vmul.f32 %v1625_v47, %v1605_v16  ;;  %1924 = vmatpush.bf16.msra.mxu1 %v1907_v6 }
 0xc3e   : > { %v1632_v24 = vmul.f32 %v1627_v30, %v1607_v51 }
 0xc41   : > { %1925 = vmatpush.bf16.msra.mxu1 %v1906_v34 }
 0xc44   : > { %1644 = vrot.lane.b32.xlu0 %v1631_v25, %s2957_s21 }
 0xc45   : > { %1642 = vrot.lane.b32.xlu2 %v1630_v43, %s2957_s21 }
 0xc4d   : > { %1646 = vrot.lane.b32.xlu2 %v1632_v24, %s2957_s21 }
 0xc97   : > { %v1639_v53 = vpop.permute.xlu2 %1638 }
 0xc98   : > { %v1653_v16 = vadd.f32 %v1639_v53, %v3417_v31 }
 0xc9f   : > { %v1643_v51 = vpop.permute.xlu2 %1642 }
 0xca0   : > { %v1655_v11 = vadd.f32 %v1643_v51, %v3489_v2 }
 0xca7   : > { %v1647_v10 = vpop.permute.xlu2 %1646 }
 0xca8   : > { %v1657_v39 = vadd.f32 %v1647_v10, %v3496_v15 }
 0xcaa   : > { %v1905_v27 = vpack.c.bf16 %v1657_v39, %v1657_v39 }
 0xcab   : > { %v1898_v18 = vpop.f32.mrf.mxu3 }
 0xcac   : > { %v3744_v9 = vadd.f32 %v2773_v41, %v1898_v18 }
 0xcae   : > { %v1641_v33 = vpop.permute.xlu0 %1640 }
 0xcaf   : > { %v1654_v1 = vadd.f32 %v1641_v33, %v3415_v63 }
 0xcb1   : > { %v1903_v13 = vpack.c.bf16 %v1654_v1, %v1653_v16 }
 0xcb3   : > { %v1900_v60 = vpop.f32.mrf.mxu3  ;;  %2726 = vmatmul.msk.bf16.vlgmr.msra.gmra.mxu1 %vm536_vm10, %v1903_v13 }
 0xcb4   : > { %v3746_v26 = vadd.f32 %v2773_v41, %v1900_v60 }
 0xcb6   : > { %v1941_v49 = vpack.c.bf16 %v3746_v26, %v3744_v9  ;;  %v1645_v63 = vpop.permute.xlu0 %1644 }
 0xcb7   : > { %v1656_v29 = vadd.f32 %v1645_v63, %v3491_v21 }
 0xcb8   : > { %v1943_v5 = vsel %vm1152_vm3, %v1941_v49, 0 }
 0xcb9   : > { %1952 = vmatpush.bf16.msra.mxu2 %v1943_v5  ;;  %v3751_v31 = vpop.f32.mrf.mxu1  ;;  %v1904_v7 = vpack.c.bf16 %v1656_v29, %v1655_v11 }
 0xcbc   : > { %2729 = vmatmul.msk.bf16.vlgmr.msra.gmra.mxu2 %vm1148_vm8, %v3434_v56  ;;  %v3771_v56 = vld [vmem:[%s4018_s3 + $0xe8] sm:$0x1f] }
 0xcc1   : > { %v1789_v61 = vpop.f32.mrf.mxu1 }
 0xcc3   : > { %2727 = vmatmul.msk.bf16.gmra.mxu1 %vm536_vm10, %v1904_v7 }
 0xccc   : > { %2730 = vmatmul.msk.bf16.gmra.mxu2 %vm1148_vm8, %v3441_v17  ;;  %v1908_v17 = vperm.slane %v3771_v56, 0 }
 0xcd3   : > { %2728 = vmatmul.msk.bf16.gmra.mxu1 %vm536_vm10, %v1905_v27 }
 0xcdc   : > { %2731 = vmatmul.msk.bf16.gmra.mxu2 %vm1148_vm8, %v3453_v55 }
 0xcec   : > { %2732 = vmatmul.msk.bf16.gmra.mxu2 %vm1148_vm8, %v3469_v40 }
 0xcfc   : > { %2733 = vmatmul.msk.bf16.gmra.mxu2 %vm1148_vm8, %v3483_v57 }
 0xd30   : > { %v1927_v2 = vpop.f32.mrf.mxu1 }
 0xd31   : > { %v1928_v21 = vadd.f32 %v1927_v2, %v1908_v17 }
 0xd38   : > { %v1929_v15 = vpop.f32.mrf.mxu1 }
 0xd39   : > { %v1930_v14 = vadd.f32 %v1929_v15, %v1908_v17 }
 0xd3f   : > { %v3774_v58 = vpop.f32.mrf.mxu2 }
 0xd40   : > { %v1932_v55 = vpop.f32.mrf.mxu1 }
 0xd41   : > { %v1933_v62 = vadd.f32 %v1932_v55, %v1908_v17 }
 0xd43   : > { %2021 = vrot.lane.b32.xlu0 %v1933_v62, %s2958_s28 }
 0xd47   : > { %v3777_v40 = vpop.f32.mrf.mxu2 }
 0xd48   : > { %v1934_v57 = vpop.f32.mrf.mxu1 }
 0xd49   : > { %v1935_v59 = vadd.f32 %v1934_v57, %v1908_v17 }
 0xd4b   : > { %2023 = vrot.lane.b32.xlu2 %v1935_v59, %s2958_s28 }
 0xd4f   : > { %v3780_v4 = vpop.f32.mrf.mxu2 }
 0xd50   : > { %v1937_v46 = vpop.f32.mrf.mxu1 }
 0xd51   : > { %v1938_v48 = vadd.f32 %v1937_v46, %v1908_v17 }
 0xd53   : > { %2025 = vrot.lane.b32.xlu2 %v1938_v48, %s2958_s28 }
 0xd57   : > { %v3783_v45 = vpop.f32.mrf.mxu2 }
 0xd58   : > { %v1939_v12 = vpop.f32.mrf.mxu1 }
 0xd5f   : > { %v3785_v42 = vpop.f32.mrf.mxu2 }
 0xd60   : > { %v1983_v38 = vrot.slane %v3785_v42, 4 }
 0xd67   : > { %v1966_v8 = vpop.f32.mrf.mxu2 }
 0xd68   : > { %v1984_v47 = vrot.slane %v1966_v8, 4 }
 0xd6a   : > { %v1985_v19 = vsel %vm239_vm0, %v1983_v38, %v1984_v47 }
 0xd6f   : > { %v1969_v50 = vpop.f32.mrf.mxu2 }
 0xd70   : > { %v1986_v54 = vrot.slane %v1969_v50, 4 }
 0xd72   : > { %v1987_v25 = vsel %vm239_vm0, %v1984_v47, %v1986_v54 }
 0xd73   : > { %1994 = vrot.lane.b32.xlu2 %v1987_v25, %s2957_s21 }
 0xd77   : > { %v1971_v43 = vpop.f32.mrf.mxu2 }
 0xd78   : > { %v1988_v36 = vrot.slane %v1971_v43, 4 }
 0xd7a   : > { %v1989_v30 = vsel %vm239_vm0, %v1986_v54, %v1988_v36 }
 0xd7b   : > { %1996 = vrot.lane.b32.xlu0 %v1989_v30, %s2957_s21 }
 0xd7f   : > { %v1974_v24 = vpop.f32.mrf.mxu2 }
 0xd80   : > { %v1990_v37 = vrot.slane %v1974_v24, 4  ;;  %v1791_v24 = vadd.f32 1e-06, %v3751_v31 }
 0xd82   : > { %v1991_v35 = vsel %vm239_vm0, %v1988_v36, %v1990_v37 }
 0xd83   : > { %1998 = vrot.lane.b32.xlu2 %v1991_v35, %s2957_s21  ;;  %2000 = vrot.lane.b32.xlu0 %v1990_v37, %s2957_s21 }
 0xd87   : > { %v1976_v6 = vpop.f32.mrf.mxu2 }
 0xd8b   : > { %2019 = vrot.lane.b32.xlu2 %v1930_v14, %s2958_s28  ;;  %1992 = vrot.lane.b32.xlu0 %v1985_v19, %s2957_s21 }
 0xd93   : > { %2017 = vrot.lane.b32.xlu0 %v1928_v21, %s2958_s28 }
 0xda5   : > { %v2024_v34 = vpop.permute.xlu2 %2023 }
 0xdad   : > { %v2026_v18 = vpop.permute.xlu2 %2025 }
 0xdb5   : > { %v2022_v16 = vpop.permute.xlu0 %2021 }
 0xdcd   : > { %v1995_v53 = vpop.permute.xlu2 %1994 }
 0xdce   : > { %v2008_v13 = vadd.f32 %v1995_v53, %v3777_v40 }
 0xddd   : > { %v1999_v33 = vpop.permute.xlu2 %1998 }
 0xdde   : > { %v2010_v51 = vadd.f32 %v1999_v33, %v3783_v45 }
 0xde0   : > { %v2035_v61 = vadd.f32 %v2024_v34, %v2010_v51  ;;  %v1822_v34 = vperm.slane %v3669_v22, 2 }
 0xde2   : > { %v2040_v2 = vmul.f32 0.5, %v2035_v61 }
 0xde5   : > { %v2020_v1 = vpop.permute.xlu2 %2019 }
 0xde6   : > { %v2033_v49 = vadd.f32 %v2020_v1, %v2008_v13 }
 0xde8   : > { %v2038_v29 = vmul.f32 0.5, %v2033_v49 }
 0xded   : > { %v1997_v41 = vpop.permute.xlu0 %1996 }
 0xdee   : > { %v2009_v60 = vadd.f32 %v1997_v41, %v3780_v4 }
 0xdf0   : > { %v2034_v5 = vadd.f32 %v2022_v16, %v2009_v60 }
 0xdf2   : > { %v2039_v63 = vmul.f32 0.5, %v2034_v5 }
 0xdf4   : > { %2902 = vtanh.f32 %v2039_v63 }
 0xdf5   : > { %v2001_v11 = vpop.permute.xlu0 %2000  ;;  %2904 = vtanh.f32 %v2038_v29 }
 0xdf6   : > { %v2011_v7 = vadd.f32 %v2001_v11, %v3785_v42 }
 0xdf8   : > { %v2036_v10 = vadd.f32 %v2026_v18, %v2011_v7  ;;  %v1816_v18 = vperm.slane %v3669_v22, 1 }
 0xdfa   : > { %v2903_v39 = vpop.eup %2902  ;;  %v2041_v27 = vmul.f32 0.5, %v2036_v10 }
 0xdfb   : > { %v2049_v17 = vmul.f32 0.5, %v2903_v39  ;;  %v2905_v14 = vpop.eup %2904 }
 0xdfc   : > { %2906 = vtanh.f32 %v2041_v27  ;;  %v2048_v55 = vmul.f32 0.5, %v2905_v14 }
 0xdfd   : > { %v1993_v21 = vpop.permute.xlu0 %1992  ;;  %v2054_v15 = vadd.f32 0.5, %v2049_v17  ;;  %2908 = vtanh.f32 %v2040_v2 }
 0xdfe   : > { %v2007_v59 = vadd.f32 %v1993_v21, %v3774_v58  ;;  %v2053_v46 = vadd.f32 0.5, %v2048_v55 }
 0xdff   : > { %2066 = vrot.lane.b32.xlu2 %v2054_v15, %s2957_s21 }
 0xe02   : > { %v2907_v62 = vpop.eup %2906 }
 0xe03   : > { %v2051_v57 = vmul.f32 0.5, %v2907_v62  ;;  %v2909_v8 = vpop.eup %2908 }
 0xe04   : > { %v2050_v54 = vmul.f32 0.5, %v2909_v8 }
 0xe05   : > { %v2018_v48 = vpop.permute.xlu0 %2017  ;;  %v2056_v12 = vadd.f32 0.5, %v2051_v57 }
 0xe06   : > { %v2032_v50 = vadd.f32 %v2018_v48, %v2007_v59  ;;  %v2055_v25 = vadd.f32 0.5, %v2050_v54 }
 0xe07   : > { %2064 = vrot.lane.b32.xlu2 %v2053_v46, %s2957_s21  ;;  %2070 = vrot.lane.b32.xlu0 %v2056_v12, %s2957_s21 }
 0xe08   : > { %v2037_v47 = vmul.f32 0.5, %v2032_v50 }
 0xe0a   : > { %2910 = vtanh.f32 %v2037_v47 }
 0xe0f   : > { %2068 = vrot.lane.b32.xlu0 %v2055_v25, %s2957_s21  ;;  %1818 = vrot.lane.b32.xlu2 %v1816_v18, %s2957_s21 }
 0xe10   : > { %v2911_v43 = vpop.eup %2910 }
 0xe11   : > { %v2047_v36 = vmul.f32 0.5, %v2911_v43  ;;  %v2194_v43 = vld [vmem:[%s4017_s2 + $0x9c] sm:$0xff] }
 0xe13   : > { %v2052_v30 = vadd.f32 0.5, %v2047_v36 }
 0xe15   : > { %2062 = vrot.lane.b32.xlu1 %v2052_v30, %s2957_s21 }
 0xe17   : > { %1793 = vrot.lane.b32.xlu0 %v1791_v24, %s2957_s21 }
 0xe1f   : > { %1824 = vrot.lane.b32.xlu0 %v1822_v34, %s2957_s21 }
 0xe59   : > { %v2067_v37 = vpop.permute.xlu2 %2066 }
 0xe5a   : > { %v2079_v33 = vmul.f32 %v2067_v37, %v3780_v4  ;;  %v2191_v37 = vld [vmem:[%s4017_s2 + $0x84] sm:$0xff] }
 0xe5c   : > { %v2084_v41 = vsel %vm536_vm10, %v2079_v33, %v2054_v15 }
 0xe79   : > { %v2071_v35 = vpop.permute.xlu0 %2070 }
 0xe7a   : > { %v2081_v6 = vmul.f32 %v2071_v35, %v3785_v42  ;;  %v2065_v42 = vpop.permute.xlu2 %2064  ;;  %v2192_v35 = vld [vmem:[%s4017_s2 + $0x8c] sm:$0xff] }
 0xe7b   : > { %v2078_v22 = vmul.f32 %v2065_v42, %v3777_v40 }
 0xe7c   : > { %v2086_v38 = vsel %vm536_vm10, %v2081_v6, %v2056_v12 }
 0xe7d   : > { %v2089_v19 = vpack.c.bf16 %v2086_v38, %v2086_v38  ;;  %v2083_v51 = vsel %vm536_vm10, %v2078_v22, %v2053_v46  ;;  %v2202_v38 = vpack.c.bf16 %v2192_v35, %v2191_v37 }
 0xe7f   : > { %v2091_v53 = vsel %vm1082_vm4, %v2089_v19, 0 }
 0xe80   : > { %2098 = vmatpush.bf16.msrb.mxu3 %v2091_v53 }
 0xe81   : > { %v2069_v16 = vpop.permute.xlu0 %2068 }
 0xe82   : > { %v2080_v1 = vmul.f32 %v2069_v16, %v3783_v45  ;;  %v1819_v15 = vpop.permute.xlu2 %1818 }
 0xe84   : > { %v2085_v13 = vsel %vm536_vm10, %v2080_v1, %v2055_v25  ;;  %v2193_v25 = vld [vmem:[%s4017_s2 + $0x94] sm:$0xff] }
 0xe85   : > { %v2088_v60 = vpack.c.bf16 %v2085_v13, %v2084_v41  ;;  %v2203_v36 = vpack.c.bf16 %v2194_v43, %v2193_v25  ;;  %v2164_v41 = vperm.slane %v3771_v56, 2 }
 0xe87   : > { %v2063_v49 = vpop.permute.xlu1 %2062  ;;  %2099 = vmatpush.bf16.msrb.mxu3 %v2088_v60 }
 0xe88   : > { %v2077_v5 = vmul.f32 %v2063_v49, %v3774_v58 }
 0xe89   : > { %v1794_v63 = vpop.permute.xlu0 %1793 }
 0xe8a   : > { %2912 = vrcp.f32 %v1794_v63  ;;  %v2082_v4 = vsel %vm536_vm10, %v2077_v5, %v2052_v30  ;;  %v1807_v61 = vand.u32 2147483648, %v1794_v63  ;;  %v1805_v10 = vand.u32 2147483647, %v1794_v63 }
 0xe8b   : > { %v2087_v29 = vpack.c.bf16 %v2083_v51, %v2082_v4  ;;  %vm1801_vm13 = vweird.f32 %v1794_v63 }
 0xe8c   : > { %v1808_v39 = vor.u32 1.1754944e-38, %v1807_v61  ;;  %vm1806_vm14 = vcmp.eq.f32.partialorder %v1805_v10, 8.507059e+37 }
 0xe8d   : > { %2100 = vmatpush.bf16.msrb.mxu3 %v2087_v29 }
 0xe90   : > { %v2913_v45 = vpop.eup %2912  ;;  %2734 = vmatmul.msk.bf16.vlgmr.msrb.gmra.mxu3 %vm1483_vm11, %v3589_v0 }
 0xe91   : > { %v1797_v11 = vmul.f32 %v2913_v45, %v1794_v63  ;;  %vm1802_vm12 = vweird.f32 %v2913_v45  ;;  %v1825_v14 = vpop.permute.xlu0 %1824  ;;  %2214 = vmatpush.bf16.msra.mxu3 %v2203_v36 }
 0xe92   : > { %vm1803_vm5 = vmor %vm1801_vm13, %vm1802_vm12 }
 0xe93   : > { %v1798_v7 = vsub.f32 1.0, %v1797_v11 }
 0xe95   : > { %v1799_v40 = vmul.f32 %v2913_v45, %v1798_v7  ;;  %2215 = vmatpush.bf16.msra.mxu3 %v2202_v38 }
 0xe97   : > { %v1800_v58 = vadd.f32 %v2913_v45, %v1799_v40 }
 0xe99   : > { %v1804_v27 = vsel %vm1803_vm5, %v2913_v45, %v1800_v58 }
 0xe9a   : > { %v1809_v17 = vsel %vm1806_vm14, %v1808_v39, %v1804_v27 }
 0xe9b   : > { %v1810_v2 = vmul.f32 %v1809_v17, %v3751_v31 }
 0xe9d   : > { %1812 = vrot.lane.b32.xlu1 %v1810_v2, %s2957_s21 }
 0xf0f   : > { %v1813_v21 = vpop.permute.xlu1 %1812 }
 0xf10   : > { %v1815_v0 = vadd.f32 %v1813_v21, %v3624_v20  ;;  %v2157_v20 = vperm.slane %v3771_v56, 1 }
 0xf12   : > { %v1821_v55 = vmul.f32 %v1819_v15, %v1815_v0 }
 0xf13   : > { %v2102_v62 = vpop.f32.mrf.mxu3 }
 0xf14   : > { %v2107_v57 = vadd.f32 1e-06, %v2102_v62  ;;  %v1827_v59 = vadd.f32 %v1825_v14, %v1821_v55 }
 0xf16   : > { %v1828_v46 = vmul.f32 0.5, %v1827_v59  ;;  %2111 = vrot.lane.b32.xlu2 %v2107_v57, %s2957_s21 }
 0xf18   : > { %2914 = vtanh.f32 %v1828_v46 }
 0xf1b   : > { %v2104_v48 = vpop.f32.mrf.mxu3 }
 0xf1c   : > { %v2108_v12 = vadd.f32 1e-06, %v2104_v48 }
 0xf1e   : > { %v2915_v8 = vpop.eup %2914  ;;  %2113 = vrot.lane.b32.xlu0 %v2108_v12, %s2957_s21 }
 0xf1f   : > { %v1830_v31 = vmul.f32 0.5, %v2915_v8 }
 0xf21   : > { %v1831_v50 = vadd.f32 0.5, %v1830_v31  ;;  %v2199_v31 = vld [vmem:[%s4018_s3 + $0x105] sm:$0xff] }
 0xf23   : > { %v1832_v47 = vmul.f32 %v1831_v50, %v1827_v59 }
 0xf25   : > { %1834 = vrot.lane.b32.xlu1 %v1832_v47, %s2958_s28  ;;  %v2774_v47 = vld [vmem:[%s4017_s2 + $0xa4] ss:$0 sm:$0xff] }
 0xf26   : > { %2159 = vrot.lane.b32.xlu0 %v2157_v20, %s2957_s21 }
 0xf70   : > { %v2112_v54 = vpop.permute.xlu2 %2111 }
 0xf71   : > { %2916 = vrcp.f32 %v2112_v54  ;;  %v2128_v19 = vand.u32 2147483648, %v2112_v54  ;;  %v2126_v18 = vand.u32 2147483647, %v2112_v54  ;;  %vm2122_vm15 = vweird.f32 %v2112_v54 }
 0xf73   : > { %v2129_v33 = vor.u32 1.1754944e-38, %v2128_v19  ;;  %vm2127_vm7 = vcmp.eq.f32.partialorder %v2126_v18, 8.507059e+37 }
 0xf77   : > { %v2917_v30 = vpop.eup %2916 }
 0xf78   : > { %v2118_v24 = vmul.f32 %v2917_v30, %v2112_v54  ;;  %vm2123_vm11 = vweird.f32 %v2917_v30 }
 0xf79   : > { %vm2124_vm1 = vmor %vm2122_vm15, %vm2123_vm11 }
 0xf7a   : > { %v2119_v6 = vsub.f32 1.0, %v2118_v24  ;;  %v2197_v24 = vld [vmem:[%s4018_s3 + $0xf5] sm:$0xff] }
 0xf7c   : > { %v2120_v34 = vmul.f32 %v2917_v30, %v2119_v6 }
 0xf7e   : > { %v2121_v53 = vadd.f32 %v2917_v30, %v2120_v34 }
 0xf80   : > { %v2125_v16 = vsel %vm2124_vm1, %v2917_v30, %v2121_v53  ;;  %v2196_v30 = vld [vmem:[%s4018_s3 + $0xed] sm:$0xff] }
 0xf81   : > { %v2130_v1 = vsel %vm2127_vm7, %v2129_v33, %v2125_v16  ;;  %v2222_v37 = vpack.c.bf16 %v2197_v24, %v2196_v30 }
 0xf82   : > { %v2131_v42 = vmul.f32 %v2130_v1, %v2102_v62 }
 0xf84   : > { %2149 = vrot.lane.b32.xlu1 %v2131_v42, %s2957_s21 }
 0xf8c   : > { %2166 = vrot.lane.b32.xlu1 %v2164_v41, %s2957_s21 }
 0xf90   : > { %v2114_v13 = vpop.permute.xlu0 %2113 }
 0xf91   : > { %2918 = vrcp.f32 %v2114_v13  ;;  %v2143_v51 = vand.u32 2147483648, %v2114_v13  ;;  %v2141_v45 = vand.u32 2147483647, %v2114_v13  ;;  %vm2137_vm12 = vweird.f32 %v2114_v13 }
 0xf93   : > { %v2144_v11 = vor.u32 1.1754944e-38, %v2143_v51  ;;  %vm2142_vm5 = vcmp.eq.f32.partialorder %v2141_v45, 8.507059e+37 }
 0xf97   : > { %v2919_v60 = vpop.eup %2918  ;;  %v1835_v22 = vpop.permute.xlu1 %1834 }
 0xf98   : > { %v2133_v49 = vmul.f32 %v2919_v60, %v2114_v13  ;;  %v3852_v5 = vadd.f32 %v1835_v22, %v3610_v44  ;;  %vm2138_vm9 = vweird.f32 %v2919_v60  ;;  %v2160_v58 = vpop.permute.xlu0 %2159 }
 0xf99   : > { %vm2139_vm13 = vmor %vm2137_vm12, %vm2138_vm9 }
 0xf9a   : > { %v2134_v63 = vsub.f32 1.0, %v2133_v49  ;;  %v2201_v4 = vpack.c.bf16 %v3852_v5, %v3852_v5 }
 0xf9c   : > { %v2135_v29 = vmul.f32 %v2919_v60, %v2134_v63  ;;  %2735 = vmatmul.msk.bf16.vlgmr.msra.gmra.mxu3 %vm536_vm10, %v2201_v4 }
 0xf9e   : > { %v2136_v56 = vadd.f32 %v2919_v60, %v2135_v29 }
 0xfa0   : > { %v2140_v7 = vsel %vm2139_vm13, %v2919_v60, %v2136_v56 }
 0xfa1   : > { %v2145_v61 = vsel %vm2142_vm5, %v2144_v11, %v2140_v7 }
 0xfa2   : > { %v2146_v40 = vmul.f32 %v2145_v61, %v2104_v48 }
 0xfa4   : > { %2151 = vrot.lane.b32.xlu2 %v2146_v40, %s2957_s21 }
 0xff6   : > { %v2150_v44 = vpop.permute.xlu1 %2149 }
 0xff7   : > { %v2155_v10 = vadd.f32 %v2150_v44, %v3744_v9 }
 0xff9   : > { %v2162_v39 = vmul.f32 %v2160_v58, %v2155_v10 }
 0xffe   : > { %v2167_v27 = vpop.permute.xlu1 %2166  ;;  %v2152_v17 = vpop.permute.xlu2 %2151 }
 0xfff   : > { %v2169_v2 = vadd.f32 %v2167_v27, %v2162_v39  ;;  %v2156_v21 = vadd.f32 %v2152_v17, %v3746_v26  ;;  %v2198_v26 = vld [vmem:[%s4018_s3 + $0xfd] sm:$0xff] }
0x1000   : > { %v2223_v50 = vpack.c.bf16 %v2199_v31, %v2198_v26 }
0x1001   : > { %v2171_v15 = vmul.f32 0.5, %v2169_v2  ;;  %v2163_v0 = vmul.f32 %v2160_v58, %v2156_v21 }
0x1002   : > { %2234 = vmatpush.bf16.msrb.mxu0 %v2223_v50 }
0x1003   : > { %2920 = vtanh.f32 %v2171_v15  ;;  %v2170_v14 = vadd.f32 %v2167_v27, %v2163_v0 }
0x1005   : > { %v2172_v55 = vmul.f32 0.5, %v2170_v14 }
0x1006   : > { %2235 = vmatpush.bf16.msrb.mxu0 %v2222_v37 }
0x1007   : > { %2922 = vtanh.f32 %v2172_v55 }
0x1009   : > { %v2921_v62 = vpop.eup %2920 }
0x100a   : > { %v2175_v57 = vmul.f32 0.5, %v2921_v62 }
0x100c   : > { %v2177_v59 = vadd.f32 0.5, %v2175_v57 }
0x100d   : > { %v2923_v46 = vpop.eup %2922 }
0x100e   : > { %v2179_v48 = vmul.f32 %v2177_v59, %v2169_v2  ;;  %v2176_v12 = vmul.f32 0.5, %v2923_v46 }
0x1010   : > { %2183 = vrot.lane.b32.xlu2 %v2179_v48, %s2958_s28  ;;  %v2178_v9 = vadd.f32 0.5, %v2176_v12 }
0x1012   : > { %v2180_v8 = vmul.f32 %v2178_v9, %v2170_v14 }
0x1014   : > { %2185 = vrot.lane.b32.xlu0 %v2180_v8, %s2958_s28 }
0x101f   : > { %v2217_v20 = vpop.f32.mrf.mxu3 }
0x1020   : > { %v3871_v54 = vadd.f32 %v2774_v47, %v2217_v20 }
0x1022   : > { %v2242_v25 = vpack.c.bf16 %v3871_v54, %v3871_v54 }
0x1024   : > { %v2244_v43 = vsel %vm1082_vm4, %v2242_v25, 0 }
0x1025   : > { %2253 = vmatpush.bf16.msrb.mxu3 %v2244_v43 }
0x1027   : > { %v2219_v36 = vpop.f32.mrf.mxu3 }
0x1028   : > { %2737 = vmatmul.msk.bf16.vlgmr.msrb.gmra.mxu3 %vm1075_vm6, %v3152_v28 }
0x1038   : > { %2738 = vmatmul.msk.bf16.gmra.mxu3 %vm1075_vm6, %v3172_v3 }
0x106a   : > { %v2184_v35 = vpop.permute.xlu2 %2183 }
0x106b   : > { %v3887_v38 = vadd.f32 %v2184_v35, %v3701_v32 }
0x1086   : > { %v2186_v6 = vpop.permute.xlu0 %2185 }
0x1087   : > { %v3890_v19 = vadd.f32 %v2186_v6, %v3704_v23  ;;  %v2200_v23 = vld [vmem:[%s4018_s3 + $0x10d] sm:$0x1f] }
0x1088   : > { %v2224_v41 = vperm.slane %v2200_v23, 0  ;;  %v2349_v2 = vperm.slane %v2200_v23, 1  ;;  %v2371_v21 = vperm.slane %v2200_v23, 3  ;;  %v2355_v9 = vperm.slane %v2200_v23, 2 }
0x1089   : > { %v2221_v34 = vpack.c.bf16 %v3890_v19, %v3887_v38  ;;  %v2378_v26 = vperm.slane %v2200_v23, 4 }
0x108b   : > { %2736 = vmatmul.msk.bf16.vlgmr.msrb.gmra.mxu0 %vm536_vm10, %v2221_v34 }
0x10ab   : > { %v2255_v18 = vpop.f32.mrf.mxu3 }
0x10b3   : > { %v2257_v53 = vpop.f32.mrf.mxu3 }
0x10b4   : > { %v2266_v33 = vrot.slane %v2257_v53, 4 }
0x10bb   : > { %v2260_v16 = vpop.f32.mrf.mxu3 }
0x10bc   : > { %v2267_v1 = vrot.slane %v2260_v16, 4 }
0x10be   : > { %2271 = vrot.lane.b32.xlu2 %v2267_v1, %s2957_s21  ;;  %v2268_v42 = vsel %vm239_vm0, %v2266_v33, %v2267_v1 }
0x10bf   : > { %2269 = vrot.lane.b32.xlu1 %v2268_v42, %s2957_s21 }
0x10c3   : > { %v2262_v32 = vpop.f32.mrf.mxu3 }
0x1108   : > { %v2237_v13 = vpop.f32.mrf.mxu0 }
0x1109   : > { %v2238_v60 = vadd.f32 %v2237_v13, %v2224_v41 }
0x110b   : > { %2279 = vrot.lane.b32.xlu0 %v2238_v60, %s2958_s28 }
0x1110   : > { %v2239_v22 = vpop.f32.mrf.mxu0 }
0x1111   : > { %v2240_v49 = vadd.f32 %v2239_v22, %v2224_v41 }
0x1113   : > { %2281 = vrot.lane.b32.xlu1 %v2240_v49, %s2958_s28 }
0x1118   : > { %v2272_v56 = vpop.permute.xlu2 %2271 }
0x1119   : > { %v2276_v11 = vadd.f32 %v2272_v56, %v2257_v53 }
0x1131   : > { %v2270_v63 = vpop.permute.xlu1 %2269 }
0x1132   : > { %v2275_v4 = vadd.f32 %v2270_v63, %v2255_v18 }
0x117d   : > { %v2280_v51 = vpop.permute.xlu0 %2279 }
0x117e   : > { %v3903_v29 = vadd.f32 %v2280_v51, %v2275_v4 }
0x1180   : > { %v2287_v45 = vmul.f32 0.5, %v3903_v29 }
0x1182   : > { %2924 = vtanh.f32 %v2287_v45 }
0x1185   : > { %v2282_v7 = vpop.permute.xlu1 %2281 }
0x1186   : > { %v2286_v61 = vadd.f32 %v2282_v7, %v2276_v11  ;;  %v2407_v11 = vld [vmem:[%s4017_s2 + $0xb5] sm:$0xff]  ;;  %v2408_v7 = vld [vmem:[%s4017_s2 + $0xbd] sm:$0xff] }
0x1188   : > { %v2925_v40 = vpop.eup %2924  ;;  %v2288_v44 = vmul.f32 0.5, %v2286_v61 }
0x1189   : > { %v2291_v10 = vmul.f32 0.5, %v2925_v40 }
0x118a   : > { %2926 = vtanh.f32 %v2288_v44 }
0x118b   : > { %v2293_v58 = vadd.f32 0.5, %v2291_v10 }
0x118d   : > { %2297 = vrot.lane.b32.xlu2 %v2293_v58, %s2957_s21 }
0x1190   : > { %v2927_v39 = vpop.eup %2926 }
0x1191   : > { %v2292_v27 = vmul.f32 0.5, %v2927_v39 }
0x1193   : > { %v2294_v17 = vadd.f32 0.5, %v2292_v27 }
0x1195   : > { %2299 = vrot.lane.b32.xlu0 %v2294_v17, %s2957_s21 }
0x119d   : > { %2351 = vrot.lane.b32.xlu0 %v2349_v2, %s2957_s21  ;;  %v2406_v2 = vld [vmem:[%s4017_s2 + $0xad] sm:$0xff] }
0x11a5   : > { %2373 = vrot.lane.b32.xlu0 %v2371_v21, %s2958_s28 }
0x11e7   : > { %v2298_v15 = vpop.permute.xlu2 %2297 }
0x11e8   : > { %v2303_v0 = vmul.f32 %v2298_v15, %v2255_v18  ;;  %v2412_v15 = vld [vmem:[%s4018_s3 + $0x122] sm:$0xff] }
0x11ea   : > { %v2305_v62 = vsel %vm536_vm10, %v2303_v0, %v2293_v58  ;;  %v2413_v0 = vld [vmem:[%s4018_s3 + $0x12a] sm:$0xff] }
0x1207   : > { %v2300_v14 = vpop.permute.xlu0 %2299 }
0x1208   : > { %v2304_v55 = vmul.f32 %v2300_v14, %v2257_v53  ;;  %v2437_v14 = vpack.c.bf16 %v2413_v0, %v2412_v15 }
0x120a   : > { %v2306_v57 = vsel %vm536_vm10, %v2304_v55, %v2294_v17  ;;  %v2405_v17 = vld [vmem:[%s4017_s2 + $0xa5] sm:$0xff]  ;;  %v2410_v55 = vld [vmem:[%s4018_s3 + $0x112] sm:$0xff] }
0x120b   : > { %v2307_v59 = vpack.c.bf16 %v2306_v57, %v2305_v62  ;;  %v2416_v21 = vpack.c.bf16 %v2406_v2, %v2405_v17  ;;  %v2411_v62 = vld [vmem:[%s4018_s3 + $0x11a] sm:$0xff] }
0x120c   : > { %v2436_v57 = vpack.c.bf16 %v2411_v62, %v2410_v55 }
0x120d   : > { %v2309_v46 = vsel %vm1152_vm3, %v2307_v59, 0 }
0x120e   : > { %2318 = vmatpush.bf16.msra.mxu0 %v2309_v46 }
0x120f   : > { %v2352_v50 = vpop.permute.xlu0 %2351 }
0x1211   : > { %2739 = vmatmul.msk.bf16.vlgmr.msra.gmra.mxu0 %vm1148_vm8, %v3360_v52 }
0x1212   : > { %2448 = vmatpush.bf16.msrb.mxu0 %v2437_v14 }
0x1216   : > { %2449 = vmatpush.bf16.msrb.mxu0 %v2436_v57 }
0x1217   : > { %v2374_v30 = vpop.permute.xlu0 %2373 }
0x1218   : > { %v2377_v6 = vmul.f32 %v2374_v30, %v2286_v61  ;;  %v2376_v22 = vmul.f32 %v2374_v30, %v3903_v29  ;;  %v2417_v61 = vpack.c.bf16 %v2408_v7, %v2407_v11 }
0x121a   : > { %2428 = vmatpush.bf16.msrb.mxu1 %v2417_v61 }
0x121e   : > { %2429 = vmatpush.bf16.msrb.mxu1 %v2416_v21 }
0x128e   : > { %v2320_v48 = vpop.f32.mrf.mxu0 }
0x128f   : > { %v2324_v12 = vadd.f32 1e-06, %v2320_v48 }
0x1291   : > { %2326 = vrot.lane.b32.xlu1 %v2324_v12, %s2957_s21 }
0x1296   : > { %v2322_v8 = vpop.f32.mrf.mxu0 }
0x1299   : > { %2357 = vrot.lane.b32.xlu1 %v2355_v9, %s2957_s21 }
0x12a1   : > { %2380 = vrot.lane.b32.xlu1 %v2378_v26, %s2958_s28 }
0x1303   : > { %v2327_v31 = vpop.permute.xlu1 %2326 }
0x1304   : > { %2928 = vrcp.f32 %v2327_v31  ;;  %v2340_v36 = vand.u32 2147483648, %v2327_v31  ;;  %v2338_v37 = vand.u32 2147483647, %v2327_v31  ;;  %vm2334_vm11 = vweird.f32 %v2327_v31 }
0x1306   : > { %v2341_v34 = vor.u32 1.1754944e-38, %v2340_v36  ;;  %vm2339_vm1 = vcmp.eq.f32.partialorder %v2338_v37, 8.507059e+37 }
0x130a   : > { %v2929_v47 = vpop.eup %2928 }
0x130b   : > { %v2330_v20 = vmul.f32 %v2929_v47, %v2327_v31  ;;  %v2358_v25 = vpop.permute.xlu1 %2357  ;;  %vm2335_vm14 = vweird.f32 %v2929_v47 }
0x130c   : > { %vm2336_vm15 = vmor %vm2334_vm11, %vm2335_vm14 }
0x130d   : > { %v2331_v43 = vsub.f32 1.0, %v2330_v20  ;;  %v2414_v20 = vld [vmem:[%s4018_s3 + $0x132] sm:$0x1f] }
0x130e   : > { %v2569_v17 = vperm.slane %v2414_v20, 2 }
0x130f   : > { %v2332_v24 = vmul.f32 %v2929_v47, %v2331_v43 }
0x1311   : > { %v2333_v35 = vadd.f32 %v2929_v47, %v2332_v24 }
0x1313   : > { %v2381_v18 = vpop.permute.xlu1 %2380  ;;  %v2337_v53 = vsel %vm2336_vm15, %v2929_v47, %v2333_v35 }
0x1314   : > { %v2384_v33 = vadd.f32 %v2381_v18, %v2377_v6  ;;  %v2342_v16 = vsel %vm2339_vm1, %v2341_v34, %v2337_v53  ;;  %v2383_v63 = vadd.f32 %v2381_v18, %v2376_v22 }
0x1315   : > { %v2343_v1 = vmul.f32 %v2342_v16, %v2320_v48 }
0x1316   : > { %v2386_v42 = vmul.f32 0.5, %v2384_v33  ;;  %v2385_v45 = vmul.f32 0.5, %v2383_v63 }
0x1317   : > { %2345 = vrot.lane.b32.xlu2 %v2343_v1, %s2957_s21 }
0x1318   : > { %2930 = vtanh.f32 %v2386_v42 }
0x131e   : > { %v2931_v32 = vpop.eup %2930 }
0x131f   : > { %v2390_v23 = vmul.f32 0.5, %v2931_v32 }
0x1321   : > { %v2392_v41 = vadd.f32 0.5, %v2390_v23 }
0x1323   : > { %v2394_v13 = vmul.f32 %v2392_v41, %v2384_v33 }
0x1325   : > { %2399 = vrot.lane.b32.xlu0 %v2394_v13, %s2957_s21 }
0x1371   : > { %v2346_v60 = vpop.permute.xlu2 %2345 }
0x1372   : > { %v2348_v49 = vadd.f32 %v2346_v60, %v3871_v54 }
0x1374   : > { %v2354_v4 = vmul.f32 %v2352_v50, %v2348_v49  ;;  %v2775_v50 = vld [vmem:[%s4017_s2 + $0xc5] ss:$0 sm:$0xff] }
0x1376   : > { %v2360_v51 = vadd.f32 %v2358_v25, %v2354_v4 }
0x1378   : > { %v2361_v56 = vmul.f32 0.5, %v2360_v51 }
0x137a   : > { %2932 = vtanh.f32 %v2361_v56 }
0x137b   : > { %2934 = vtanh.f32 %v2385_v45 }
0x1380   : > { %v2933_v29 = vpop.eup %2932 }
0x1381   : > { %v2363_v40 = vmul.f32 0.5, %v2933_v29  ;;  %v2935_v54 = vpop.eup %2934 }
0x1382   : > { %v2389_v10 = vmul.f32 0.5, %v2935_v54 }
0x1383   : > { %v2364_v44 = vadd.f32 0.5, %v2363_v40 }
0x1384   : > { %v2391_v39 = vadd.f32 0.5, %v2389_v10 }
0x1385   : > { %v2365_v58 = vmul.f32 %v2364_v44, %v2360_v51 }
0x1386   : > { %v2393_v27 = vmul.f32 %v2391_v39, %v2383_v63 }
0x1387   : > { %2367 = vrot.lane.b32.xlu2 %v2365_v58, %s2958_s28  ;;  %v2563_v58 = vperm.slane %v2414_v20, 1 }
0x138f   : > { %2397 = vrot.lane.b32.xlu2 %v2393_v27, %s2957_s21 }
0x1397   : > { %v2400_v12 = vpop.permute.xlu0 %2399 }
0x1398   : > { %v2404_v8 = vadd.f32 %v2400_v12, %v3890_v19 }
0x13e1   : > { %v2368_v59 = vpop.permute.xlu2 %2367 }
0x13e2   : > { %v3949_v46 = vadd.f32 %v2368_v59, %v3852_v5 }
0x13e4   : > { %v2415_v48 = vpack.c.bf16 %v3949_v46, %v3949_v46 }
0x13e6   : > { %2740 = vmatmul.msk.bf16.vlgmr.msrb.gmra.mxu1 %vm536_vm10, %v2415_v48 }
0x13e9   : > { %v2398_v9 = vpop.permute.xlu2 %2397 }
0x13ea   : > { %v2403_v26 = vadd.f32 %v2398_v9, %v3887_v38  ;;  %v2438_v38 = vperm.slane %v2414_v20, 0 }
0x13ec   : > { %v2435_v31 = vpack.c.bf16 %v2404_v8, %v2403_v26 }
0x13ee   : > { %2741 = vmatmul.msk.bf16.vlgmr.msrb.gmra.mxu0 %vm536_vm10, %v2435_v31 }
0x1463   : > { %v2431_v5 = vpop.f32.mrf.mxu1 }
0x1464   : > { %v3960_v47 = vadd.f32 %v2775_v50, %v2431_v5 }
0x1466   : > { %v2456_v25 = vpack.c.bf16 %v3960_v47, %v3960_v47 }
0x1468   : > { %v2458_v19 = vsel %vm1082_vm4, %v2456_v25, 0 }
0x1469   : > { %2467 = vmatpush.bf16.msra.mxu1 %v2458_v19 }
0x146b   : > { %v2433_v43 = vpop.f32.mrf.mxu1  ;;  %v2451_v36 = vpop.f32.mrf.mxu0 }
0x146c   : > { %v2452_v30 = vadd.f32 %v2451_v36, %v2438_v38  ;;  %2742 = vmatmul.msk.bf16.vlgmr.msra.gmra.mxu1 %vm1075_vm6, %v3152_v28 }
0x146e   : > { %2493 = vrot.lane.b32.xlu0 %v2452_v30, %s2958_s28  ;;  %v2603_v30 = vld [vmem:[%s4018_s3 + $0x14f] sm:$0xff] }
0x146f   : > { %2620 = vmatpush.msra.mxu0 %v2603_v30 }
0x1473   : > { %v2453_v53 = vpop.f32.mrf.mxu0 }
0x1474   : > { %v2454_v16 = vadd.f32 %v2453_v53, %v2438_v38 }
0x147c   : > { %2743 = vmatmul.msk.bf16.gmra.mxu1 %vm1075_vm6, %v3172_v3 }
0x14e0   : > { %v2494_v42 = vpop.permute.xlu0 %2493 }
0x14e9   : > { %v2469_v24 = vpop.f32.mrf.mxu1 }
0x14f1   : > { %v2471_v37 = vpop.f32.mrf.mxu1 }
0x14f2   : > { %v2480_v6 = vrot.slane %v2471_v37, 4 }
0x14f9   : > { %v2474_v35 = vpop.f32.mrf.mxu1 }
0x14fa   : > { %v2481_v34 = vrot.slane %v2474_v35, 4  ;;  %v2959_v35 = vmov 4.0  }
0x14fc   : > { %2485 = vrot.lane.b32.xlu2 %v2481_v34, %s2957_s21  ;;  %v2482_v18 = vsel %vm239_vm0, %v2480_v6, %v2481_v34 }
0x14fd   : > { %2483 = vrot.lane.b32.xlu1 %v2482_v18, %s2957_s21 }
0x1501   : > { %v2476_v33 = vpop.f32.mrf.mxu1 }
0x1505   : > { %2495 = vrot.lane.b32.xlu1 %v2454_v16, %s2958_s28 }
0x1556   : > { %v2486_v32 = vpop.permute.xlu2 %2485 }
0x1557   : > { %v2490_v41 = vadd.f32 %v2486_v32, %v2471_v37 }
0x156f   : > { %v2484_v28 = vpop.permute.xlu1 %2483 }
0x1570   : > { %v2489_v1 = vadd.f32 %v2484_v28, %v2469_v24 }
0x1572   : > { %v2499_v3 = vadd.f32 %v2494_v42, %v2489_v1 }
0x1574   : > { %v2501_v23 = vmul.f32 0.5, %v2499_v3 }
0x1576   : > { %2936 = vtanh.f32 %v2501_v23 }
0x1577   : > { %v2496_v13 = vpop.permute.xlu1 %2495 }
0x1578   : > { %v2500_v60 = vadd.f32 %v2496_v13, %v2490_v41 }
0x157a   : > { %v2502_v22 = vmul.f32 0.5, %v2500_v60 }
0x157c   : > { %v2937_v49 = vpop.eup %2936  ;;  %2938 = vtanh.f32 %v2502_v22 }
0x157d   : > { %v2505_v63 = vmul.f32 0.5, %v2937_v49  ;;  %v2604_v49 = vld [vmem:[%s4018_s3 + $0x157] sm:$0x1] }
0x157f   : > { %v2507_v4 = vadd.f32 0.5, %v2505_v63 }
0x1581   : > { %2511 = vrot.lane.b32.xlu2 %v2507_v4, %s2957_s21 }
0x1582   : > { %v2939_v51 = vpop.eup %2938 }
0x1583   : > { %v2506_v45 = vmul.f32 0.5, %v2939_v51 }
0x1585   : > { %v2508_v56 = vadd.f32 0.5, %v2506_v45 }
0x1587   : > { %2513 = vrot.lane.b32.xlu0 %v2508_v56, %s2957_s21 }
0x158f   : > { %2565 = vrot.lane.b32.xlu0 %v2563_v58, %s2957_s21 }
0x15db   : > { %v2512_v11 = vpop.permute.xlu2 %2511 }
0x15dc   : > { %v2517_v7 = vmul.f32 %v2512_v11, %v2469_v24  ;;  %v2601_v24 = vld [vmem:[%s4018_s3 + $0x13f] sm:$0xff] }
0x15de   : > { %v2519_v40 = vsel %vm536_vm10, %v2517_v7, %v2507_v4 }
0x15f9   : > { %v2514_v61 = vpop.permute.xlu0 %2513 }
0x15fa   : > { %v2518_v29 = vmul.f32 %v2514_v61, %v2471_v37  ;;  %v2600_v37 = vld [vmem:[%s4018_s3 + $0x137] sm:$0xff] }
0x15fc   : > { %v2520_v54 = vsel %vm536_vm10, %v2518_v29, %v2508_v56 }
0x15fd   : > { %v2521_v44 = vpack.c.bf16 %v2520_v54, %v2519_v40 }
0x15ff   : > { %v2523_v10 = vsel %vm1152_vm3, %v2521_v44, 0 }
0x1600   : > { %2532 = vmatpush.bf16.msra.mxu3 %v2523_v10 }
0x1601   : > { %v2566_v26 = vpop.permute.xlu0 %2565 }
0x1603   : > { %2744 = vmatmul.msk.bf16.vlgmr.msra.gmra.mxu3 %vm1148_vm8, %v3360_v52 }
0x1686   : > { %v2534_v39 = vpop.f32.mrf.mxu3 }
0x1687   : > { %v2538_v27 = vadd.f32 1e-06, %v2534_v39 }
0x1689   : > { %2540 = vrot.lane.b32.xlu1 %v2538_v27, %s2957_s21 }
0x168e   : > { %v2536_v2 = vpop.f32.mrf.mxu3 }
0x1691   : > { %2571 = vrot.lane.b32.xlu1 %v2569_v17, %s2957_s21 }
0x16fb   : > { %v2541_v21 = vpop.permute.xlu1 %2540 }
0x16fc   : > { %2940 = vrcp.f32 %v2541_v21  ;;  %v2554_v55 = vand.u32 2147483648, %v2541_v21  ;;  %v2552_v52 = vand.u32 2147483647, %v2541_v21  ;;  %vm2548_vm4 = vweird.f32 %v2541_v21 }
0x16fe   : > { %v2555_v59 = vor.u32 1.1754944e-38, %v2554_v55  ;;  %vm2553_vm3 = vcmp.eq.f32.partialorder %v2552_v52, 8.507059e+37 }
0x1702   : > { %v2941_v15 = vpop.eup %2940 }
0x1703   : > { %v2544_v0 = vmul.f32 %v2941_v15, %v2541_v21  ;;  %vm2549_vm0 = vweird.f32 %v2941_v15  ;;  %v2572_v50 = vpop.permute.xlu1 %2571 }
0x1704   : > { %vm2550_vm6 = vmor %vm2548_vm4, %vm2549_vm0 }
0x1705   : > { %v2545_v14 = vsub.f32 1.0, %v2544_v0 }
0x1707   : > { %v2546_v62 = vmul.f32 %v2941_v15, %v2545_v14 }
0x1709   : > { %v2547_v57 = vadd.f32 %v2941_v15, %v2546_v62 }
0x170b   : > { %v2551_v48 = vsel %vm2550_vm6, %v2941_v15, %v2547_v57 }
0x170c   : > { %v2556_v12 = vsel %vm2553_vm3, %v2555_v59, %v2551_v48 }
0x170d   : > { %v2557_v9 = vmul.f32 %v2556_v12, %v2534_v39 }
0x170f   : > { %2559 = vrot.lane.b32.xlu2 %v2557_v9, %s2957_s21 }
0x1769   : > { %v2560_v8 = vpop.permute.xlu2 %2559 }
0x176a   : > { %v2562_v31 = vadd.f32 %v2560_v8, %v3960_v47  ;;  %v2602_v47 = vld [vmem:[%s4018_s3 + $0x147] sm:$0xff] }
0x176b   : > { %2621 = vmatpush.msra.mxu0 %v2602_v47 }
0x176c   : > { %v2568_v5 = vmul.f32 %v2566_v26, %v2562_v31 }
0x176d   : > { %2622 = vmatpush.msra.mxu0 %v2601_v24 }
0x176e   : > { %v2574_v20 = vadd.f32 %v2572_v50, %v2568_v5 }
0x176f   : > { %2623 = vmatpush.msra.mxu0 %v2600_v37 }
0x1770   : > { %v2575_v25 = vmul.f32 0.5, %v2574_v20 }
0x1772   : > { %2942 = vtanh.f32 %v2575_v25 }
0x1773   : > { %2944 = vrcp.f32 %v2959_v35 }
0x1778   : > { %v2943_v19 = vpop.eup %2942 }
0x1779   : > { %v2577_v38 = vmul.f32 0.5, %v2943_v19  ;;  %v2945_v6 = vpop.eup %2944 }
0x177a   : > { %v2593_v34 = vmul.f32 4.0, %v2945_v6  ;;  %vm2597_vm8 = vweird.f32 %v2945_v6 }
0x177b   : > { %v2578_v43 = vadd.f32 0.5, %v2577_v38 }
0x177c   : > { %v2594_v53 = vsub.f32 1.0, %v2593_v34 }
0x177d   : > { %v2579_v36 = vmul.f32 %v2578_v43, %v2574_v20 }
0x177e   : > { %v2595_v1 = vmul.f32 %v2945_v6, %v2594_v53 }
0x177f   : > { %2581 = vrot.lane.b32.xlu2 %v2579_v36, %s2958_s28 }
0x1780   : > { %v2596_v32 = vadd.f32 %v2945_v6, %v2595_v1 }
0x1782   : > { %v2598_v13 = vsel %vm2597_vm8, %v2945_v6, %v2596_v32 }
0x17d9   : > { %v2582_v18 = vpop.permute.xlu2 %2581 }
0x17da   : > { %v2584_v33 = vadd.f32 %v2582_v18, %v3949_v46 }
0x17dc   : > { %v2585_v16 = vsel %vm360_vm2, %v2584_v33, 0.0  ;;  %vm2628_vm2 = vcmask 0  }
0x17dd   : > { %v2586_v28 = vrot.slane %v2585_v16, 4 }
0x17df   : > { %v2587_v42 = vadd.f32 %v2586_v28, %v2585_v16 }
0x17e1   : > { %v2588_v3 = vrot.slane %v2587_v42, 2 }
0x17e3   : > { %v2589_v23 = vadd.f32 %v2588_v3, %v2587_v42 }
0x17e5   : > { %v2590_v41 = vrot.slane %v2589_v23, 1 }
0x17e7   : > { %v2591_v60 = vadd.f32 %v2590_v41, %v2589_v23 }
0x17e9   : > { %v2599_v22 = vmul.f32 %v2598_v13, %v2591_v60 }
0x17eb   : > { %2745 = vmatmul.msk.f32.vlgmr.msra.gmra.mxu0 %vm536_vm10, %v2599_v22 }
0x1868   : > { %v2625_v46 = vpop.f32.mrf.mxu0 }
0x1869   : > { %v2626_v63 = vadd.f32 %v2625_v46, %v2604_v49 }
0x186b   : > { %2629 = vst.msk [vmem:[%s213_s5] sm:$0x1] %vm2628_vm2, %v2626_v63 }
0x186c PF: > { %s14_s15 = sadd.s32 1, %s2952_s15  }
0x186d   : > { %p11_p4 = scmp.ge.s32.totalorder %s14_s15, 4  }
0x186f   :  { %13 = sbr.rel (!%p11_p4) target bundleno = 1 (0x1), region = 69 }

</bundles_post_ra>
